<compile_context>
chip_gen: v6e
topology: v6e:2x2x1
jax: 0.10.0
libtpu: 0.0.40
codegen_flags: <defaults>
</compile_context>

<pallas_src>
import math

import jax
import jax.numpy as jnp
from jax.experimental import pallas as pl
from jax.experimental.pallas import tpu as pltpu

D_MODEL = 32
N_HEAD = 4
HEAD_DIM = D_MODEL // N_HEAD
P_DROP = 0.0          # dropout is identity
LN_EPS = 1e-5
NEG_INF = -1e30
SCALE = 1.0 / math.sqrt(D_MODEL / N_HEAD)


# ----------------------------- in-kernel helpers ----------------------------

def _layer_norm(z, gamma, beta):
    # LayerNorm with biased variance (PyTorch semantics), affine.
    mean = jnp.mean(z, axis=-1, keepdims=True)
    var = jnp.mean(jnp.square(z - mean), axis=-1, keepdims=True)
    return (z - mean) * jax.lax.rsqrt(var + LN_EPS) * gamma + beta


def _softmax_lastdim(s):
    m = jnp.max(s, axis=-1, keepdims=True)
    e = jnp.exp(s - m)
    return e * pl.reciprocal(jnp.sum(e, axis=-1, keepdims=True), approx=True)


def _attn_to_scratch(q, k, vt, yt_scratch, keep_mask):
    """Per-head attention; writes y_h^T into rows [h*Dh, (h+1)*Dh) of yt_scratch.

    q:  (Tq, D)   per-head slices taken along lanes
    k:  (Tkv, D)
    vt: (D, Tkv)  V already in transposed (feature-major) form
    yt_scratch: VMEM ref (D, Tq) == yT_all stacked head-major.
    """
    for h in range(N_HEAD):
        lo, hi = h * HEAD_DIM, (h + 1) * HEAD_DIM
        s = jnp.einsum('td,sd->ts', q[:, lo:hi], k[:, lo:hi],
                       preferred_element_type=jnp.float32) * SCALE
        if keep_mask is not None:
            s = jnp.where(keep_mask, s, NEG_INF)
        att = _softmax_lastdim(s)                          # (Tq, Tkv)
        # y_h^T[d, t] = sum_s V_h[s, d] * att[t, s]
        yt_scratch[lo:hi, :] = jnp.einsum('ds,ts->dt', vt[lo:hi, :], att,
                                          preferred_element_type=jnp.float32)


def _merged_out_proj(yt_scratch, wo, tq):
    """PyTorch-faithful head merge fused with the output projection.

    merged = reshape(yT_all, (Tq, D)) (row-major, the torch
    y.transpose(2,3).view(B,T_q,-1) quirk), and
      merged @ Wo = sum_a  yT_all[a::R, :] @ Wo[a*Tq:(a+1)*Tq, :],   R = D // Tq.
    The strided row blocks are read straight from the VMEM scratch.
    """
    d_model, d_out = wo.shape
    r = d_model // tq
    acc = None
    for a in range(r):
        ya = yt_scratch[pl.ds(a, tq, stride=r), :]                   # (Tq, Tq)
        term = jnp.dot(ya, wo[a * tq:(a + 1) * tq, :],
                       preferred_element_type=jnp.float32)           # (Tq, D_out)
        acc = term if acc is None else acc + term
    return acc


# ------------------------------- fused kernel --------------------------------

def _decoder_block_kernel(dec_ref, enc_ref,
                          wqk_s_ref, wvt_s_ref, wo_s_ref,
                          wq_c_ref, wk_c_ref, wvt_c_ref, wo_c_ref,
                          w1_ref, b1_ref, w2_ref, vecs_ref,
                          out_ref, yt_scratch):
    B, T_tgt, D = dec_ref.shape

    vecs = vecs_ref[...]
    ln1_g, ln1_b = vecs[0:1, :], vecs[1:2, :]
    ln2_g, ln2_b = vecs[2:3, :], vecs[3:4, :]
    ln3_g, ln3_b = vecs[4:5, :], vecs[5:6, :]
    fb2 = vecs[6:7, :]

    wqk_s = wqk_s_ref[...]
    wvt_s = wvt_s_ref[...]
    wo_s = wo_s_ref[...]
    wq_c = wq_c_ref[...]
    wk_c = wk_c_ref[...]
    wvt_c = wvt_c_ref[...]
    wo_c = wo_c_ref[...]
    w1 = w1_ref[...]
    b1 = b1_ref[...]
    w2 = w2_ref[...]

    # Causal mask, hoisted once (self-attention only).
    row = jax.lax.broadcasted_iota(jnp.int32, (T_tgt, T_tgt), 0)
    col = jax.lax.broadcasted_iota(jnp.int32, (T_tgt, T_tgt), 1)
    causal_keep = col <= row

    for b in range(B):                     # B is tiny & static; fully unrolled
        x = dec_ref[b]                     # (T_tgt, D)
        enc = enc_ref[b]                   # (T_src, D)

        # ---- causal self-attention + residual + LN1 ----
        qk = jnp.dot(x, wqk_s, preferred_element_type=jnp.float32)      # (T, 2D)
        vt = jnp.einsum('od,sd->os', wvt_s, x,
                        preferred_element_type=jnp.float32)             # (D, T)
        _attn_to_scratch(qk[:, :D], qk[:, D:], vt, yt_scratch, causal_keep)
        sa = _merged_out_proj(yt_scratch, wo_s, T_tgt)
        t1 = _layer_norm(x + sa, ln1_g, ln1_b)

        # ---- cross-attention + residual + LN2 ----
        q = jnp.dot(t1, wq_c, preferred_element_type=jnp.float32)
        k = jnp.dot(enc, wk_c, preferred_element_type=jnp.float32)
        vt_c = jnp.einsum('od,sd->os', wvt_c, enc,
                          preferred_element_type=jnp.float32)
        _attn_to_scratch(q, k, vt_c, yt_scratch, None)
        ca = _merged_out_proj(yt_scratch, wo_c, T_tgt)
        t2 = _layer_norm(t1 + ca, ln2_g, ln2_b)

        # ---- position-wise FFN + residual + LN3 ----
        h = jnp.maximum(
            jnp.dot(t2, w1, preferred_element_type=jnp.float32) + b1, 0.0)
        f = jnp.dot(h, w2, preferred_element_type=jnp.float32) + fb2
        out_ref[b] = _layer_norm(t2 + f, ln3_g, ln3_b)


# ------------------------------- wrapper -------------------------------------

def decoder_block(encoder_output, decoder_output, params):
    B, T_tgt, D = decoder_output.shape
    assert D == D_MODEL and D % T_tgt == 0, "merge trick assumes T_tgt | d_model"

    sa_p, ca_p, ffn = params["self_attn"], params["cross_attn"], params["ffn"]

    # Weight plumbing (tiny, folds into the graph): fuse self Q|K, pre-transpose
    # V weights so the kernel emits y^T with contract-last-dim matmuls only, and
    # pack all (D,) vectors into one operand.
    w_qk_self = jnp.concatenate([sa_p["wq"], sa_p["wk"]], axis=1)     # (D, 2D)
    wv_self_t = sa_p["wv"].T                                          # (D, D)
    wv_cross_t = ca_p["wv"].T
    vecs = jnp.stack([params["ln1_g"], params["ln1_b"],
                      params["ln2_g"], params["ln2_b"],
                      params["ln3_g"], params["ln3_b"],
                      ffn["b2"], jnp.zeros_like(ffn["b2"])], axis=0)  # (8, D)
    b1 = ffn["b1"].reshape(1, -1)                                     # (1, 4D)

    return pl.pallas_call(
        _decoder_block_kernel,
        out_shape=jax.ShapeDtypeStruct((B, T_tgt, D), jnp.float32),
        scratch_shapes=[pltpu.VMEM((D, T_tgt), jnp.float32)],   # yT_all scratch
    )(decoder_output, encoder_output,
      w_qk_self, wv_self_t, sa_p["wo"],
      ca_p["wq"], ca_p["wk"], wv_cross_t, ca_p["wo"],
      ffn["w1"], b1, ffn["w2"], vecs)


# --------------------------- pure-JAX reference ------------------------------

def decoder_block_ref(enc, dec, params):
    def mha(q_raw, kv_raw, p, causal):
        B, Tq, D = q_raw.shape
        Tkv = kv_raw.shape[1]
        H, Dh = N_HEAD, D // N_HEAD
        q = (q_raw @ p["wq"]).reshape(B, Tq, H, Dh).transpose(0, 2, 1, 3)
        k = (kv_raw @ p["wk"]).reshape(B, Tkv, H, Dh).transpose(0, 2, 1, 3)
        v = (kv_raw @ p["wv"]).reshape(B, Tkv, H, Dh).transpose(0, 2, 1, 3)
        s = jnp.einsum('bhtd,bhsd->bhts', q, k) / math.sqrt(D / H)
        if causal:
            mask = jnp.tril(jnp.ones((Tq, Tkv)))
            s = jnp.where(mask == 0, -jnp.inf, s)
        att = jax.nn.softmax(s, axis=-1)
        y = jnp.einsum('bhts,bhsd->bhtd', att, v)
        y = jnp.transpose(y, (0, 1, 3, 2)).reshape(B, Tq, D)  # faithful torch merge
        return y @ p["wo"]

    def ln(x, g, b):
        mu = x.mean(-1, keepdims=True)
        var = ((x - mu) ** 2).mean(-1, keepdims=True)
        return (x - mu) * jax.lax.rsqrt(var + LN_EPS) * g + b

    t = ln(dec + mha(dec, dec, params["self_attn"], True),
           params["ln1_g"], params["ln1_b"])
    t2 = ln(t + mha(t, enc, params["cross_attn"], False),
            params["ln2_g"], params["ln2_b"])
    f = (jnp.maximum(t2 @ params["ffn"]["w1"] + params["ffn"]["b1"], 0.0)
         @ params["ffn"]["w2"] + params["ffn"]["b2"])
    return ln(t2 + f, params["ln3_g"], params["ln3_b"])


# ------------------------------ params / main --------------------------------

def init_params(key, d_model):
    ks = jax.random.split(key, 12)

    def w(k, shape):
        return (0.02 * jax.random.normal(k, shape)).astype(jnp.float32)

    attn = lambda k0, k1, k2, k3: {
        "wq": w(k0, (d_model, d_model)), "wk": w(k1, (d_model, d_model)),
        "wv": w(k2, (d_model, d_model)), "wo": w(k3, (d_model, d_model))}
    return {
        "self_attn": attn(ks[0], ks[1], ks[2], ks[3]),
        "cross_attn": attn(ks[4], ks[5], ks[6], ks[7]),
        "ffn": {"w1": w(ks[8], (d_model, 4 * d_model)),
                "b1": jnp.zeros((4 * d_model,), jnp.float32),
                "w2": w(ks[9], (4 * d_model, d_model)),
                "b2": jnp.zeros((d_model,), jnp.float32)},
        "ln1_g": jnp.ones((d_model,), jnp.float32),
        "ln1_b": jnp.zeros((d_model,), jnp.float32),
        "ln2_g": jnp.ones((d_model,), jnp.float32),
        "ln2_b": jnp.zeros((d_model,), jnp.float32),
        "ln3_g": jnp.ones((d_model,), jnp.float32),
        "ln3_b": jnp.zeros((d_model,), jnp.float32),
    }


if __name__ == "__main__":
    key = jax.random.PRNGKey(0)
    k_enc, k_dec, k_par = jax.random.split(key, 3)
    B, T_src, T_tgt = 2, 8, 8
    encoder_output = jax.random.normal(k_enc, (B, T_src, D_MODEL), jnp.float32)
    decoder_output = jax.random.normal(k_dec, (B, T_tgt, D_MODEL), jnp.float32)
    params = init_params(k_par, D_MODEL)

    out = jax.jit(decoder_block)(encoder_output, decoder_output, params)
    out = jax.block_until_ready(out)
    ref = jax.jit(decoder_block_ref)(encoder_output, decoder_output, params)
    ref = jax.block_until_ready(ref)

    assert out.shape == (B, T_tgt, D_MODEL)
    assert bool(jnp.all(jnp.isfinite(out)))
    assert float(jnp.max(jnp.abs(out - ref))) < 1e-2
    print("KERNEL_OK")
</pallas_src>

<mosaic_0001>
module attributes {stable_mosaic.version = 11 : i64} {
  func.func @_decoder_block_kernel(%arg0: memref<2x8x32xf32, #tpu.memory_space<vmem>>, %arg1: memref<2x8x32xf32, #tpu.memory_space<vmem>>, %arg2: memref<32x64xf32, #tpu.memory_space<vmem>>, %arg3: memref<32x32xf32, #tpu.memory_space<vmem>>, %arg4: memref<32x32xf32, #tpu.memory_space<vmem>>, %arg5: memref<32x32xf32, #tpu.memory_space<vmem>>, %arg6: memref<32x32xf32, #tpu.memory_space<vmem>>, %arg7: memref<32x32xf32, #tpu.memory_space<vmem>>, %arg8: memref<32x32xf32, #tpu.memory_space<vmem>>, %arg9: memref<32x128xf32, #tpu.memory_space<vmem>>, %arg10: memref<1x128xf32, #tpu.memory_space<vmem>>, %arg11: memref<128x32xf32, #tpu.memory_space<vmem>>, %arg12: memref<8x32xf32, #tpu.memory_space<vmem>>, %arg13: memref<2x8x32xf32, #tpu.memory_space<vmem>>, %arg14: memref<32x8xf32, #tpu.memory_space<vmem>>) attributes {dimension_semantics = [], scalar_prefetch = 0 : i64, scratch_operands = 1 : i64, tpu.core_type = #tpu.core_type<tc>} {
    %c0 = arith.constant 0 : index
    %c0_0 = arith.constant 0 : index
    %0 = vector.load %arg12[%c0, %c0_0] : memref<8x32xf32, #tpu.memory_space<vmem>>, vector<8x32xf32>
    %1 = vector.extract_strided_slice %0 {offsets = [0, 0], sizes = [1, 32], strides = [1, 1]} : vector<8x32xf32> to vector<1x32xf32>
    %2 = vector.extract_strided_slice %0 {offsets = [1, 0], sizes = [1, 32], strides = [1, 1]} : vector<8x32xf32> to vector<1x32xf32>
    %3 = vector.extract_strided_slice %0 {offsets = [2, 0], sizes = [1, 32], strides = [1, 1]} : vector<8x32xf32> to vector<1x32xf32>
    %4 = vector.extract_strided_slice %0 {offsets = [3, 0], sizes = [1, 32], strides = [1, 1]} : vector<8x32xf32> to vector<1x32xf32>
    %5 = vector.extract_strided_slice %0 {offsets = [4, 0], sizes = [1, 32], strides = [1, 1]} : vector<8x32xf32> to vector<1x32xf32>
    %6 = vector.extract_strided_slice %0 {offsets = [5, 0], sizes = [1, 32], strides = [1, 1]} : vector<8x32xf32> to vector<1x32xf32>
    %7 = vector.extract_strided_slice %0 {offsets = [6, 0], sizes = [1, 32], strides = [1, 1]} : vector<8x32xf32> to vector<1x32xf32>
    %c0_1 = arith.constant 0 : index
    %c0_2 = arith.constant 0 : index
    %8 = vector.load %arg2[%c0_1, %c0_2] : memref<32x64xf32, #tpu.memory_space<vmem>>, vector<32x64xf32>
    %c0_3 = arith.constant 0 : index
    %c0_4 = arith.constant 0 : index
    %9 = vector.load %arg3[%c0_3, %c0_4] : memref<32x32xf32, #tpu.memory_space<vmem>>, vector<32x32xf32>
    %c0_5 = arith.constant 0 : index
    %c0_6 = arith.constant 0 : index
    %10 = vector.load %arg4[%c0_5, %c0_6] : memref<32x32xf32, #tpu.memory_space<vmem>>, vector<32x32xf32>
    %c0_7 = arith.constant 0 : index
    %c0_8 = arith.constant 0 : index
    %11 = vector.load %arg5[%c0_7, %c0_8] : memref<32x32xf32, #tpu.memory_space<vmem>>, vector<32x32xf32>
    %c0_9 = arith.constant 0 : index
    %c0_10 = arith.constant 0 : index
    %12 = vector.load %arg6[%c0_9, %c0_10] : memref<32x32xf32, #tpu.memory_space<vmem>>, vector<32x32xf32>
    %c0_11 = arith.constant 0 : index
    %c0_12 = arith.constant 0 : index
    %13 = vector.load %arg7[%c0_11, %c0_12] : memref<32x32xf32, #tpu.memory_space<vmem>>, vector<32x32xf32>
    %c0_13 = arith.constant 0 : index
    %c0_14 = arith.constant 0 : index
    %14 = vector.load %arg8[%c0_13, %c0_14] : memref<32x32xf32, #tpu.memory_space<vmem>>, vector<32x32xf32>
    %c0_15 = arith.constant 0 : index
    %c0_16 = arith.constant 0 : index
    %15 = vector.load %arg9[%c0_15, %c0_16] : memref<32x128xf32, #tpu.memory_space<vmem>>, vector<32x128xf32>
    %c0_17 = arith.constant 0 : index
    %c0_18 = arith.constant 0 : index
    %16 = vector.load %arg10[%c0_17, %c0_18] : memref<1x128xf32, #tpu.memory_space<vmem>>, vector<1x128xf32>
    %c0_19 = arith.constant 0 : index
    %c0_20 = arith.constant 0 : index
    %17 = vector.load %arg11[%c0_19, %c0_20] : memref<128x32xf32, #tpu.memory_space<vmem>>, vector<128x32xf32>
    %18 = tpu.iota {dimensions = array<i32: 0>} : vector<8x8xi32>
    %19 = tpu.iota {dimensions = array<i32: 1>} : vector<8x8xi32>
    %20 = arith.cmpi sle, %19, %18 : vector<8x8xi32>
    %c0_21 = arith.constant 0 : index
    %c0_22 = arith.constant 0 : index
    %c0_23 = arith.constant 0 : index
    %21 = vector.load %arg0[%c0_21, %c0_22, %c0_23] : memref<2x8x32xf32, #tpu.memory_space<vmem>>, vector<1x8x32xf32>
    %22 = vector.shape_cast %21 : vector<1x8x32xf32> to vector<8x32xf32>
    %c0_24 = arith.constant 0 : index
    %c0_25 = arith.constant 0 : index
    %c0_26 = arith.constant 0 : index
    %23 = vector.load %arg1[%c0_24, %c0_25, %c0_26] : memref<2x8x32xf32, #tpu.memory_space<vmem>>, vector<1x8x32xf32>
    %24 = vector.shape_cast %23 : vector<1x8x32xf32> to vector<8x32xf32>
    %cst = arith.constant dense<0.000000e+00> : vector<8x64xf32>
    %25 = tpu.matmul %22, %8, %cst {dimension_numbers = #tpu.dot_dimension_numbers<[1], [0], [0], [1], [0, 0, 1, 1], [], []>} : vector<8x32xf32>, vector<32x64xf32>, vector<8x64xf32> -> vector<8x64xf32>
    "tpu.trace_start"() <{level = 10 : i32, message = "od,sd->os"}> : () -> ()
    %cst_27 = arith.constant dense<0.000000e+00> : vector<32x8xf32>
    %26 = tpu.matmul %9, %22, %cst_27 {dimension_numbers = #tpu.dot_dimension_numbers<[1], [1], [0], [0], [0, 0, 1, 0], [], []>} : vector<32x32xf32>, vector<8x32xf32>, vector<32x8xf32> -> vector<32x8xf32>
    "tpu.trace_stop"() : () -> ()
    %27 = vector.extract_strided_slice %25 {offsets = [0, 0], sizes = [8, 32], strides = [1, 1]} : vector<8x64xf32> to vector<8x32xf32>
    %28 = vector.extract_strided_slice %25 {offsets = [0, 32], sizes = [8, 32], strides = [1, 1]} : vector<8x64xf32> to vector<8x32xf32>
    %29 = vector.extract_strided_slice %27 {offsets = [0, 0], sizes = [8, 8], strides = [1, 1]} : vector<8x32xf32> to vector<8x8xf32>
    %30 = vector.extract_strided_slice %28 {offsets = [0, 0], sizes = [8, 8], strides = [1, 1]} : vector<8x32xf32> to vector<8x8xf32>
    "tpu.trace_start"() <{level = 10 : i32, message = "td,sd->ts"}> : () -> ()
    %cst_28 = arith.constant dense<0.000000e+00> : vector<8x8xf32>
    %31 = tpu.matmul %29, %30, %cst_28 {dimension_numbers = #tpu.dot_dimension_numbers<[1], [1], [0], [0], [0, 0, 1, 0], [], []>} : vector<8x8xf32>, vector<8x8xf32>, vector<8x8xf32> -> vector<8x8xf32>
    "tpu.trace_stop"() : () -> ()
    %cst_29 = arith.constant 0.353553385 : f32
    %32 = vector.broadcast %cst_29 : f32 to vector<8x8xf32>
    %33 = arith.mulf %31, %32 : vector<8x8xf32>
    %cst_30 = arith.constant -1.000000e+30 : f32
    %34 = vector.broadcast %cst_30 : f32 to vector<8x8xf32>
    %35 = arith.select %20, %33, %34 : vector<8x8xi1>, vector<8x8xf32>
    %cst_31 = arith.constant dense<0xFF800000> : vector<8xf32>
    %36 = vector.multi_reduction <maximumf>, %35, %cst_31 [1] : vector<8x8xf32> to vector<8xf32>
    %37 = vector.shape_cast %36 : vector<8xf32> to vector<8x1xf32>
    %38 = vector.broadcast %37 : vector<8x1xf32> to vector<8x8xf32>
    %39 = arith.subf %35, %38 : vector<8x8xf32>
    %40 = math.exp %39 : vector<8x8xf32>
    %cst_32 = arith.constant dense<0.000000e+00> : vector<8xf32>
    %41 = vector.multi_reduction <add>, %40, %cst_32 [1] : vector<8x8xf32> to vector<8xf32>
    %42 = vector.shape_cast %41 : vector<8xf32> to vector<8x1xf32>
    %43 = tpu.reciprocal %42 {approx = true} : vector<8x1xf32> -> vector<8x1xf32>
    %44 = vector.broadcast %43 : vector<8x1xf32> to vector<8x8xf32>
    %45 = arith.mulf %40, %44 : vector<8x8xf32>
    %46 = vector.extract_strided_slice %26 {offsets = [0, 0], sizes = [8, 8], strides = [1, 1]} : vector<32x8xf32> to vector<8x8xf32>
    "tpu.trace_start"() <{level = 10 : i32, message = "ds,ts->dt"}> : () -> ()
    %cst_33 = arith.constant dense<0.000000e+00> : vector<8x8xf32>
    %47 = tpu.matmul %46, %45, %cst_33 {dimension_numbers = #tpu.dot_dimension_numbers<[1], [1], [0], [0], [0, 0, 1, 0], [], []>} : vector<8x8xf32>, vector<8x8xf32>, vector<8x8xf32> -> vector<8x8xf32>
    "tpu.trace_stop"() : () -> ()
    %c0_34 = arith.constant 0 : index
    %c0_35 = arith.constant 0 : index
    %48 = vector.load %arg14[%c0_34, %c0_35] : memref<32x8xf32, #tpu.memory_space<vmem>>, vector<8x8xf32>
    tpu.vector_store %arg14[%c0_34, %c0_35], %47 {strides = array<i32>} : memref<32x8xf32, #tpu.memory_space<vmem>>, vector<8x8xf32>,
    %49 = vector.extract_strided_slice %27 {offsets = [0, 8], sizes = [8, 8], strides = [1, 1]} : vector<8x32xf32> to vector<8x8xf32>
    %50 = vector.extract_strided_slice %28 {offsets = [0, 8], sizes = [8, 8], strides = [1, 1]} : vector<8x32xf32> to vector<8x8xf32>
    "tpu.trace_start"() <{level = 10 : i32, message = "td,sd->ts"}> : () -> ()
    %cst_36 = arith.constant dense<0.000000e+00> : vector<8x8xf32>
    %51 = tpu.matmul %49, %50, %cst_36 {dimension_numbers = #tpu.dot_dimension_numbers<[1], [1], [0], [0], [0, 0, 1, 0], [], []>} : vector<8x8xf32>, vector<8x8xf32>, vector<8x8xf32> -> vector<8x8xf32>
    "tpu.trace_stop"() : () -> ()
    %cst_37 = arith.constant 0.353553385 : f32
    %52 = vector.broadcast %cst_37 : f32 to vector<8x8xf32>
    %53 = arith.mulf %51, %52 : vector<8x8xf32>
    %cst_38 = arith.constant -1.000000e+30 : f32
    %54 = vector.broadcast %cst_38 : f32 to vector<8x8xf32>
    %55 = arith.select %20, %53, %54 : vector<8x8xi1>, vector<8x8xf32>
    %cst_39 = arith.constant dense<0xFF800000> : vector<8xf32>
    %56 = vector.multi_reduction <maximumf>, %55, %cst_39 [1] : vector<8x8xf32> to vector<8xf32>
    %57 = vector.shape_cast %56 : vector<8xf32> to vector<8x1xf32>
    %58 = vector.broadcast %57 : vector<8x1xf32> to vector<8x8xf32>
    %59 = arith.subf %55, %58 : vector<8x8xf32>
    %60 = math.exp %59 : vector<8x8xf32>
    %cst_40 = arith.constant dense<0.000000e+00> : vector<8xf32>
    %61 = vector.multi_reduction <add>, %60, %cst_40 [1] : vector<8x8xf32> to vector<8xf32>
    %62 = vector.shape_cast %61 : vector<8xf32> to vector<8x1xf32>
    %63 = tpu.reciprocal %62 {approx = true} : vector<8x1xf32> -> vector<8x1xf32>
    %64 = vector.broadcast %63 : vector<8x1xf32> to vector<8x8xf32>
    %65 = arith.mulf %60, %64 : vector<8x8xf32>
    %66 = vector.extract_strided_slice %26 {offsets = [8, 0], sizes = [8, 8], strides = [1, 1]} : vector<32x8xf32> to vector<8x8xf32>
    "tpu.trace_start"() <{level = 10 : i32, message = "ds,ts->dt"}> : () -> ()
    %cst_41 = arith.constant dense<0.000000e+00> : vector<8x8xf32>
    %67 = tpu.matmul %66, %65, %cst_41 {dimension_numbers = #tpu.dot_dimension_numbers<[1], [1], [0], [0], [0, 0, 1, 0], [], []>} : vector<8x8xf32>, vector<8x8xf32>, vector<8x8xf32> -> vector<8x8xf32>
    "tpu.trace_stop"() : () -> ()
    %c8 = arith.constant 8 : index
    %c0_42 = arith.constant 0 : index
    %68 = vector.load %arg14[%c8, %c0_42] : memref<32x8xf32, #tpu.memory_space<vmem>>, vector<8x8xf32>
    tpu.vector_store %arg14[%c8, %c0_42], %67 {strides = array<i32>} : memref<32x8xf32, #tpu.memory_space<vmem>>, vector<8x8xf32>,
    %69 = vector.extract_strided_slice %27 {offsets = [0, 16], sizes = [8, 8], strides = [1, 1]} : vector<8x32xf32> to vector<8x8xf32>
    %70 = vector.extract_strided_slice %28 {offsets = [0, 16], sizes = [8, 8], strides = [1, 1]} : vector<8x32xf32> to vector<8x8xf32>
    "tpu.trace_start"() <{level = 10 : i32, message = "td,sd->ts"}> : () -> ()
    %cst_43 = arith.constant dense<0.000000e+00> : vector<8x8xf32>
    %71 = tpu.matmul %69, %70, %cst_43 {dimension_numbers = #tpu.dot_dimension_numbers<[1], [1], [0], [0], [0, 0, 1, 0], [], []>} : vector<8x8xf32>, vector<8x8xf32>, vector<8x8xf32> -> vector<8x8xf32>
    "tpu.trace_stop"() : () -> ()
    %cst_44 = arith.constant 0.353553385 : f32
    %72 = vector.broadcast %cst_44 : f32 to vector<8x8xf32>
    %73 = arith.mulf %71, %72 : vector<8x8xf32>
    %cst_45 = arith.constant -1.000000e+30 : f32
    %74 = vector.broadcast %cst_45 : f32 to vector<8x8xf32>
    %75 = arith.select %20, %73, %74 : vector<8x8xi1>, vector<8x8xf32>
    %cst_46 = arith.constant dense<0xFF800000> : vector<8xf32>
    %76 = vector.multi_reduction <maximumf>, %75, %cst_46 [1] : vector<8x8xf32> to vector<8xf32>
    %77 = vector.shape_cast %76 : vector<8xf32> to vector<8x1xf32>
    %78 = vector.broadcast %77 : vector<8x1xf32> to vector<8x8xf32>
    %79 = arith.subf %75, %78 : vector<8x8xf32>
    %80 = math.exp %79 : vector<8x8xf32>
    %cst_47 = arith.constant dense<0.000000e+00> : vector<8xf32>
    %81 = vector.multi_reduction <add>, %80, %cst_47 [1] : vector<8x8xf32> to vector<8xf32>
    %82 = vector.shape_cast %81 : vector<8xf32> to vector<8x1xf32>
    %83 = tpu.reciprocal %82 {approx = true} : vector<8x1xf32> -> vector<8x1xf32>
    %84 = vector.broadcast %83 : vector<8x1xf32> to vector<8x8xf32>
    %85 = arith.mulf %80, %84 : vector<8x8xf32>
    %86 = vector.extract_strided_slice %26 {offsets = [16, 0], sizes = [8, 8], strides = [1, 1]} : vector<32x8xf32> to vector<8x8xf32>
    "tpu.trace_start"() <{level = 10 : i32, message = "ds,ts->dt"}> : () -> ()
    %cst_48 = arith.constant dense<0.000000e+00> : vector<8x8xf32>
    %87 = tpu.matmul %86, %85, %cst_48 {dimension_numbers = #tpu.dot_dimension_numbers<[1], [1], [0], [0], [0, 0, 1, 0], [], []>} : vector<8x8xf32>, vector<8x8xf32>, vector<8x8xf32> -> vector<8x8xf32>
    "tpu.trace_stop"() : () -> ()
    %c16 = arith.constant 16 : index
    %c0_49 = arith.constant 0 : index
    %88 = vector.load %arg14[%c16, %c0_49] : memref<32x8xf32, #tpu.memory_space<vmem>>, vector<8x8xf32>
    tpu.vector_store %arg14[%c16, %c0_49], %87 {strides = array<i32>} : memref<32x8xf32, #tpu.memory_space<vmem>>, vector<8x8xf32>,
    %89 = vector.extract_strided_slice %27 {offsets = [0, 24], sizes = [8, 8], strides = [1, 1]} : vector<8x32xf32> to vector<8x8xf32>
    %90 = vector.extract_strided_slice %28 {offsets = [0, 24], sizes = [8, 8], strides = [1, 1]} : vector<8x32xf32> to vector<8x8xf32>
    "tpu.trace_start"() <{level = 10 : i32, message = "td,sd->ts"}> : () -> ()
    %cst_50 = arith.constant dense<0.000000e+00> : vector<8x8xf32>
    %91 = tpu.matmul %89, %90, %cst_50 {dimension_numbers = #tpu.dot_dimension_numbers<[1], [1], [0], [0], [0, 0, 1, 0], [], []>} : vector<8x8xf32>, vector<8x8xf32>, vector<8x8xf32> -> vector<8x8xf32>
    "tpu.trace_stop"() : () -> ()
    %cst_51 = arith.constant 0.353553385 : f32
    %92 = vector.broadcast %cst_51 : f32 to vector<8x8xf32>
    %93 = arith.mulf %91, %92 : vector<8x8xf32>
    %cst_52 = arith.constant -1.000000e+30 : f32
    %94 = vector.broadcast %cst_52 : f32 to vector<8x8xf32>
    %95 = arith.select %20, %93, %94 : vector<8x8xi1>, vector<8x8xf32>
    %cst_53 = arith.constant dense<0xFF800000> : vector<8xf32>
    %96 = vector.multi_reduction <maximumf>, %95, %cst_53 [1] : vector<8x8xf32> to vector<8xf32>
    %97 = vector.shape_cast %96 : vector<8xf32> to vector<8x1xf32>
    %98 = vector.broadcast %97 : vector<8x1xf32> to vector<8x8xf32>
    %99 = arith.subf %95, %98 : vector<8x8xf32>
    %100 = math.exp %99 : vector<8x8xf32>
    %cst_54 = arith.constant dense<0.000000e+00> : vector<8xf32>
    %101 = vector.multi_reduction <add>, %100, %cst_54 [1] : vector<8x8xf32> to vector<8xf32>
    %102 = vector.shape_cast %101 : vector<8xf32> to vector<8x1xf32>
    %103 = tpu.reciprocal %102 {approx = true} : vector<8x1xf32> -> vector<8x1xf32>
    %104 = vector.broadcast %103 : vector<8x1xf32> to vector<8x8xf32>
    %105 = arith.mulf %100, %104 : vector<8x8xf32>
    %106 = vector.extract_strided_slice %26 {offsets = [24, 0], sizes = [8, 8], strides = [1, 1]} : vector<32x8xf32> to vector<8x8xf32>
    "tpu.trace_start"() <{level = 10 : i32, message = "ds,ts->dt"}> : () -> ()
    %cst_55 = arith.constant dense<0.000000e+00> : vector<8x8xf32>
    %107 = tpu.matmul %106, %105, %cst_55 {dimension_numbers = #tpu.dot_dimension_numbers<[1], [1], [0], [0], [0, 0, 1, 0], [], []>} : vector<8x8xf32>, vector<8x8xf32>, vector<8x8xf32> -> vector<8x8xf32>
    "tpu.trace_stop"() : () -> ()
    %c24 = arith.constant 24 : index
    %c0_56 = arith.constant 0 : index
    %108 = vector.load %arg14[%c24, %c0_56] : memref<32x8xf32, #tpu.memory_space<vmem>>, vector<8x8xf32>
    tpu.vector_store %arg14[%c24, %c0_56], %107 {strides = array<i32>} : memref<32x8xf32, #tpu.memory_space<vmem>>, vector<8x8xf32>,
    %c0_57 = arith.constant 0 : index
    %c0_58 = arith.constant 0 : index
    %109 = tpu.strided_load %arg14[%c0_57, %c0_58] {strides = array<i32: 4, 1>} : memref<32x8xf32, #tpu.memory_space<vmem>>, vector<8x8xf32>
    %110 = vector.extract_strided_slice %10 {offsets = [0, 0], sizes = [8, 32], strides = [1, 1]} : vector<32x32xf32> to vector<8x32xf32>
    %cst_59 = arith.constant dense<0.000000e+00> : vector<8x32xf32>
    %111 = tpu.matmul %109, %110, %cst_59 {dimension_numbers = #tpu.dot_dimension_numbers<[1], [0], [0], [1], [0, 0, 1, 1], [], []>} : vector<8x8xf32>, vector<8x32xf32>, vector<8x32xf32> -> vector<8x32xf32>
    %c1 = arith.constant 1 : index
    %c0_60 = arith.constant 0 : index
    %112 = tpu.strided_load %arg14[%c1, %c0_60] {strides = array<i32: 4, 1>} : memref<32x8xf32, #tpu.memory_space<vmem>>, vector<8x8xf32>
    %113 = vector.extract_strided_slice %10 {offsets = [8, 0], sizes = [8, 32], strides = [1, 1]} : vector<32x32xf32> to vector<8x32xf32>
    %cst_61 = arith.constant dense<0.000000e+00> : vector<8x32xf32>
    %114 = tpu.matmul %112, %113, %cst_61 {dimension_numbers = #tpu.dot_dimension_numbers<[1], [0], [0], [1], [0, 0, 1, 1], [], []>} : vector<8x8xf32>, vector<8x32xf32>, vector<8x32xf32> -> vector<8x32xf32>
    %115 = arith.addf %111, %114 : vector<8x32xf32>
    %c2 = arith.constant 2 : index
    %c0_62 = arith.constant 0 : index
    %116 = tpu.strided_load %arg14[%c2, %c0_62] {strides = array<i32: 4, 1>} : memref<32x8xf32, #tpu.memory_space<vmem>>, vector<8x8xf32>
    %117 = vector.extract_strided_slice %10 {offsets = [16, 0], sizes = [8, 32], strides = [1, 1]} : vector<32x32xf32> to vector<8x32xf32>
    %cst_63 = arith.constant dense<0.000000e+00> : vector<8x32xf32>
    %118 = tpu.matmul %116, %117, %cst_63 {dimension_numbers = #tpu.dot_dimension_numbers<[1], [0], [0], [1], [0, 0, 1, 1], [], []>} : vector<8x8xf32>, vector<8x32xf32>, vector<8x32xf32> -> vector<8x32xf32>
    %119 = arith.addf %115, %118 : vector<8x32xf32>
    %c3 = arith.constant 3 : index
    %c0_64 = arith.constant 0 : index
    %120 = tpu.strided_load %arg14[%c3, %c0_64] {strides = array<i32: 4, 1>} : memref<32x8xf32, #tpu.memory_space<vmem>>, vector<8x8xf32>
    %121 = vector.extract_strided_slice %10 {offsets = [24, 0], sizes = [8, 32], strides = [1, 1]} : vector<32x32xf32> to vector<8x32xf32>
    %cst_65 = arith.constant dense<0.000000e+00> : vector<8x32xf32>
    %122 = tpu.matmul %120, %121, %cst_65 {dimension_numbers = #tpu.dot_dimension_numbers<[1], [0], [0], [1], [0, 0, 1, 1], [], []>} : vector<8x8xf32>, vector<8x32xf32>, vector<8x32xf32> -> vector<8x32xf32>
    %123 = arith.addf %119, %122 : vector<8x32xf32>
    %124 = arith.addf %22, %123 : vector<8x32xf32>
    %cst_66 = arith.constant dense<0.000000e+00> : vector<8xf32>
    %125 = vector.multi_reduction <add>, %124, %cst_66 [1] : vector<8x32xf32> to vector<8xf32>
    %126 = vector.shape_cast %125 : vector<8xf32> to vector<8x1xf32>
    %cst_67 = arith.constant 3.200000e+01 : f32
    %127 = vector.broadcast %cst_67 : f32 to vector<8x1xf32>
    %128 = arith.divf %126, %127 : vector<8x1xf32>
    %129 = vector.broadcast %128 : vector<8x1xf32> to vector<8x32xf32>
    %130 = arith.subf %124, %129 : vector<8x32xf32>
    %131 = arith.mulf %130, %130 : vector<8x32xf32>
    %cst_68 = arith.constant dense<0.000000e+00> : vector<8xf32>
    %132 = vector.multi_reduction <add>, %131, %cst_68 [1] : vector<8x32xf32> to vector<8xf32>
    %133 = vector.shape_cast %132 : vector<8xf32> to vector<8x1xf32>
    %cst_69 = arith.constant 3.200000e+01 : f32
    %134 = vector.broadcast %cst_69 : f32 to vector<8x1xf32>
    %135 = arith.divf %133, %134 : vector<8x1xf32>
    %136 = vector.broadcast %128 : vector<8x1xf32> to vector<8x32xf32>
    %137 = arith.subf %124, %136 : vector<8x32xf32>
    %cst_70 = arith.constant 9.99999974E-6 : f32
    %138 = vector.broadcast %cst_70 : f32 to vector<8x1xf32>
    %139 = arith.addf %135, %138 : vector<8x1xf32>
    %140 = math.rsqrt %139 : vector<8x1xf32>
    %141 = vector.broadcast %140 : vector<8x1xf32> to vector<8x32xf32>
    %142 = arith.mulf %137, %141 : vector<8x32xf32>
    %143 = vector.broadcast %1 : vector<1x32xf32> to vector<8x32xf32>
    %144 = arith.mulf %142, %143 : vector<8x32xf32>
    %145 = vector.broadcast %2 : vector<1x32xf32> to vector<8x32xf32>
    %146 = arith.addf %144, %145 : vector<8x32xf32>
    %cst_71 = arith.constant dense<0.000000e+00> : vector<8x32xf32>
    %147 = tpu.matmul %146, %11, %cst_71 {dimension_numbers = #tpu.dot_dimension_numbers<[1], [0], [0], [1], [0, 0, 1, 1], [], []>} : vector<8x32xf32>, vector<32x32xf32>, vector<8x32xf32> -> vector<8x32xf32>
    %cst_72 = arith.constant dense<0.000000e+00> : vector<8x32xf32>
    %148 = tpu.matmul %24, %12, %cst_72 {dimension_numbers = #tpu.dot_dimension_numbers<[1], [0], [0], [1], [0, 0, 1, 1], [], []>} : vector<8x32xf32>, vector<32x32xf32>, vector<8x32xf32> -> vector<8x32xf32>
    "tpu.trace_start"() <{level = 10 : i32, message = "od,sd->os"}> : () -> ()
    %cst_73 = arith.constant dense<0.000000e+00> : vector<32x8xf32>
    %149 = tpu.matmul %13, %24, %cst_73 {dimension_numbers = #tpu.dot_dimension_numbers<[1], [1], [0], [0], [0, 0, 1, 0], [], []>} : vector<32x32xf32>, vector<8x32xf32>, vector<32x8xf32> -> vector<32x8xf32>
    "tpu.trace_stop"() : () -> ()
    %150 = vector.extract_strided_slice %147 {offsets = [0, 0], sizes = [8, 8], strides = [1, 1]} : vector<8x32xf32> to vector<8x8xf32>
    %151 = vector.extract_strided_slice %148 {offsets = [0, 0], sizes = [8, 8], strides = [1, 1]} : vector<8x32xf32> to vector<8x8xf32>
    "tpu.trace_start"() <{level = 10 : i32, message = "td,sd->ts"}> : () -> ()
    %cst_74 = arith.constant dense<0.000000e+00> : vector<8x8xf32>
    %152 = tpu.matmul %150, %151, %cst_74 {dimension_numbers = #tpu.dot_dimension_numbers<[1], [1], [0], [0], [0, 0, 1, 0], [], []>} : vector<8x8xf32>, vector<8x8xf32>, vector<8x8xf32> -> vector<8x8xf32>
    "tpu.trace_stop"() : () -> ()
    %cst_75 = arith.constant 0.353553385 : f32
    %153 = vector.broadcast %cst_75 : f32 to vector<8x8xf32>
    %154 = arith.mulf %152, %153 : vector<8x8xf32>
    %cst_76 = arith.constant dense<0xFF800000> : vector<8xf32>
    %155 = vector.multi_reduction <maximumf>, %154, %cst_76 [1] : vector<8x8xf32> to vector<8xf32>
    %156 = vector.shape_cast %155 : vector<8xf32> to vector<8x1xf32>
    %157 = vector.broadcast %156 : vector<8x1xf32> to vector<8x8xf32>
    %158 = arith.subf %154, %157 : vector<8x8xf32>
    %159 = math.exp %158 : vector<8x8xf32>
    %cst_77 = arith.constant dense<0.000000e+00> : vector<8xf32>
    %160 = vector.multi_reduction <add>, %159, %cst_77 [1] : vector<8x8xf32> to vector<8xf32>
    %161 = vector.shape_cast %160 : vector<8xf32> to vector<8x1xf32>
    %162 = tpu.reciprocal %161 {approx = true} : vector<8x1xf32> -> vector<8x1xf32>
    %163 = vector.broadcast %162 : vector<8x1xf32> to vector<8x8xf32>
    %164 = arith.mulf %159, %163 : vector<8x8xf32>
    %165 = vector.extract_strided_slice %149 {offsets = [0, 0], sizes = [8, 8], strides = [1, 1]} : vector<32x8xf32> to vector<8x8xf32>
    "tpu.trace_start"() <{level = 10 : i32, message = "ds,ts->dt"}> : () -> ()
    %cst_78 = arith.constant dense<0.000000e+00> : vector<8x8xf32>
    %166 = tpu.matmul %165, %164, %cst_78 {dimension_numbers = #tpu.dot_dimension_numbers<[1], [1], [0], [0], [0, 0, 1, 0], [], []>} : vector<8x8xf32>, vector<8x8xf32>, vector<8x8xf32> -> vector<8x8xf32>
    "tpu.trace_stop"() : () -> ()
    %c0_79 = arith.constant 0 : index
    %c0_80 = arith.constant 0 : index
    %167 = vector.load %arg14[%c0_79, %c0_80] : memref<32x8xf32, #tpu.memory_space<vmem>>, vector<8x8xf32>
    tpu.vector_store %arg14[%c0_79, %c0_80], %166 {strides = array<i32>} : memref<32x8xf32, #tpu.memory_space<vmem>>, vector<8x8xf32>,
    %168 = vector.extract_strided_slice %147 {offsets = [0, 8], sizes = [8, 8], strides = [1, 1]} : vector<8x32xf32> to vector<8x8xf32>
    %169 = vector.extract_strided_slice %148 {offsets = [0, 8], sizes = [8, 8], strides = [1, 1]} : vector<8x32xf32> to vector<8x8xf32>
    "tpu.trace_start"() <{level = 10 : i32, message = "td,sd->ts"}> : () -> ()
    %cst_81 = arith.constant dense<0.000000e+00> : vector<8x8xf32>
    %170 = tpu.matmul %168, %169, %cst_81 {dimension_numbers = #tpu.dot_dimension_numbers<[1], [1], [0], [0], [0, 0, 1, 0], [], []>} : vector<8x8xf32>, vector<8x8xf32>, vector<8x8xf32> -> vector<8x8xf32>
    "tpu.trace_stop"() : () -> ()
    %cst_82 = arith.constant 0.353553385 : f32
    %171 = vector.broadcast %cst_82 : f32 to vector<8x8xf32>
    %172 = arith.mulf %170, %171 : vector<8x8xf32>
    %cst_83 = arith.constant dense<0xFF800000> : vector<8xf32>
    %173 = vector.multi_reduction <maximumf>, %172, %cst_83 [1] : vector<8x8xf32> to vector<8xf32>
    %174 = vector.shape_cast %173 : vector<8xf32> to vector<8x1xf32>
    %175 = vector.broadcast %174 : vector<8x1xf32> to vector<8x8xf32>
    %176 = arith.subf %172, %175 : vector<8x8xf32>
    %177 = math.exp %176 : vector<8x8xf32>
    %cst_84 = arith.constant dense<0.000000e+00> : vector<8xf32>
    %178 = vector.multi_reduction <add>, %177, %cst_84 [1] : vector<8x8xf32> to vector<8xf32>
    %179 = vector.shape_cast %178 : vector<8xf32> to vector<8x1xf32>
    %180 = tpu.reciprocal %179 {approx = true} : vector<8x1xf32> -> vector<8x1xf32>
    %181 = vector.broadcast %180 : vector<8x1xf32> to vector<8x8xf32>
    %182 = arith.mulf %177, %181 : vector<8x8xf32>
    %183 = vector.extract_strided_slice %149 {offsets = [8, 0], sizes = [8, 8], strides = [1, 1]} : vector<32x8xf32> to vector<8x8xf32>
    "tpu.trace_start"() <{level = 10 : i32, message = "ds,ts->dt"}> : () -> ()
    %cst_85 = arith.constant dense<0.000000e+00> : vector<8x8xf32>
    %184 = tpu.matmul %183, %182, %cst_85 {dimension_numbers = #tpu.dot_dimension_numbers<[1], [1], [0], [0], [0, 0, 1, 0], [], []>} : vector<8x8xf32>, vector<8x8xf32>, vector<8x8xf32> -> vector<8x8xf32>
    "tpu.trace_stop"() : () -> ()
    %c8_86 = arith.constant 8 : index
    %c0_87 = arith.constant 0 : index
    %185 = vector.load %arg14[%c8_86, %c0_87] : memref<32x8xf32, #tpu.memory_space<vmem>>, vector<8x8xf32>
    tpu.vector_store %arg14[%c8_86, %c0_87], %184 {strides = array<i32>} : memref<32x8xf32, #tpu.memory_space<vmem>>, vector<8x8xf32>,
    %186 = vector.extract_strided_slice %147 {offsets = [0, 16], sizes = [8, 8], strides = [1, 1]} : vector<8x32xf32> to vector<8x8xf32>
    %187 = vector.extract_strided_slice %148 {offsets = [0, 16], sizes = [8, 8], strides = [1, 1]} : vector<8x32xf32> to vector<8x8xf32>
    "tpu.trace_start"() <{level = 10 : i32, message = "td,sd->ts"}> : () -> ()
    %cst_88 = arith.constant dense<0.000000e+00> : vector<8x8xf32>
    %188 = tpu.matmul %186, %187, %cst_88 {dimension_numbers = #tpu.dot_dimension_numbers<[1], [1], [0], [0], [0, 0, 1, 0], [], []>} : vector<8x8xf32>, vector<8x8xf32>, vector<8x8xf32> -> vector<8x8xf32>
    "tpu.trace_stop"() : () -> ()
    %cst_89 = arith.constant 0.353553385 : f32
    %189 = vector.broadcast %cst_89 : f32 to vector<8x8xf32>
    %190 = arith.mulf %188, %189 : vector<8x8xf32>
    %cst_90 = arith.constant dense<0xFF800000> : vector<8xf32>
    %191 = vector.multi_reduction <maximumf>, %190, %cst_90 [1] : vector<8x8xf32> to vector<8xf32>
    %192 = vector.shape_cast %191 : vector<8xf32> to vector<8x1xf32>
    %193 = vector.broadcast %192 : vector<8x1xf32> to vector<8x8xf32>
    %194 = arith.subf %190, %193 : vector<8x8xf32>
    %195 = math.exp %194 : vector<8x8xf32>
    %cst_91 = arith.constant dense<0.000000e+00> : vector<8xf32>
    %196 = vector.multi_reduction <add>, %195, %cst_91 [1] : vector<8x8xf32> to vector<8xf32>
    %197 = vector.shape_cast %196 : vector<8xf32> to vector<8x1xf32>
    %198 = tpu.reciprocal %197 {approx = true} : vector<8x1xf32> -> vector<8x1xf32>
    %199 = vector.broadcast %198 : vector<8x1xf32> to vector<8x8xf32>
    %200 = arith.mulf %195, %199 : vector<8x8xf32>
    %201 = vector.extract_strided_slice %149 {offsets = [16, 0], sizes = [8, 8], strides = [1, 1]} : vector<32x8xf32> to vector<8x8xf32>
    "tpu.trace_start"() <{level = 10 : i32, message = "ds,ts->dt"}> : () -> ()
    %cst_92 = arith.constant dense<0.000000e+00> : vector<8x8xf32>
    %202 = tpu.matmul %201, %200, %cst_92 {dimension_numbers = #tpu.dot_dimension_numbers<[1], [1], [0], [0], [0, 0, 1, 0], [], []>} : vector<8x8xf32>, vector<8x8xf32>, vector<8x8xf32> -> vector<8x8xf32>
    "tpu.trace_stop"() : () -> ()
    %c16_93 = arith.constant 16 : index
    %c0_94 = arith.constant 0 : index
    %203 = vector.load %arg14[%c16_93, %c0_94] : memref<32x8xf32, #tpu.memory_space<vmem>>, vector<8x8xf32>
    tpu.vector_store %arg14[%c16_93, %c0_94], %202 {strides = array<i32>} : memref<32x8xf32, #tpu.memory_space<vmem>>, vector<8x8xf32>,
    %204 = vector.extract_strided_slice %147 {offsets = [0, 24], sizes = [8, 8], strides = [1, 1]} : vector<8x32xf32> to vector<8x8xf32>
    %205 = vector.extract_strided_slice %148 {offsets = [0, 24], sizes = [8, 8], strides = [1, 1]} : vector<8x32xf32> to vector<8x8xf32>
    "tpu.trace_start"() <{level = 10 : i32, message = "td,sd->ts"}> : () -> ()
    %cst_95 = arith.constant dense<0.000000e+00> : vector<8x8xf32>
    %206 = tpu.matmul %204, %205, %cst_95 {dimension_numbers = #tpu.dot_dimension_numbers<[1], [1], [0], [0], [0, 0, 1, 0], [], []>} : vector<8x8xf32>, vector<8x8xf32>, vector<8x8xf32> -> vector<8x8xf32>
    "tpu.trace_stop"() : () -> ()
    %cst_96 = arith.constant 0.353553385 : f32
    %207 = vector.broadcast %cst_96 : f32 to vector<8x8xf32>
    %208 = arith.mulf %206, %207 : vector<8x8xf32>
    %cst_97 = arith.constant dense<0xFF800000> : vector<8xf32>
    %209 = vector.multi_reduction <maximumf>, %208, %cst_97 [1] : vector<8x8xf32> to vector<8xf32>
    %210 = vector.shape_cast %209 : vector<8xf32> to vector<8x1xf32>
    %211 = vector.broadcast %210 : vector<8x1xf32> to vector<8x8xf32>
    %212 = arith.subf %208, %211 : vector<8x8xf32>
    %213 = math.exp %212 : vector<8x8xf32>
    %cst_98 = arith.constant dense<0.000000e+00> : vector<8xf32>
    %214 = vector.multi_reduction <add>, %213, %cst_98 [1] : vector<8x8xf32> to vector<8xf32>
    %215 = vector.shape_cast %214 : vector<8xf32> to vector<8x1xf32>
    %216 = tpu.reciprocal %215 {approx = true} : vector<8x1xf32> -> vector<8x1xf32>
    %217 = vector.broadcast %216 : vector<8x1xf32> to vector<8x8xf32>
    %218 = arith.mulf %213, %217 : vector<8x8xf32>
    %219 = vector.extract_strided_slice %149 {offsets = [24, 0], sizes = [8, 8], strides = [1, 1]} : vector<32x8xf32> to vector<8x8xf32>
    "tpu.trace_start"() <{level = 10 : i32, message = "ds,ts->dt"}> : () -> ()
    %cst_99 = arith.constant dense<0.000000e+00> : vector<8x8xf32>
    %220 = tpu.matmul %219, %218, %cst_99 {dimension_numbers = #tpu.dot_dimension_numbers<[1], [1], [0], [0], [0, 0, 1, 0], [], []>} : vector<8x8xf32>, vector<8x8xf32>, vector<8x8xf32> -> vector<8x8xf32>
    "tpu.trace_stop"() : () -> ()
    %c24_100 = arith.constant 24 : index
    %c0_101 = arith.constant 0 : index
    %221 = vector.load %arg14[%c24_100, %c0_101] : memref<32x8xf32, #tpu.memory_space<vmem>>, vector<8x8xf32>
    tpu.vector_store %arg14[%c24_100, %c0_101], %220 {strides = array<i32>} : memref<32x8xf32, #tpu.memory_space<vmem>>, vector<8x8xf32>,
    %c0_102 = arith.constant 0 : index
    %c0_103 = arith.constant 0 : index
    %222 = tpu.strided_load %arg14[%c0_102, %c0_103] {strides = array<i32: 4, 1>} : memref<32x8xf32, #tpu.memory_space<vmem>>, vector<8x8xf32>
    %223 = vector.extract_strided_slice %14 {offsets = [0, 0], sizes = [8, 32], strides = [1, 1]} : vector<32x32xf32> to vector<8x32xf32>
    %cst_104 = arith.constant dense<0.000000e+00> : vector<8x32xf32>
    %224 = tpu.matmul %222, %223, %cst_104 {dimension_numbers = #tpu.dot_dimension_numbers<[1], [0], [0], [1], [0, 0, 1, 1], [], []>} : vector<8x8xf32>, vector<8x32xf32>, vector<8x32xf32> -> vector<8x32xf32>
    %c1_105 = arith.constant 1 : index
    %c0_106 = arith.constant 0 : index
    %225 = tpu.strided_load %arg14[%c1_105, %c0_106] {strides = array<i32: 4, 1>} : memref<32x8xf32, #tpu.memory_space<vmem>>, vector<8x8xf32>
    %226 = vector.extract_strided_slice %14 {offsets = [8, 0], sizes = [8, 32], strides = [1, 1]} : vector<32x32xf32> to vector<8x32xf32>
    %cst_107 = arith.constant dense<0.000000e+00> : vector<8x32xf32>
    %227 = tpu.matmul %225, %226, %cst_107 {dimension_numbers = #tpu.dot_dimension_numbers<[1], [0], [0], [1], [0, 0, 1, 1], [], []>} : vector<8x8xf32>, vector<8x32xf32>, vector<8x32xf32> -> vector<8x32xf32>
    %228 = arith.addf %224, %227 : vector<8x32xf32>
    %c2_108 = arith.constant 2 : index
    %c0_109 = arith.constant 0 : index
    %229 = tpu.strided_load %arg14[%c2_108, %c0_109] {strides = array<i32: 4, 1>} : memref<32x8xf32, #tpu.memory_space<vmem>>, vector<8x8xf32>
    %230 = vector.extract_strided_slice %14 {offsets = [16, 0], sizes = [8, 32], strides = [1, 1]} : vector<32x32xf32> to vector<8x32xf32>
    %cst_110 = arith.constant dense<0.000000e+00> : vector<8x32xf32>
    %231 = tpu.matmul %229, %230, %cst_110 {dimension_numbers = #tpu.dot_dimension_numbers<[1], [0], [0], [1], [0, 0, 1, 1], [], []>} : vector<8x8xf32>, vector<8x32xf32>, vector<8x32xf32> -> vector<8x32xf32>
    %232 = arith.addf %228, %231 : vector<8x32xf32>
    %c3_111 = arith.constant 3 : index
    %c0_112 = arith.constant 0 : index
    %233 = tpu.strided_load %arg14[%c3_111, %c0_112] {strides = array<i32: 4, 1>} : memref<32x8xf32, #tpu.memory_space<vmem>>, vector<8x8xf32>
    %234 = vector.extract_strided_slice %14 {offsets = [24, 0], sizes = [8, 32], strides = [1, 1]} : vector<32x32xf32> to vector<8x32xf32>
    %cst_113 = arith.constant dense<0.000000e+00> : vector<8x32xf32>
    %235 = tpu.matmul %233, %234, %cst_113 {dimension_numbers = #tpu.dot_dimension_numbers<[1], [0], [0], [1], [0, 0, 1, 1], [], []>} : vector<8x8xf32>, vector<8x32xf32>, vector<8x32xf32> -> vector<8x32xf32>
    %236 = arith.addf %232, %235 : vector<8x32xf32>
    %237 = arith.addf %146, %236 : vector<8x32xf32>
    %cst_114 = arith.constant dense<0.000000e+00> : vector<8xf32>
    %238 = vector.multi_reduction <add>, %237, %cst_114 [1] : vector<8x32xf32> to vector<8xf32>
    %239 = vector.shape_cast %238 : vector<8xf32> to vector<8x1xf32>
    %cst_115 = arith.constant 3.200000e+01 : f32
    %240 = vector.broadcast %cst_115 : f32 to vector<8x1xf32>
    %241 = arith.divf %239, %240 : vector<8x1xf32>
    %242 = vector.broadcast %241 : vector<8x1xf32> to vector<8x32xf32>
    %243 = arith.subf %237, %242 : vector<8x32xf32>
    %244 = arith.mulf %243, %243 : vector<8x32xf32>
    %cst_116 = arith.constant dense<0.000000e+00> : vector<8xf32>
    %245 = vector.multi_reduction <add>, %244, %cst_116 [1] : vector<8x32xf32> to vector<8xf32>
    %246 = vector.shape_cast %245 : vector<8xf32> to vector<8x1xf32>
    %cst_117 = arith.constant 3.200000e+01 : f32
    %247 = vector.broadcast %cst_117 : f32 to vector<8x1xf32>
    %248 = arith.divf %246, %247 : vector<8x1xf32>
    %249 = vector.broadcast %241 : vector<8x1xf32> to vector<8x32xf32>
    %250 = arith.subf %237, %249 : vector<8x32xf32>
    %cst_118 = arith.constant 9.99999974E-6 : f32
    %251 = vector.broadcast %cst_118 : f32 to vector<8x1xf32>
    %252 = arith.addf %248, %251 : vector<8x1xf32>
    %253 = math.rsqrt %252 : vector<8x1xf32>
    %254 = vector.broadcast %253 : vector<8x1xf32> to vector<8x32xf32>
    %255 = arith.mulf %250, %254 : vector<8x32xf32>
    %256 = vector.broadcast %3 : vector<1x32xf32> to vector<8x32xf32>
    %257 = arith.mulf %255, %256 : vector<8x32xf32>
    %258 = vector.broadcast %4 : vector<1x32xf32> to vector<8x32xf32>
    %259 = arith.addf %257, %258 : vector<8x32xf32>
    %cst_119 = arith.constant dense<0.000000e+00> : vector<8x128xf32>
    %260 = tpu.matmul %259, %15, %cst_119 {dimension_numbers = #tpu.dot_dimension_numbers<[1], [0], [0], [1], [0, 0, 1, 1], [], []>} : vector<8x32xf32>, vector<32x128xf32>, vector<8x128xf32> -> vector<8x128xf32>
    %261 = vector.broadcast %16 : vector<1x128xf32> to vector<8x128xf32>
    %262 = arith.addf %260, %261 : vector<8x128xf32>
    %cst_120 = arith.constant 0.000000e+00 : f32
    %263 = vector.broadcast %cst_120 : f32 to vector<8x128xf32>
    %264 = arith.maximumf %262, %263 : vector<8x128xf32>
    %cst_121 = arith.constant dense<0.000000e+00> : vector<8x32xf32>
    %265 = tpu.matmul %264, %17, %cst_121 {dimension_numbers = #tpu.dot_dimension_numbers<[1], [0], [0], [1], [0, 0, 1, 1], [], []>} : vector<8x128xf32>, vector<128x32xf32>, vector<8x32xf32> -> vector<8x32xf32>
    %266 = vector.broadcast %7 : vector<1x32xf32> to vector<8x32xf32>
    %267 = arith.addf %265, %266 : vector<8x32xf32>
    %268 = arith.addf %259, %267 : vector<8x32xf32>
    %cst_122 = arith.constant dense<0.000000e+00> : vector<8xf32>
    %269 = vector.multi_reduction <add>, %268, %cst_122 [1] : vector<8x32xf32> to vector<8xf32>
    %270 = vector.shape_cast %269 : vector<8xf32> to vector<8x1xf32>
    %cst_123 = arith.constant 3.200000e+01 : f32
    %271 = vector.broadcast %cst_123 : f32 to vector<8x1xf32>
    %272 = arith.divf %270, %271 : vector<8x1xf32>
    %273 = vector.broadcast %272 : vector<8x1xf32> to vector<8x32xf32>
    %274 = arith.subf %268, %273 : vector<8x32xf32>
    %275 = arith.mulf %274, %274 : vector<8x32xf32>
    %cst_124 = arith.constant dense<0.000000e+00> : vector<8xf32>
    %276 = vector.multi_reduction <add>, %275, %cst_124 [1] : vector<8x32xf32> to vector<8xf32>
    %277 = vector.shape_cast %276 : vector<8xf32> to vector<8x1xf32>
    %cst_125 = arith.constant 3.200000e+01 : f32
    %278 = vector.broadcast %cst_125 : f32 to vector<8x1xf32>
    %279 = arith.divf %277, %278 : vector<8x1xf32>
    %280 = vector.broadcast %272 : vector<8x1xf32> to vector<8x32xf32>
    %281 = arith.subf %268, %280 : vector<8x32xf32>
    %cst_126 = arith.constant 9.99999974E-6 : f32
    %282 = vector.broadcast %cst_126 : f32 to vector<8x1xf32>
    %283 = arith.addf %279, %282 : vector<8x1xf32>
    %284 = math.rsqrt %283 : vector<8x1xf32>
    %285 = vector.broadcast %284 : vector<8x1xf32> to vector<8x32xf32>
    %286 = arith.mulf %281, %285 : vector<8x32xf32>
    %287 = vector.broadcast %5 : vector<1x32xf32> to vector<8x32xf32>
    %288 = arith.mulf %286, %287 : vector<8x32xf32>
    %289 = vector.broadcast %6 : vector<1x32xf32> to vector<8x32xf32>
    %290 = arith.addf %288, %289 : vector<8x32xf32>
    %c0_127 = arith.constant 0 : index
    %c0_128 = arith.constant 0 : index
    %c0_129 = arith.constant 0 : index
    %291 = vector.load %arg13[%c0_127, %c0_128, %c0_129] : memref<2x8x32xf32, #tpu.memory_space<vmem>>, vector<1x8x32xf32>
    %292 = vector.shape_cast %291 : vector<1x8x32xf32> to vector<8x32xf32>
    %293 = vector.shape_cast %290 : vector<8x32xf32> to vector<1x8x32xf32>
    tpu.vector_store %arg13[%c0_127, %c0_128, %c0_129], %293 {strides = array<i32>} : memref<2x8x32xf32, #tpu.memory_space<vmem>>, vector<1x8x32xf32>,
    %c1_130 = arith.constant 1 : index
    %c0_131 = arith.constant 0 : index
    %c0_132 = arith.constant 0 : index
    %294 = vector.load %arg0[%c1_130, %c0_131, %c0_132] : memref<2x8x32xf32, #tpu.memory_space<vmem>>, vector<1x8x32xf32>
    %295 = vector.shape_cast %294 : vector<1x8x32xf32> to vector<8x32xf32>
    %c1_133 = arith.constant 1 : index
    %c0_134 = arith.constant 0 : index
    %c0_135 = arith.constant 0 : index
    %296 = vector.load %arg1[%c1_133, %c0_134, %c0_135] : memref<2x8x32xf32, #tpu.memory_space<vmem>>, vector<1x8x32xf32>
    %297 = vector.shape_cast %296 : vector<1x8x32xf32> to vector<8x32xf32>
    %cst_136 = arith.constant dense<0.000000e+00> : vector<8x64xf32>
    %298 = tpu.matmul %295, %8, %cst_136 {dimension_numbers = #tpu.dot_dimension_numbers<[1], [0], [0], [1], [0, 0, 1, 1], [], []>} : vector<8x32xf32>, vector<32x64xf32>, vector<8x64xf32> -> vector<8x64xf32>
    "tpu.trace_start"() <{level = 10 : i32, message = "od,sd->os"}> : () -> ()
    %cst_137 = arith.constant dense<0.000000e+00> : vector<32x8xf32>
    %299 = tpu.matmul %9, %295, %cst_137 {dimension_numbers = #tpu.dot_dimension_numbers<[1], [1], [0], [0], [0, 0, 1, 0], [], []>} : vector<32x32xf32>, vector<8x32xf32>, vector<32x8xf32> -> vector<32x8xf32>
    "tpu.trace_stop"() : () -> ()
    %300 = vector.extract_strided_slice %298 {offsets = [0, 0], sizes = [8, 32], strides = [1, 1]} : vector<8x64xf32> to vector<8x32xf32>
    %301 = vector.extract_strided_slice %298 {offsets = [0, 32], sizes = [8, 32], strides = [1, 1]} : vector<8x64xf32> to vector<8x32xf32>
    %302 = vector.extract_strided_slice %300 {offsets = [0, 0], sizes = [8, 8], strides = [1, 1]} : vector<8x32xf32> to vector<8x8xf32>
    %303 = vector.extract_strided_slice %301 {offsets = [0, 0], sizes = [8, 8], strides = [1, 1]} : vector<8x32xf32> to vector<8x8xf32>
    "tpu.trace_start"() <{level = 10 : i32, message = "td,sd->ts"}> : () -> ()
    %cst_138 = arith.constant dense<0.000000e+00> : vector<8x8xf32>
    %304 = tpu.matmul %302, %303, %cst_138 {dimension_numbers = #tpu.dot_dimension_numbers<[1], [1], [0], [0], [0, 0, 1, 0], [], []>} : vector<8x8xf32>, vector<8x8xf32>, vector<8x8xf32> -> vector<8x8xf32>
    "tpu.trace_stop"() : () -> ()
    %cst_139 = arith.constant 0.353553385 : f32
    %305 = vector.broadcast %cst_139 : f32 to vector<8x8xf32>
    %306 = arith.mulf %304, %305 : vector<8x8xf32>
    %cst_140 = arith.constant -1.000000e+30 : f32
    %307 = vector.broadcast %cst_140 : f32 to vector<8x8xf32>
    %308 = arith.select %20, %306, %307 : vector<8x8xi1>, vector<8x8xf32>
    %cst_141 = arith.constant dense<0xFF800000> : vector<8xf32>
    %309 = vector.multi_reduction <maximumf>, %308, %cst_141 [1] : vector<8x8xf32> to vector<8xf32>
    %310 = vector.shape_cast %309 : vector<8xf32> to vector<8x1xf32>
    %311 = vector.broadcast %310 : vector<8x1xf32> to vector<8x8xf32>
    %312 = arith.subf %308, %311 : vector<8x8xf32>
    %313 = math.exp %312 : vector<8x8xf32>
    %cst_142 = arith.constant dense<0.000000e+00> : vector<8xf32>
    %314 = vector.multi_reduction <add>, %313, %cst_142 [1] : vector<8x8xf32> to vector<8xf32>
    %315 = vector.shape_cast %314 : vector<8xf32> to vector<8x1xf32>
    %316 = tpu.reciprocal %315 {approx = true} : vector<8x1xf32> -> vector<8x1xf32>
    %317 = vector.broadcast %316 : vector<8x1xf32> to vector<8x8xf32>
    %318 = arith.mulf %313, %317 : vector<8x8xf32>
    %319 = vector.extract_strided_slice %299 {offsets = [0, 0], sizes = [8, 8], strides = [1, 1]} : vector<32x8xf32> to vector<8x8xf32>
    "tpu.trace_start"() <{level = 10 : i32, message = "ds,ts->dt"}> : () -> ()
    %cst_143 = arith.constant dense<0.000000e+00> : vector<8x8xf32>
    %320 = tpu.matmul %319, %318, %cst_143 {dimension_numbers = #tpu.dot_dimension_numbers<[1], [1], [0], [0], [0, 0, 1, 0], [], []>} : vector<8x8xf32>, vector<8x8xf32>, vector<8x8xf32> -> vector<8x8xf32>
    "tpu.trace_stop"() : () -> ()
    %c0_144 = arith.constant 0 : index
    %c0_145 = arith.constant 0 : index
    %321 = vector.load %arg14[%c0_144, %c0_145] : memref<32x8xf32, #tpu.memory_space<vmem>>, vector<8x8xf32>
    tpu.vector_store %arg14[%c0_144, %c0_145], %320 {strides = array<i32>} : memref<32x8xf32, #tpu.memory_space<vmem>>, vector<8x8xf32>,
    %322 = vector.extract_strided_slice %300 {offsets = [0, 8], sizes = [8, 8], strides = [1, 1]} : vector<8x32xf32> to vector<8x8xf32>
    %323 = vector.extract_strided_slice %301 {offsets = [0, 8], sizes = [8, 8], strides = [1, 1]} : vector<8x32xf32> to vector<8x8xf32>
    "tpu.trace_start"() <{level = 10 : i32, message = "td,sd->ts"}> : () -> ()
    %cst_146 = arith.constant dense<0.000000e+00> : vector<8x8xf32>
    %324 = tpu.matmul %322, %323, %cst_146 {dimension_numbers = #tpu.dot_dimension_numbers<[1], [1], [0], [0], [0, 0, 1, 0], [], []>} : vector<8x8xf32>, vector<8x8xf32>, vector<8x8xf32> -> vector<8x8xf32>
    "tpu.trace_stop"() : () -> ()
    %cst_147 = arith.constant 0.353553385 : f32
    %325 = vector.broadcast %cst_147 : f32 to vector<8x8xf32>
    %326 = arith.mulf %324, %325 : vector<8x8xf32>
    %cst_148 = arith.constant -1.000000e+30 : f32
    %327 = vector.broadcast %cst_148 : f32 to vector<8x8xf32>
    %328 = arith.select %20, %326, %327 : vector<8x8xi1>, vector<8x8xf32>
    %cst_149 = arith.constant dense<0xFF800000> : vector<8xf32>
    %329 = vector.multi_reduction <maximumf>, %328, %cst_149 [1] : vector<8x8xf32> to vector<8xf32>
    %330 = vector.shape_cast %329 : vector<8xf32> to vector<8x1xf32>
    %331 = vector.broadcast %330 : vector<8x1xf32> to vector<8x8xf32>
    %332 = arith.subf %328, %331 : vector<8x8xf32>
    %333 = math.exp %332 : vector<8x8xf32>
    %cst_150 = arith.constant dense<0.000000e+00> : vector<8xf32>
    %334 = vector.multi_reduction <add>, %333, %cst_150 [1] : vector<8x8xf32> to vector<8xf32>
    %335 = vector.shape_cast %334 : vector<8xf32> to vector<8x1xf32>
    %336 = tpu.reciprocal %335 {approx = true} : vector<8x1xf32> -> vector<8x1xf32>
    %337 = vector.broadcast %336 : vector<8x1xf32> to vector<8x8xf32>
    %338 = arith.mulf %333, %337 : vector<8x8xf32>
    %339 = vector.extract_strided_slice %299 {offsets = [8, 0], sizes = [8, 8], strides = [1, 1]} : vector<32x8xf32> to vector<8x8xf32>
    "tpu.trace_start"() <{level = 10 : i32, message = "ds,ts->dt"}> : () -> ()
    %cst_151 = arith.constant dense<0.000000e+00> : vector<8x8xf32>
    %340 = tpu.matmul %339, %338, %cst_151 {dimension_numbers = #tpu.dot_dimension_numbers<[1], [1], [0], [0], [0, 0, 1, 0], [], []>} : vector<8x8xf32>, vector<8x8xf32>, vector<8x8xf32> -> vector<8x8xf32>
    "tpu.trace_stop"() : () -> ()
    %c8_152 = arith.constant 8 : index
    %c0_153 = arith.constant 0 : index
    %341 = vector.load %arg14[%c8_152, %c0_153] : memref<32x8xf32, #tpu.memory_space<vmem>>, vector<8x8xf32>
    tpu.vector_store %arg14[%c8_152, %c0_153], %340 {strides = array<i32>} : memref<32x8xf32, #tpu.memory_space<vmem>>, vector<8x8xf32>,
    %342 = vector.extract_strided_slice %300 {offsets = [0, 16], sizes = [8, 8], strides = [1, 1]} : vector<8x32xf32> to vector<8x8xf32>
    %343 = vector.extract_strided_slice %301 {offsets = [0, 16], sizes = [8, 8], strides = [1, 1]} : vector<8x32xf32> to vector<8x8xf32>
    "tpu.trace_start"() <{level = 10 : i32, message = "td,sd->ts"}> : () -> ()
    %cst_154 = arith.constant dense<0.000000e+00> : vector<8x8xf32>
    %344 = tpu.matmul %342, %343, %cst_154 {dimension_numbers = #tpu.dot_dimension_numbers<[1], [1], [0], [0], [0, 0, 1, 0], [], []>} : vector<8x8xf32>, vector<8x8xf32>, vector<8x8xf32> -> vector<8x8xf32>
    "tpu.trace_stop"() : () -> ()
    %cst_155 = arith.constant 0.353553385 : f32
    %345 = vector.broadcast %cst_155 : f32 to vector<8x8xf32>
    %346 = arith.mulf %344, %345 : vector<8x8xf32>
    %cst_156 = arith.constant -1.000000e+30 : f32
    %347 = vector.broadcast %cst_156 : f32 to vector<8x8xf32>
    %348 = arith.select %20, %346, %347 : vector<8x8xi1>, vector<8x8xf32>
    %cst_157 = arith.constant dense<0xFF800000> : vector<8xf32>
    %349 = vector.multi_reduction <maximumf>, %348, %cst_157 [1] : vector<8x8xf32> to vector<8xf32>
    %350 = vector.shape_cast %349 : vector<8xf32> to vector<8x1xf32>
    %351 = vector.broadcast %350 : vector<8x1xf32> to vector<8x8xf32>
    %352 = arith.subf %348, %351 : vector<8x8xf32>
    %353 = math.exp %352 : vector<8x8xf32>
    %cst_158 = arith.constant dense<0.000000e+00> : vector<8xf32>
    %354 = vector.multi_reduction <add>, %353, %cst_158 [1] : vector<8x8xf32> to vector<8xf32>
    %355 = vector.shape_cast %354 : vector<8xf32> to vector<8x1xf32>
    %356 = tpu.reciprocal %355 {approx = true} : vector<8x1xf32> -> vector<8x1xf32>
    %357 = vector.broadcast %356 : vector<8x1xf32> to vector<8x8xf32>
    %358 = arith.mulf %353, %357 : vector<8x8xf32>
    %359 = vector.extract_strided_slice %299 {offsets = [16, 0], sizes = [8, 8], strides = [1, 1]} : vector<32x8xf32> to vector<8x8xf32>
    "tpu.trace_start"() <{level = 10 : i32, message = "ds,ts->dt"}> : () -> ()
    %cst_159 = arith.constant dense<0.000000e+00> : vector<8x8xf32>
    %360 = tpu.matmul %359, %358, %cst_159 {dimension_numbers = #tpu.dot_dimension_numbers<[1], [1], [0], [0], [0, 0, 1, 0], [], []>} : vector<8x8xf32>, vector<8x8xf32>, vector<8x8xf32> -> vector<8x8xf32>
    "tpu.trace_stop"() : () -> ()
    %c16_160 = arith.constant 16 : index
    %c0_161 = arith.constant 0 : index
    %361 = vector.load %arg14[%c16_160, %c0_161] : memref<32x8xf32, #tpu.memory_space<vmem>>, vector<8x8xf32>
    tpu.vector_store %arg14[%c16_160, %c0_161], %360 {strides = array<i32>} : memref<32x8xf32, #tpu.memory_space<vmem>>, vector<8x8xf32>,
    %362 = vector.extract_strided_slice %300 {offsets = [0, 24], sizes = [8, 8], strides = [1, 1]} : vector<8x32xf32> to vector<8x8xf32>
    %363 = vector.extract_strided_slice %301 {offsets = [0, 24], sizes = [8, 8], strides = [1, 1]} : vector<8x32xf32> to vector<8x8xf32>
    "tpu.trace_start"() <{level = 10 : i32, message = "td,sd->ts"}> : () -> ()
    %cst_162 = arith.constant dense<0.000000e+00> : vector<8x8xf32>
    %364 = tpu.matmul %362, %363, %cst_162 {dimension_numbers = #tpu.dot_dimension_numbers<[1], [1], [0], [0], [0, 0, 1, 0], [], []>} : vector<8x8xf32>, vector<8x8xf32>, vector<8x8xf32> -> vector<8x8xf32>
    "tpu.trace_stop"() : () -> ()
    %cst_163 = arith.constant 0.353553385 : f32
    %365 = vector.broadcast %cst_163 : f32 to vector<8x8xf32>
    %366 = arith.mulf %364, %365 : vector<8x8xf32>
    %cst_164 = arith.constant -1.000000e+30 : f32
    %367 = vector.broadcast %cst_164 : f32 to vector<8x8xf32>
    %368 = arith.select %20, %366, %367 : vector<8x8xi1>, vector<8x8xf32>
    %cst_165 = arith.constant dense<0xFF800000> : vector<8xf32>
    %369 = vector.multi_reduction <maximumf>, %368, %cst_165 [1] : vector<8x8xf32> to vector<8xf32>
    %370 = vector.shape_cast %369 : vector<8xf32> to vector<8x1xf32>
    %371 = vector.broadcast %370 : vector<8x1xf32> to vector<8x8xf32>
    %372 = arith.subf %368, %371 : vector<8x8xf32>
    %373 = math.exp %372 : vector<8x8xf32>
    %cst_166 = arith.constant dense<0.000000e+00> : vector<8xf32>
    %374 = vector.multi_reduction <add>, %373, %cst_166 [1] : vector<8x8xf32> to vector<8xf32>
    %375 = vector.shape_cast %374 : vector<8xf32> to vector<8x1xf32>
    %376 = tpu.reciprocal %375 {approx = true} : vector<8x1xf32> -> vector<8x1xf32>
    %377 = vector.broadcast %376 : vector<8x1xf32> to vector<8x8xf32>
    %378 = arith.mulf %373, %377 : vector<8x8xf32>
    %379 = vector.extract_strided_slice %299 {offsets = [24, 0], sizes = [8, 8], strides = [1, 1]} : vector<32x8xf32> to vector<8x8xf32>
    "tpu.trace_start"() <{level = 10 : i32, message = "ds,ts->dt"}> : () -> ()
    %cst_167 = arith.constant dense<0.000000e+00> : vector<8x8xf32>
    %380 = tpu.matmul %379, %378, %cst_167 {dimension_numbers = #tpu.dot_dimension_numbers<[1], [1], [0], [0], [0, 0, 1, 0], [], []>} : vector<8x8xf32>, vector<8x8xf32>, vector<8x8xf32> -> vector<8x8xf32>
    "tpu.trace_stop"() : () -> ()
    %c24_168 = arith.constant 24 : index
    %c0_169 = arith.constant 0 : index
    %381 = vector.load %arg14[%c24_168, %c0_169] : memref<32x8xf32, #tpu.memory_space<vmem>>, vector<8x8xf32>
    tpu.vector_store %arg14[%c24_168, %c0_169], %380 {strides = array<i32>} : memref<32x8xf32, #tpu.memory_space<vmem>>, vector<8x8xf32>,
    %c0_170 = arith.constant 0 : index
    %c0_171 = arith.constant 0 : index
    %382 = tpu.strided_load %arg14[%c0_170, %c0_171] {strides = array<i32: 4, 1>} : memref<32x8xf32, #tpu.memory_space<vmem>>, vector<8x8xf32>
    %383 = vector.extract_strided_slice %10 {offsets = [0, 0], sizes = [8, 32], strides = [1, 1]} : vector<32x32xf32> to vector<8x32xf32>
    %cst_172 = arith.constant dense<0.000000e+00> : vector<8x32xf32>
    %384 = tpu.matmul %382, %383, %cst_172 {dimension_numbers = #tpu.dot_dimension_numbers<[1], [0], [0], [1], [0, 0, 1, 1], [], []>} : vector<8x8xf32>, vector<8x32xf32>, vector<8x32xf32> -> vector<8x32xf32>
    %c1_173 = arith.constant 1 : index
    %c0_174 = arith.constant 0 : index
    %385 = tpu.strided_load %arg14[%c1_173, %c0_174] {strides = array<i32: 4, 1>} : memref<32x8xf32, #tpu.memory_space<vmem>>, vector<8x8xf32>
    %386 = vector.extract_strided_slice %10 {offsets = [8, 0], sizes = [8, 32], strides = [1, 1]} : vector<32x32xf32> to vector<8x32xf32>
    %cst_175 = arith.constant dense<0.000000e+00> : vector<8x32xf32>
    %387 = tpu.matmul %385, %386, %cst_175 {dimension_numbers = #tpu.dot_dimension_numbers<[1], [0], [0], [1], [0, 0, 1, 1], [], []>} : vector<8x8xf32>, vector<8x32xf32>, vector<8x32xf32> -> vector<8x32xf32>
    %388 = arith.addf %384, %387 : vector<8x32xf32>
    %c2_176 = arith.constant 2 : index
    %c0_177 = arith.constant 0 : index
    %389 = tpu.strided_load %arg14[%c2_176, %c0_177] {strides = array<i32: 4, 1>} : memref<32x8xf32, #tpu.memory_space<vmem>>, vector<8x8xf32>
    %390 = vector.extract_strided_slice %10 {offsets = [16, 0], sizes = [8, 32], strides = [1, 1]} : vector<32x32xf32> to vector<8x32xf32>
    %cst_178 = arith.constant dense<0.000000e+00> : vector<8x32xf32>
    %391 = tpu.matmul %389, %390, %cst_178 {dimension_numbers = #tpu.dot_dimension_numbers<[1], [0], [0], [1], [0, 0, 1, 1], [], []>} : vector<8x8xf32>, vector<8x32xf32>, vector<8x32xf32> -> vector<8x32xf32>
    %392 = arith.addf %388, %391 : vector<8x32xf32>
    %c3_179 = arith.constant 3 : index
    %c0_180 = arith.constant 0 : index
    %393 = tpu.strided_load %arg14[%c3_179, %c0_180] {strides = array<i32: 4, 1>} : memref<32x8xf32, #tpu.memory_space<vmem>>, vector<8x8xf32>
    %394 = vector.extract_strided_slice %10 {offsets = [24, 0], sizes = [8, 32], strides = [1, 1]} : vector<32x32xf32> to vector<8x32xf32>
    %cst_181 = arith.constant dense<0.000000e+00> : vector<8x32xf32>
    %395 = tpu.matmul %393, %394, %cst_181 {dimension_numbers = #tpu.dot_dimension_numbers<[1], [0], [0], [1], [0, 0, 1, 1], [], []>} : vector<8x8xf32>, vector<8x32xf32>, vector<8x32xf32> -> vector<8x32xf32>
    %396 = arith.addf %392, %395 : vector<8x32xf32>
    %397 = arith.addf %295, %396 : vector<8x32xf32>
    %cst_182 = arith.constant dense<0.000000e+00> : vector<8xf32>
    %398 = vector.multi_reduction <add>, %397, %cst_182 [1] : vector<8x32xf32> to vector<8xf32>
    %399 = vector.shape_cast %398 : vector<8xf32> to vector<8x1xf32>
    %cst_183 = arith.constant 3.200000e+01 : f32
    %400 = vector.broadcast %cst_183 : f32 to vector<8x1xf32>
    %401 = arith.divf %399, %400 : vector<8x1xf32>
    %402 = vector.broadcast %401 : vector<8x1xf32> to vector<8x32xf32>
    %403 = arith.subf %397, %402 : vector<8x32xf32>
    %404 = arith.mulf %403, %403 : vector<8x32xf32>
    %cst_184 = arith.constant dense<0.000000e+00> : vector<8xf32>
    %405 = vector.multi_reduction <add>, %404, %cst_184 [1] : vector<8x32xf32> to vector<8xf32>
    %406 = vector.shape_cast %405 : vector<8xf32> to vector<8x1xf32>
    %cst_185 = arith.constant 3.200000e+01 : f32
    %407 = vector.broadcast %cst_185 : f32 to vector<8x1xf32>
    %408 = arith.divf %406, %407 : vector<8x1xf32>
    %409 = vector.broadcast %401 : vector<8x1xf32> to vector<8x32xf32>
    %410 = arith.subf %397, %409 : vector<8x32xf32>
    %cst_186 = arith.constant 9.99999974E-6 : f32
    %411 = vector.broadcast %cst_186 : f32 to vector<8x1xf32>
    %412 = arith.addf %408, %411 : vector<8x1xf32>
    %413 = math.rsqrt %412 : vector<8x1xf32>
    %414 = vector.broadcast %413 : vector<8x1xf32> to vector<8x32xf32>
    %415 = arith.mulf %410, %414 : vector<8x32xf32>
    %416 = vector.broadcast %1 : vector<1x32xf32> to vector<8x32xf32>
    %417 = arith.mulf %415, %416 : vector<8x32xf32>
    %418 = vector.broadcast %2 : vector<1x32xf32> to vector<8x32xf32>
    %419 = arith.addf %417, %418 : vector<8x32xf32>
    %cst_187 = arith.constant dense<0.000000e+00> : vector<8x32xf32>
    %420 = tpu.matmul %419, %11, %cst_187 {dimension_numbers = #tpu.dot_dimension_numbers<[1], [0], [0], [1], [0, 0, 1, 1], [], []>} : vector<8x32xf32>, vector<32x32xf32>, vector<8x32xf32> -> vector<8x32xf32>
    %cst_188 = arith.constant dense<0.000000e+00> : vector<8x32xf32>
    %421 = tpu.matmul %297, %12, %cst_188 {dimension_numbers = #tpu.dot_dimension_numbers<[1], [0], [0], [1], [0, 0, 1, 1], [], []>} : vector<8x32xf32>, vector<32x32xf32>, vector<8x32xf32> -> vector<8x32xf32>
    "tpu.trace_start"() <{level = 10 : i32, message = "od,sd->os"}> : () -> ()
    %cst_189 = arith.constant dense<0.000000e+00> : vector<32x8xf32>
    %422 = tpu.matmul %13, %297, %cst_189 {dimension_numbers = #tpu.dot_dimension_numbers<[1], [1], [0], [0], [0, 0, 1, 0], [], []>} : vector<32x32xf32>, vector<8x32xf32>, vector<32x8xf32> -> vector<32x8xf32>
    "tpu.trace_stop"() : () -> ()
    %423 = vector.extract_strided_slice %420 {offsets = [0, 0], sizes = [8, 8], strides = [1, 1]} : vector<8x32xf32> to vector<8x8xf32>
    %424 = vector.extract_strided_slice %421 {offsets = [0, 0], sizes = [8, 8], strides = [1, 1]} : vector<8x32xf32> to vector<8x8xf32>
    "tpu.trace_start"() <{level = 10 : i32, message = "td,sd->ts"}> : () -> ()
    %cst_190 = arith.constant dense<0.000000e+00> : vector<8x8xf32>
    %425 = tpu.matmul %423, %424, %cst_190 {dimension_numbers = #tpu.dot_dimension_numbers<[1], [1], [0], [0], [0, 0, 1, 0], [], []>} : vector<8x8xf32>, vector<8x8xf32>, vector<8x8xf32> -> vector<8x8xf32>
    "tpu.trace_stop"() : () -> ()
    %cst_191 = arith.constant 0.353553385 : f32
    %426 = vector.broadcast %cst_191 : f32 to vector<8x8xf32>
    %427 = arith.mulf %425, %426 : vector<8x8xf32>
    %cst_192 = arith.constant dense<0xFF800000> : vector<8xf32>
    %428 = vector.multi_reduction <maximumf>, %427, %cst_192 [1] : vector<8x8xf32> to vector<8xf32>
    %429 = vector.shape_cast %428 : vector<8xf32> to vector<8x1xf32>
    %430 = vector.broadcast %429 : vector<8x1xf32> to vector<8x8xf32>
    %431 = arith.subf %427, %430 : vector<8x8xf32>
    %432 = math.exp %431 : vector<8x8xf32>
    %cst_193 = arith.constant dense<0.000000e+00> : vector<8xf32>
    %433 = vector.multi_reduction <add>, %432, %cst_193 [1] : vector<8x8xf32> to vector<8xf32>
    %434 = vector.shape_cast %433 : vector<8xf32> to vector<8x1xf32>
    %435 = tpu.reciprocal %434 {approx = true} : vector<8x1xf32> -> vector<8x1xf32>
    %436 = vector.broadcast %435 : vector<8x1xf32> to vector<8x8xf32>
    %437 = arith.mulf %432, %436 : vector<8x8xf32>
    %438 = vector.extract_strided_slice %422 {offsets = [0, 0], sizes = [8, 8], strides = [1, 1]} : vector<32x8xf32> to vector<8x8xf32>
    "tpu.trace_start"() <{level = 10 : i32, message = "ds,ts->dt"}> : () -> ()
    %cst_194 = arith.constant dense<0.000000e+00> : vector<8x8xf32>
    %439 = tpu.matmul %438, %437, %cst_194 {dimension_numbers = #tpu.dot_dimension_numbers<[1], [1], [0], [0], [0, 0, 1, 0], [], []>} : vector<8x8xf32>, vector<8x8xf32>, vector<8x8xf32> -> vector<8x8xf32>
    "tpu.trace_stop"() : () -> ()
    %c0_195 = arith.constant 0 : index
    %c0_196 = arith.constant 0 : index
    %440 = vector.load %arg14[%c0_195, %c0_196] : memref<32x8xf32, #tpu.memory_space<vmem>>, vector<8x8xf32>
    tpu.vector_store %arg14[%c0_195, %c0_196], %439 {strides = array<i32>} : memref<32x8xf32, #tpu.memory_space<vmem>>, vector<8x8xf32>,
    %441 = vector.extract_strided_slice %420 {offsets = [0, 8], sizes = [8, 8], strides = [1, 1]} : vector<8x32xf32> to vector<8x8xf32>
    %442 = vector.extract_strided_slice %421 {offsets = [0, 8], sizes = [8, 8], strides = [1, 1]} : vector<8x32xf32> to vector<8x8xf32>
    "tpu.trace_start"() <{level = 10 : i32, message = "td,sd->ts"}> : () -> ()
    %cst_197 = arith.constant dense<0.000000e+00> : vector<8x8xf32>
    %443 = tpu.matmul %441, %442, %cst_197 {dimension_numbers = #tpu.dot_dimension_numbers<[1], [1], [0], [0], [0, 0, 1, 0], [], []>} : vector<8x8xf32>, vector<8x8xf32>, vector<8x8xf32> -> vector<8x8xf32>
    "tpu.trace_stop"() : () -> ()
    %cst_198 = arith.constant 0.353553385 : f32
    %444 = vector.broadcast %cst_198 : f32 to vector<8x8xf32>
    %445 = arith.mulf %443, %444 : vector<8x8xf32>
    %cst_199 = arith.constant dense<0xFF800000> : vector<8xf32>
    %446 = vector.multi_reduction <maximumf>, %445, %cst_199 [1] : vector<8x8xf32> to vector<8xf32>
    %447 = vector.shape_cast %446 : vector<8xf32> to vector<8x1xf32>
    %448 = vector.broadcast %447 : vector<8x1xf32> to vector<8x8xf32>
    %449 = arith.subf %445, %448 : vector<8x8xf32>
    %450 = math.exp %449 : vector<8x8xf32>
    %cst_200 = arith.constant dense<0.000000e+00> : vector<8xf32>
    %451 = vector.multi_reduction <add>, %450, %cst_200 [1] : vector<8x8xf32> to vector<8xf32>
    %452 = vector.shape_cast %451 : vector<8xf32> to vector<8x1xf32>
    %453 = tpu.reciprocal %452 {approx = true} : vector<8x1xf32> -> vector<8x1xf32>
    %454 = vector.broadcast %453 : vector<8x1xf32> to vector<8x8xf32>
    %455 = arith.mulf %450, %454 : vector<8x8xf32>
    %456 = vector.extract_strided_slice %422 {offsets = [8, 0], sizes = [8, 8], strides = [1, 1]} : vector<32x8xf32> to vector<8x8xf32>
    "tpu.trace_start"() <{level = 10 : i32, message = "ds,ts->dt"}> : () -> ()
    %cst_201 = arith.constant dense<0.000000e+00> : vector<8x8xf32>
    %457 = tpu.matmul %456, %455, %cst_201 {dimension_numbers = #tpu.dot_dimension_numbers<[1], [1], [0], [0], [0, 0, 1, 0], [], []>} : vector<8x8xf32>, vector<8x8xf32>, vector<8x8xf32> -> vector<8x8xf32>
    "tpu.trace_stop"() : () -> ()
    %c8_202 = arith.constant 8 : index
    %c0_203 = arith.constant 0 : index
    %458 = vector.load %arg14[%c8_202, %c0_203] : memref<32x8xf32, #tpu.memory_space<vmem>>, vector<8x8xf32>
    tpu.vector_store %arg14[%c8_202, %c0_203], %457 {strides = array<i32>} : memref<32x8xf32, #tpu.memory_space<vmem>>, vector<8x8xf32>,
    %459 = vector.extract_strided_slice %420 {offsets = [0, 16], sizes = [8, 8], strides = [1, 1]} : vector<8x32xf32> to vector<8x8xf32>
    %460 = vector.extract_strided_slice %421 {offsets = [0, 16], sizes = [8, 8], strides = [1, 1]} : vector<8x32xf32> to vector<8x8xf32>
    "tpu.trace_start"() <{level = 10 : i32, message = "td,sd->ts"}> : () -> ()
    %cst_204 = arith.constant dense<0.000000e+00> : vector<8x8xf32>
    %461 = tpu.matmul %459, %460, %cst_204 {dimension_numbers = #tpu.dot_dimension_numbers<[1], [1], [0], [0], [0, 0, 1, 0], [], []>} : vector<8x8xf32>, vector<8x8xf32>, vector<8x8xf32> -> vector<8x8xf32>
    "tpu.trace_stop"() : () -> ()
    %cst_205 = arith.constant 0.353553385 : f32
    %462 = vector.broadcast %cst_205 : f32 to vector<8x8xf32>
    %463 = arith.mulf %461, %462 : vector<8x8xf32>
    %cst_206 = arith.constant dense<0xFF800000> : vector<8xf32>
    %464 = vector.multi_reduction <maximumf>, %463, %cst_206 [1] : vector<8x8xf32> to vector<8xf32>
    %465 = vector.shape_cast %464 : vector<8xf32> to vector<8x1xf32>
    %466 = vector.broadcast %465 : vector<8x1xf32> to vector<8x8xf32>
    %467 = arith.subf %463, %466 : vector<8x8xf32>
    %468 = math.exp %467 : vector<8x8xf32>
    %cst_207 = arith.constant dense<0.000000e+00> : vector<8xf32>
    %469 = vector.multi_reduction <add>, %468, %cst_207 [1] : vector<8x8xf32> to vector<8xf32>
    %470 = vector.shape_cast %469 : vector<8xf32> to vector<8x1xf32>
    %471 = tpu.reciprocal %470 {approx = true} : vector<8x1xf32> -> vector<8x1xf32>
    %472 = vector.broadcast %471 : vector<8x1xf32> to vector<8x8xf32>
    %473 = arith.mulf %468, %472 : vector<8x8xf32>
    %474 = vector.extract_strided_slice %422 {offsets = [16, 0], sizes = [8, 8], strides = [1, 1]} : vector<32x8xf32> to vector<8x8xf32>
    "tpu.trace_start"() <{level = 10 : i32, message = "ds,ts->dt"}> : () -> ()
    %cst_208 = arith.constant dense<0.000000e+00> : vector<8x8xf32>
    %475 = tpu.matmul %474, %473, %cst_208 {dimension_numbers = #tpu.dot_dimension_numbers<[1], [1], [0], [0], [0, 0, 1, 0], [], []>} : vector<8x8xf32>, vector<8x8xf32>, vector<8x8xf32> -> vector<8x8xf32>
    "tpu.trace_stop"() : () -> ()
    %c16_209 = arith.constant 16 : index
    %c0_210 = arith.constant 0 : index
    %476 = vector.load %arg14[%c16_209, %c0_210] : memref<32x8xf32, #tpu.memory_space<vmem>>, vector<8x8xf32>
    tpu.vector_store %arg14[%c16_209, %c0_210], %475 {strides = array<i32>} : memref<32x8xf32, #tpu.memory_space<vmem>>, vector<8x8xf32>,
    %477 = vector.extract_strided_slice %420 {offsets = [0, 24], sizes = [8, 8], strides = [1, 1]} : vector<8x32xf32> to vector<8x8xf32>
    %478 = vector.extract_strided_slice %421 {offsets = [0, 24], sizes = [8, 8], strides = [1, 1]} : vector<8x32xf32> to vector<8x8xf32>
    "tpu.trace_start"() <{level = 10 : i32, message = "td,sd->ts"}> : () -> ()
    %cst_211 = arith.constant dense<0.000000e+00> : vector<8x8xf32>
    %479 = tpu.matmul %477, %478, %cst_211 {dimension_numbers = #tpu.dot_dimension_numbers<[1], [1], [0], [0], [0, 0, 1, 0], [], []>} : vector<8x8xf32>, vector<8x8xf32>, vector<8x8xf32> -> vector<8x8xf32>
    "tpu.trace_stop"() : () -> ()
    %cst_212 = arith.constant 0.353553385 : f32
    %480 = vector.broadcast %cst_212 : f32 to vector<8x8xf32>
    %481 = arith.mulf %479, %480 : vector<8x8xf32>
    %cst_213 = arith.constant dense<0xFF800000> : vector<8xf32>
    %482 = vector.multi_reduction <maximumf>, %481, %cst_213 [1] : vector<8x8xf32> to vector<8xf32>
    %483 = vector.shape_cast %482 : vector<8xf32> to vector<8x1xf32>
    %484 = vector.broadcast %483 : vector<8x1xf32> to vector<8x8xf32>
    %485 = arith.subf %481, %484 : vector<8x8xf32>
    %486 = math.exp %485 : vector<8x8xf32>
    %cst_214 = arith.constant dense<0.000000e+00> : vector<8xf32>
    %487 = vector.multi_reduction <add>, %486, %cst_214 [1] : vector<8x8xf32> to vector<8xf32>
    %488 = vector.shape_cast %487 : vector<8xf32> to vector<8x1xf32>
    %489 = tpu.reciprocal %488 {approx = true} : vector<8x1xf32> -> vector<8x1xf32>
    %490 = vector.broadcast %489 : vector<8x1xf32> to vector<8x8xf32>
    %491 = arith.mulf %486, %490 : vector<8x8xf32>
    %492 = vector.extract_strided_slice %422 {offsets = [24, 0], sizes = [8, 8], strides = [1, 1]} : vector<32x8xf32> to vector<8x8xf32>
    "tpu.trace_start"() <{level = 10 : i32, message = "ds,ts->dt"}> : () -> ()
    %cst_215 = arith.constant dense<0.000000e+00> : vector<8x8xf32>
    %493 = tpu.matmul %492, %491, %cst_215 {dimension_numbers = #tpu.dot_dimension_numbers<[1], [1], [0], [0], [0, 0, 1, 0], [], []>} : vector<8x8xf32>, vector<8x8xf32>, vector<8x8xf32> -> vector<8x8xf32>
    "tpu.trace_stop"() : () -> ()
    %c24_216 = arith.constant 24 : index
    %c0_217 = arith.constant 0 : index
    %494 = vector.load %arg14[%c24_216, %c0_217] : memref<32x8xf32, #tpu.memory_space<vmem>>, vector<8x8xf32>
    tpu.vector_store %arg14[%c24_216, %c0_217], %493 {strides = array<i32>} : memref<32x8xf32, #tpu.memory_space<vmem>>, vector<8x8xf32>,
    %c0_218 = arith.constant 0 : index
    %c0_219 = arith.constant 0 : index
    %495 = tpu.strided_load %arg14[%c0_218, %c0_219] {strides = array<i32: 4, 1>} : memref<32x8xf32, #tpu.memory_space<vmem>>, vector<8x8xf32>
    %496 = vector.extract_strided_slice %14 {offsets = [0, 0], sizes = [8, 32], strides = [1, 1]} : vector<32x32xf32> to vector<8x32xf32>
    %cst_220 = arith.constant dense<0.000000e+00> : vector<8x32xf32>
    %497 = tpu.matmul %495, %496, %cst_220 {dimension_numbers = #tpu.dot_dimension_numbers<[1], [0], [0], [1], [0, 0, 1, 1], [], []>} : vector<8x8xf32>, vector<8x32xf32>, vector<8x32xf32> -> vector<8x32xf32>
    %c1_221 = arith.constant 1 : index
    %c0_222 = arith.constant 0 : index
    %498 = tpu.strided_load %arg14[%c1_221, %c0_222] {strides = array<i32: 4, 1>} : memref<32x8xf32, #tpu.memory_space<vmem>>, vector<8x8xf32>
    %499 = vector.extract_strided_slice %14 {offsets = [8, 0], sizes = [8, 32], strides = [1, 1]} : vector<32x32xf32> to vector<8x32xf32>
    %cst_223 = arith.constant dense<0.000000e+00> : vector<8x32xf32>
    %500 = tpu.matmul %498, %499, %cst_223 {dimension_numbers = #tpu.dot_dimension_numbers<[1], [0], [0], [1], [0, 0, 1, 1], [], []>} : vector<8x8xf32>, vector<8x32xf32>, vector<8x32xf32> -> vector<8x32xf32>
    %501 = arith.addf %497, %500 : vector<8x32xf32>
    %c2_224 = arith.constant 2 : index
    %c0_225 = arith.constant 0 : index
    %502 = tpu.strided_load %arg14[%c2_224, %c0_225] {strides = array<i32: 4, 1>} : memref<32x8xf32, #tpu.memory_space<vmem>>, vector<8x8xf32>
    %503 = vector.extract_strided_slice %14 {offsets = [16, 0], sizes = [8, 32], strides = [1, 1]} : vector<32x32xf32> to vector<8x32xf32>
    %cst_226 = arith.constant dense<0.000000e+00> : vector<8x32xf32>
    %504 = tpu.matmul %502, %503, %cst_226 {dimension_numbers = #tpu.dot_dimension_numbers<[1], [0], [0], [1], [0, 0, 1, 1], [], []>} : vector<8x8xf32>, vector<8x32xf32>, vector<8x32xf32> -> vector<8x32xf32>
    %505 = arith.addf %501, %504 : vector<8x32xf32>
    %c3_227 = arith.constant 3 : index
    %c0_228 = arith.constant 0 : index
    %506 = tpu.strided_load %arg14[%c3_227, %c0_228] {strides = array<i32: 4, 1>} : memref<32x8xf32, #tpu.memory_space<vmem>>, vector<8x8xf32>
    %507 = vector.extract_strided_slice %14 {offsets = [24, 0], sizes = [8, 32], strides = [1, 1]} : vector<32x32xf32> to vector<8x32xf32>
    %cst_229 = arith.constant dense<0.000000e+00> : vector<8x32xf32>
    %508 = tpu.matmul %506, %507, %cst_229 {dimension_numbers = #tpu.dot_dimension_numbers<[1], [0], [0], [1], [0, 0, 1, 1], [], []>} : vector<8x8xf32>, vector<8x32xf32>, vector<8x32xf32> -> vector<8x32xf32>
    %509 = arith.addf %505, %508 : vector<8x32xf32>
    %510 = arith.addf %419, %509 : vector<8x32xf32>
    %cst_230 = arith.constant dense<0.000000e+00> : vector<8xf32>
    %511 = vector.multi_reduction <add>, %510, %cst_230 [1] : vector<8x32xf32> to vector<8xf32>
    %512 = vector.shape_cast %511 : vector<8xf32> to vector<8x1xf32>
    %cst_231 = arith.constant 3.200000e+01 : f32
    %513 = vector.broadcast %cst_231 : f32 to vector<8x1xf32>
    %514 = arith.divf %512, %513 : vector<8x1xf32>
    %515 = vector.broadcast %514 : vector<8x1xf32> to vector<8x32xf32>
    %516 = arith.subf %510, %515 : vector<8x32xf32>
    %517 = arith.mulf %516, %516 : vector<8x32xf32>
    %cst_232 = arith.constant dense<0.000000e+00> : vector<8xf32>
    %518 = vector.multi_reduction <add>, %517, %cst_232 [1] : vector<8x32xf32> to vector<8xf32>
    %519 = vector.shape_cast %518 : vector<8xf32> to vector<8x1xf32>
    %cst_233 = arith.constant 3.200000e+01 : f32
    %520 = vector.broadcast %cst_233 : f32 to vector<8x1xf32>
    %521 = arith.divf %519, %520 : vector<8x1xf32>
    %522 = vector.broadcast %514 : vector<8x1xf32> to vector<8x32xf32>
    %523 = arith.subf %510, %522 : vector<8x32xf32>
    %cst_234 = arith.constant 9.99999974E-6 : f32
    %524 = vector.broadcast %cst_234 : f32 to vector<8x1xf32>
    %525 = arith.addf %521, %524 : vector<8x1xf32>
    %526 = math.rsqrt %525 : vector<8x1xf32>
    %527 = vector.broadcast %526 : vector<8x1xf32> to vector<8x32xf32>
    %528 = arith.mulf %523, %527 : vector<8x32xf32>
    %529 = vector.broadcast %3 : vector<1x32xf32> to vector<8x32xf32>
    %530 = arith.mulf %528, %529 : vector<8x32xf32>
    %531 = vector.broadcast %4 : vector<1x32xf32> to vector<8x32xf32>
    %532 = arith.addf %530, %531 : vector<8x32xf32>
    %cst_235 = arith.constant dense<0.000000e+00> : vector<8x128xf32>
    %533 = tpu.matmul %532, %15, %cst_235 {dimension_numbers = #tpu.dot_dimension_numbers<[1], [0], [0], [1], [0, 0, 1, 1], [], []>} : vector<8x32xf32>, vector<32x128xf32>, vector<8x128xf32> -> vector<8x128xf32>
    %534 = vector.broadcast %16 : vector<1x128xf32> to vector<8x128xf32>
    %535 = arith.addf %533, %534 : vector<8x128xf32>
    %cst_236 = arith.constant 0.000000e+00 : f32
    %536 = vector.broadcast %cst_236 : f32 to vector<8x128xf32>
    %537 = arith.maximumf %535, %536 : vector<8x128xf32>
    %cst_237 = arith.constant dense<0.000000e+00> : vector<8x32xf32>
    %538 = tpu.matmul %537, %17, %cst_237 {dimension_numbers = #tpu.dot_dimension_numbers<[1], [0], [0], [1], [0, 0, 1, 1], [], []>} : vector<8x128xf32>, vector<128x32xf32>, vector<8x32xf32> -> vector<8x32xf32>
    %539 = vector.broadcast %7 : vector<1x32xf32> to vector<8x32xf32>
    %540 = arith.addf %538, %539 : vector<8x32xf32>
    %541 = arith.addf %532, %540 : vector<8x32xf32>
    %cst_238 = arith.constant dense<0.000000e+00> : vector<8xf32>
    %542 = vector.multi_reduction <add>, %541, %cst_238 [1] : vector<8x32xf32> to vector<8xf32>
    %543 = vector.shape_cast %542 : vector<8xf32> to vector<8x1xf32>
    %cst_239 = arith.constant 3.200000e+01 : f32
    %544 = vector.broadcast %cst_239 : f32 to vector<8x1xf32>
    %545 = arith.divf %543, %544 : vector<8x1xf32>
    %546 = vector.broadcast %545 : vector<8x1xf32> to vector<8x32xf32>
    %547 = arith.subf %541, %546 : vector<8x32xf32>
    %548 = arith.mulf %547, %547 : vector<8x32xf32>
    %cst_240 = arith.constant dense<0.000000e+00> : vector<8xf32>
    %549 = vector.multi_reduction <add>, %548, %cst_240 [1] : vector<8x32xf32> to vector<8xf32>
    %550 = vector.shape_cast %549 : vector<8xf32> to vector<8x1xf32>
    %cst_241 = arith.constant 3.200000e+01 : f32
    %551 = vector.broadcast %cst_241 : f32 to vector<8x1xf32>
    %552 = arith.divf %550, %551 : vector<8x1xf32>
    %553 = vector.broadcast %545 : vector<8x1xf32> to vector<8x32xf32>
    %554 = arith.subf %541, %553 : vector<8x32xf32>
    %cst_242 = arith.constant 9.99999974E-6 : f32
    %555 = vector.broadcast %cst_242 : f32 to vector<8x1xf32>
    %556 = arith.addf %552, %555 : vector<8x1xf32>
    %557 = math.rsqrt %556 : vector<8x1xf32>
    %558 = vector.broadcast %557 : vector<8x1xf32> to vector<8x32xf32>
    %559 = arith.mulf %554, %558 : vector<8x32xf32>
    %560 = vector.broadcast %5 : vector<1x32xf32> to vector<8x32xf32>
    %561 = arith.mulf %559, %560 : vector<8x32xf32>
    %562 = vector.broadcast %6 : vector<1x32xf32> to vector<8x32xf32>
    %563 = arith.addf %561, %562 : vector<8x32xf32>
    %c1_243 = arith.constant 1 : index
    %c0_244 = arith.constant 0 : index
    %c0_245 = arith.constant 0 : index
    %564 = vector.load %arg13[%c1_243, %c0_244, %c0_245] : memref<2x8x32xf32, #tpu.memory_space<vmem>>, vector<1x8x32xf32>
    %565 = vector.shape_cast %564 : vector<1x8x32xf32> to vector<8x32xf32>
    %566 = vector.shape_cast %563 : vector<8x32xf32> to vector<1x8x32xf32>
    tpu.vector_store %arg13[%c1_243, %c0_244, %c0_245], %566 {strides = array<i32>} : memref<2x8x32xf32, #tpu.memory_space<vmem>>, vector<1x8x32xf32>,
    return
  }
}

</mosaic_0001>

<bundles_post_ra>
// kernel: decoder_block.1
= control target key start
LH: loop header
LB: loop body
LE: loop exit
PB: predicated region body
PF: predicated region fallthrough
CT: control target
= control target key end

     0   :  { %v7067_v1 = vmov 0.0   ;;  %vm6060_vm0 = vmmov 0   ;;  %s7053_s0 = inlined_call_operand.vmem [shape: f32[2,8,32], index: 0, kind: input, shape index: {}]   ;;  %s7054_s1 = inlined_call_operand.vmem [shape: f32[2,8,32], index: 1, kind: input, shape index: {}]   ;;  %s7055_s2 = inlined_call_operand.vmem [shape: f32[32,64], index: 2, kind: input, shape index: {}]   ;;  %s7056_s3 = inlined_call_operand.vmem [shape: f32[32,32], index: 3, kind: input, shape index: {}]   ;;  %s7057_s4 = inlined_call_operand.vmem [shape: f32[32,32], index: 4, kind: input, shape index: {}]   ;;  %s7058_s5 = inlined_call_operand.vmem [shape: f32[32,32], index: 5, kind: input, shape index: {}]   ;;  %s7059_s6 = inlined_call_operand.vmem [shape: f32[32,32], index: 6, kind: input, shape index: {}]   ;;  %s7060_s7 = inlined_call_operand.vmem [shape: f32[32,32], index: 7, kind: input, shape index: {}]   ;;  %s7061_s8 = inlined_call_operand.vmem [shape: f32[32,32], index: 8, kind: input, shape index: {}]   ;;  %s7062_s9 = inlined_call_operand.vmem [shape: f32[32,128], index: 9, kind: input, shape index: {}]   ;;  %s7063_s10 = inlined_call_operand.vmem [shape: f32[1,128], index: 10, kind: input, shape index: {}]   ;;  %s7064_s11 = inlined_call_operand.vmem [shape: f32[128,32], index: 11, kind: input, shape index: {}]   ;;  %s7065_s12 = inlined_call_operand.vmem [shape: f32[8,32], index: 12, kind: input, shape index: {}]   ;;  %s7066_s13 = inlined_call_operand.hbm [shape: f32[2,8,32], index: 13, kind: output, shape index: {}]  }
   0x1   :  { %v6144_v0 = vld [vmem:[%s7055_s2 + $0x18] sm:$0xff]  ;;  %5518 = vmatprep.subr.mxu0 %v7067_v1  ;;  %v6150_v2 = vld [vmem:[%s7055_s2 + $0x10] sm:$0xff]  ;;  %5526 = vmatprep.mubr.msk.f32.mxu0 %vm6060_vm0, %v7067_v1 }
   0x2   :  { %18 = vsyncpa [#allocation4], 0  ;;  %5519 = vmatpush3.msra.mxu0 %v6144_v0  ;;  %5552 = vmatprep.subr.mxu1 %v7067_v1  ;;  %v6160_v3 = vld [vmem:[%s7055_s2 + $0x8] sm:$0xff]  ;;  %v6169_v4 = vld [vmem:[%s7055_s2] sm:$0xff]  ;;  %vm102_vm1 = vcmask 261120   ;;  %s6061_s25 = smov 88   ;;  %v95_v15 = vlaneseq }
   0x3   :  { %5520 = vmatprep.subr.mxu0 %v7067_v1  ;;  %5554 = vmatprep.mubr.msk.f32.mxu1 %vm6060_vm0, %v7067_v1  ;;  %v6175_v5 = vld [vmem:[%s7053_s0] sm:$0xff]  ;;  %v6194_v7 = vld [vmem:[%s7056_s3 + $0x8] sm:$0xff]  ;;  %v6199_v8 = vld [vmem:[%s7056_s3 + $0x10] sm:$0xff]  ;;  %s6062_s26 = smov 96   ;;  %s6063_s27 = smov 120   ;;  %vm276_vm2 = vcmask 64512  }
   0x4   :  { %5521 = vmatpush3.msra.mxu0 %v6150_v2  ;;  %v6189_v6 = vld [vmem:[%s7056_s3] sm:$0xff]  ;;  %v6210_v9 = vld [vmem:[%s7056_s3 + $0x18] sm:$0xff]  ;;  %s6064_s28 = smov 80   ;;  %v6229_v17 = vshrl.u32 %v95_v15, 7  ;;  %v98_v18 = vand.u32 127, %v95_v15  ;;  %s6065_s3 = smov 104  }
   0x5   :  { %5522 = vmatprep.subr.mxu0 %v7067_v1  ;;  %s6066_s29 = smov 112   ;;  %s6067_s30 = smov 72  }
   0x6   :  { %5523 = vmatpush3.msra.mxu0 %v6160_v3  ;;  %7075 = vst [vmem:[#allocation6_spill] sm:$0xff] %v6229_v17  ;;  %vm6234_vm3 = vcmp.le.s32.totalorder %v98_v18, %v6229_v17 }
   0x7   :  { %5524 = vmatprep.subr.mxu0 %v7067_v1 }
   0x8   :  { %5525 = vmatpush3.msra.mxu0 %v6169_v4 }
   0x9   :  { %5527 = vmatmul.mubr.msk.f32.vlgmr.msra.gmra.mxu0 %vm102_vm1, %v6175_v5  ;;  %5529 = vmatprep.subr.msk.mxu0 %vm102_vm1, %v6175_v5 }
   0xa   :  { %5530 = vmatpush3.xpose.msk.msra.mxu0 %vm102_vm1, %v6175_v5  ;;  %5531 = vmatprep.mubr.msk.f32.mxu0 %vm102_vm1, %v6189_v6 }
   0xb   :  { %5537 = vmatprep.subr.mxu0 %v7067_v1 }
   0xd   :  { %5532 = vmatmul.mubr.msk.f32.vlgmr.msra.gmra.mxu0 %vm102_vm1, %v6194_v7 }
   0xe   :  { %5534 = vmatprep.mubr.msk.f32.mxu0 %vm102_vm1, %v6199_v8 }
  0x11   :  { %5535 = vmatmul.mubr.msk.f32.gmra.mxu0 %vm102_vm1, %v6210_v9 }
  0x12   :  { %5539 = vmatprep.mubr.msk.f32.mxu0 %vm6060_vm0, %v7067_v1 }
  0xc9   :  { %v172_v10 = vpop.f32.mrf.mxu0 }
  0xca   :  { %443 = vrot.lane.b32.xlu1 %v172_v10, %s6061_s25  ;;  %274 = vrot.lane.b32.xlu0 %v172_v10, %s6062_s26 }
  0xcb   :  { %v5528_v11 = vpop.f32.mrf.mxu0 }
  0xcd   :  { %v6225_v13 = vpop.f32.mrf.mxu0 }
  0xce   :  { %441 = vrot.lane.b32.xlu1 %v172_v10, %s6063_s27 }
  0xcf   :  { %v254_v14 = vpop.f32.mrf.mxu0 }
  0xd1   :  { %v6227_v16 = vpop.f32.mrf.mxu0 }
  0xd2   :  { %611 = vrot.lane.b32.xlu1 %v172_v10, %s6064_s28 }
  0xd3   :  { %v6231_v19 = vpop.f32.mrf.mxu0 }
 0x13c   :  { %v275_v12 = vpop.permute.xlu0 %274  ;;  %v444_v31 = vpop.permute.xlu1 %443 }
 0x13d   :  { %5538 = vmatpush3.xpose.msk.msra.mxu0 %vm276_vm2, %v275_v12 }
 0x13e   :  { %5542 = vmatprep.subr.mxu0 %v7067_v1 }
 0x140   :  { %5540 = vmatmul.mubr.msk.f32.vlgmr.msra.gmra.mxu0 %vm276_vm2, %v172_v10  ;;  %v442_v32 = vpop.permute.xlu1 %441 }
 0x141   :  { %5544 = vmatprep.mubr.msk.f32.mxu0 %vm6060_vm0, %v7067_v1 }
 0x144   :  { %v612_v33 = vpop.permute.xlu1 %611 }
 0x200   :  { %v347_v20 = vpop.f32.mrf.mxu0 }
 0x201   :  { %v351_v22 = vmul.f32 0.35355338, %v347_v20 }
 0x202   :  { %v5541_v23 = vpop.f32.mrf.mxu0 }
 0x203   :  { %v352_v24 = vsel %vm6234_vm3, %v351_v22, -1e+30 }
 0x204   :  { %v353_v25 = vsel %vm276_vm2, %v352_v24, -inf }
 0x205   :  { %354 = vmax.xlane.f32.xlu0 %v353_v25 }
 0x21b   :  { %777 = vrot.lane.b32.xlu0 %v172_v10, %s6065_s3 }
 0x28e   :  { %v355_v26 = vpop.xlane.xlu0 %354 }
 0x28f   :  { %v356_v27 = vsub.f32 %v352_v24, %v355_v26 }
 0x291   :  { %v357_v28 = vmul.f32 1.442695, %v356_v27 }
 0x292   :  { %v778_v39 = vpop.permute.xlu0 %777 }
 0x293   :  { %5960 = vpow2.f32 %v357_v28 }
 0x2a0   :  { %v5961_v29 = vpop.eup %5960 }
 0x2a1   :  { %v359_v30 = vsel %vm276_vm2, %v5961_v29, 0.0 }
 0x2a2   :  { %360 = vadd.xlane.f32.xlu1 %v359_v30 }
 0x2b3   :  { %609 = vrot.lane.b32.xlu1 %v172_v10, %s6066_s29 }
 0x2b7   :  { %779 = vrot.lane.b32.xlu1 %v172_v10, %s6067_s30 }
 0x32b   :  { %v361_v34 = vpop.xlane.xlu1 %360 }
 0x32c   :  { %5962 = vrcp.f32 %v361_v34 }
 0x32f   :  { %v610_v37 = vpop.permute.xlu1 %609 }
 0x333   :  { %v780_v38 = vpop.permute.xlu1 %779 }
 0x339   :  { %v5963_v35 = vpop.eup %5962 }
 0x33a   :  { %v363_v36 = vmul.f32 %v5963_v35, %v5961_v29 }
 0x33c   :  { %5543 = vmatpush3.xpose.msk.msra.mxu0 %vm276_vm2, %v363_v36 }
 0x33d   :  { %5547 = vmatprep.subr.mxu0 %v7067_v1 }
 0x33f   :  { %5545 = vmatmul.mubr.msk.f32.vlgmr.msra.gmra.mxu0 %vm276_vm2, %v254_v14 }
 0x340   :  { %5548 = vmatpush3.xpose.msk.msra.mxu0 %vm276_vm2, %v444_v31  ;;  %5549 = vmatprep.mubr.msk.f32.mxu0 %vm6060_vm0, %v7067_v1 }
 0x341   :  { %5557 = vmatprep.subr.mxu0 %v7067_v1 }
 0x343   :  { %5550 = vmatmul.mubr.msk.f32.vlgmr.msra.gmra.mxu0 %vm276_vm2, %v442_v32 }
 0x344   :  { %5558 = vmatpush3.xpose.msk.msra.mxu0 %vm276_vm2, %v612_v33  ;;  %5559 = vmatprep.mubr.msk.f32.mxu0 %vm6060_vm0, %v7067_v1 }
 0x345   :  { %5567 = vmatprep.subr.mxu0 %v7067_v1 }
 0x347   :  { %5560 = vmatmul.mubr.msk.f32.vlgmr.msra.gmra.mxu0 %vm276_vm2, %v610_v37  ;;  %v6316_v37 = vld [vmem:[%s7057_s4 + $0x10] sm:$0xff] }
 0x348   :  { %5568 = vmatpush3.xpose.msk.msra.mxu0 %vm276_vm2, %v780_v38  ;;  %5569 = vmatprep.mubr.msk.f32.mxu0 %vm6060_vm0, %v7067_v1 }
 0x349   :  { %5577 = vmatprep.subr.mxu0 %v7067_v1 }
 0x34b   :  { %5570 = vmatmul.mubr.msk.f32.vlgmr.msra.gmra.mxu0 %vm276_vm2, %v778_v39 }
 0x34c   :  { %5579 = vmatprep.mubr.msk.f32.mxu0 %vm6060_vm0, %v7067_v1 }
 0x3ff   :  { %v436_v40 = vpop.f32.mrf.mxu0 }
 0x400   :  { %440 = vst.msk [vmem:[#allocation2] sm:$0xff] %vm276_vm2, %v436_v40  ;;  %v6321_v40 = vld [vmem:[%s7057_s4 + $0x18] sm:$0xff] }
 0x401   :  { %v5546_v41 = vpop.f32.mrf.mxu0 }
 0x403   :  { %v515_v42 = vpop.f32.mrf.mxu0 }
 0x404   :  { %v519_v43 = vmul.f32 0.35355338, %v515_v42 }
 0x405   :  { %v5551_v44 = vpop.f32.mrf.mxu0 }
 0x406   :  { %v520_v45 = vsel %vm6234_vm3, %v519_v43, -1e+30 }
 0x407   :  { %v683_v46 = vpop.f32.mrf.mxu0  ;;  %v521_v47 = vsel %vm276_vm2, %v520_v45, -inf }
 0x408   :  { %v687_v48 = vmul.f32 0.35355338, %v683_v46  ;;  %522 = vmax.xlane.f32.xlu1 %v521_v47 }
 0x409   :  { %v5561_v49 = vpop.f32.mrf.mxu0 }
 0x40a   :  { %v688_v50 = vsel %vm6234_vm3, %v687_v48, -1e+30 }
 0x40b   :  { %v851_v51 = vpop.f32.mrf.mxu0  ;;  %v689_v52 = vsel %vm276_vm2, %v688_v50, -inf }
 0x40c   :  { %v855_v53 = vmul.f32 0.35355338, %v851_v51  ;;  %690 = vmax.xlane.f32.xlu0 %v689_v52 }
 0x40d   :  { %v5571_v54 = vpop.f32.mrf.mxu0 }
 0x40e   :  { %v856_v55 = vsel %vm6234_vm3, %v855_v53, -1e+30 }
 0x40f   :  { %v857_v56 = vsel %vm276_vm2, %v856_v55, -inf }
 0x410   :  { %858 = vmax.xlane.f32.xlu1 %v857_v56 }
 0x491   :  { %v523_v57 = vpop.xlane.xlu1 %522 }
 0x492   :  { %v524_v58 = vsub.f32 %v520_v45, %v523_v57 }
 0x494   :  { %v525_v59 = vmul.f32 1.442695, %v524_v58 }
 0x495   :  { %v691_v60 = vpop.xlane.xlu0 %690 }
 0x496   :  { %5964 = vpow2.f32 %v525_v59  ;;  %v692_v61 = vsub.f32 %v688_v50, %v691_v60 }
 0x498   :  { %v693_v62 = vmul.f32 1.442695, %v692_v61  ;;  %v6345_v61 = vld [vmem:[%s7059_s6 + $0x18] sm:$0xff] }
 0x499   :  { %v859_v63 = vpop.xlane.xlu1 %858 }
 0x49a   :  { %5966 = vpow2.f32 %v693_v62  ;;  %v860_v10 = vsub.f32 %v856_v55, %v859_v63  ;;  %v6359_v62 = vld [vmem:[%s7058_s5 + $0x18] sm:$0xff]  ;;  %v6364_v63 = vld [vmem:[%s7059_s6 + $0x8] sm:$0xff] }
 0x49c   :  { %v861_v11 = vmul.f32 1.442695, %v860_v10  ;;  %v6371_v10 = vld [vmem:[%s7058_s5 + $0x10] sm:$0xff] }
 0x49e   :  { %5968 = vpow2.f32 %v861_v11  ;;  %v6376_v11 = vld [vmem:[%s7059_s6] sm:$0xff] }
 0x4a3   :  { %v5965_v12 = vpop.eup %5964 }
 0x4a4   :  { %v527_v14 = vsel %vm276_vm2, %v5965_v12, 0.0 }
 0x4a5   :  { %528 = vadd.xlane.f32.xlu1 %v527_v14  ;;  %v6386_v14 = vld [vmem:[%s7058_s5 + $0x8] sm:$0xff] }
 0x4a7   :  { %v5967_v15 = vpop.eup %5966 }
 0x4a8   :  { %v695_v18 = vsel %vm276_vm2, %v5967_v15, 0.0 }
 0x4a9   :  { %696 = vadd.xlane.f32.xlu1 %v695_v18 }
 0x4ab   :  { %v5969_v20 = vpop.eup %5968 }
 0x4ac   :  { %v863_v22 = vsel %vm276_vm2, %v5969_v20, 0.0 }
 0x4ad   :  { %864 = vadd.xlane.f32.xlu1 %v863_v22 }
 0x52e   :  { %v529_v23 = vpop.xlane.xlu1 %528 }
 0x52f   :  { %5970 = vrcp.f32 %v529_v23  ;;  %v1263_v23 = vsub.s32 0, %v6229_v17 }
 0x532   :  { %v697_v24 = vpop.xlane.xlu1 %696 }
 0x533   :  { %5972 = vrcp.f32 %v697_v24  ;;  %v6408_v24 = vld [vmem:[%s7065_s12] sm:$0xff] }
 0x536   :  { %v865_v25 = vpop.xlane.xlu1 %864 }
 0x537   :  { %5974 = vrcp.f32 %v865_v25  ;;  %v1268_v25 = vsub.s32 1, %v6229_v17 }
 0x53c   :  { %v5971_v26 = vpop.eup %5970 }
 0x53d   :  { %v531_v27 = vmul.f32 %v5971_v26, %v5965_v12  ;;  %v101_v12 = vld [vmem:[%s7054_s1] sm:$0xff]  ;;  %v6412_v26 = vrot.slane %v6408_v24, %v1263_v23 }
 0x53f   :  { %5553 = vmatpush3.xpose.msk.msra.mxu1 %vm276_vm2, %v531_v27 }
 0x540   :  { %v5973_v28 = vpop.eup %5972  ;;  %5562 = vmatprep.subr.mxu1 %v7067_v1 }
 0x541   :  { %v699_v29 = vmul.f32 %v5973_v28, %v5967_v15  ;;  %v6395_v15 = vld [vmem:[%s7058_s5] sm:$0xff] }
 0x542   :  { %5555 = vmatmul.mubr.msk.f32.vlgmr.msra.gmra.mxu1 %vm276_vm2, %v6225_v13  ;;  %v6299_v13 = vld [vmem:[%s7057_s4 + $0x8] sm:$0xff] }
 0x543   :  { %5563 = vmatpush3.xpose.msk.msra.mxu1 %vm276_vm2, %v699_v29  ;;  %5564 = vmatprep.mubr.msk.f32.mxu1 %vm6060_vm0, %v7067_v1  ;;  %v6415_v29 = vrot.slane %v6408_v24, %v1268_v25 }
 0x544   :  { %v5975_v30 = vpop.eup %5974  ;;  %5572 = vmatprep.subr.mxu1 %v7067_v1  ;;  %5578 = vmatpush3.msra.mxu0 %v6299_v13 }
 0x545   :  { %v867_v31 = vmul.f32 %v5975_v30, %v5969_v20  ;;  %5587 = vmatprep.subr.mxu0 %v7067_v1 }
 0x546   :  { %5565 = vmatmul.mubr.msk.f32.vlgmr.msra.gmra.mxu1 %vm276_vm2, %v6231_v19  ;;  %v6304_v19 = vld [vmem:[%s7057_s4] sm:$0xff] }
 0x547   :  { %5573 = vmatpush3.xpose.msk.msra.mxu1 %vm276_vm2, %v867_v31  ;;  %5574 = vmatprep.mubr.msk.f32.mxu1 %vm6060_vm0, %v7067_v1 }
 0x548   :  { %5582 = vmatprep.subr.mxu1 %v7067_v1 }
 0x54a   :  { %5575 = vmatmul.mubr.msk.f32.vlgmr.msra.gmra.mxu1 %vm276_vm2, %v6227_v16 }
 0x54b   :  { %5584 = vmatprep.mubr.msk.f32.mxu1 %vm6060_vm0, %v7067_v1  ;;  %5583 = vmatpush3.msra.mxu1 %v6304_v19 }
 0x54c   :  { %5592 = vmatprep.subr.mxu1 %v7067_v1 }
 0x602   :  { %v604_v16 = vpop.f32.mrf.mxu1 }
 0x603   :  { %608 = vst.msk [vmem:[#allocation2 + $0x8] sm:$0xff] %vm276_vm2, %v604_v16 }
 0x604   :  { %v5556_v32 = vpop.f32.mrf.mxu1 }
 0x606   :  { %v772_v33 = vpop.f32.mrf.mxu1 }
 0x607   :  { %776 = vst.msk [vmem:[#allocation2 + $0x10] sm:$0xff] %vm276_vm2, %v772_v33  ;;  %v6431_v33 = vld [vmem:[%s7060_s7] sm:$0xff] }
 0x608   :  { %v5566_v34 = vpop.f32.mrf.mxu1 }
 0x609   :  { %v6436_v34 = vld [vmem:[%s7060_s7 + $0x8] sm:$0xff] }
 0x60a   :  { %v940_v35 = vpop.f32.mrf.mxu1 }
 0x60b   :  { %944 = vst.msk [vmem:[#allocation2 + $0x18] sm:$0xff] %vm276_vm2, %v940_v35  ;;  %v6441_v35 = vld [vmem:[%s7060_s7 + $0x10] sm:$0xff] }
 0x60c   :  { %v5576_v36 = vpop.f32.mrf.mxu1 }
 0x60d   :  { %v6452_v36 = vld [vmem:[%s7060_s7 + $0x18] sm:$0xff] }
 0x612   :  { %v945_v38 = vld [vmem:[#allocation2] ss:$4 sm:$0xff]  ;;  %v947_v39 = vld [vmem:[#allocation2 + $0x1] ss:$4 sm:$0xff]  ;;  %v1095_v41 = vld [vmem:[#allocation2 + $0x2] ss:$4 sm:$0xff] }
 0x613   :  { %5580 = vmatmul.mubr.msk.f32.vlgmr.msra.gmra.mxu0 %vm276_vm2, %v947_v39  ;;  %5585 = vmatmul.mubr.msk.f32.vlgmr.msra.gmra.mxu1 %vm276_vm2, %v945_v38  ;;  %v1171_v42 = vld [vmem:[#allocation2 + $0x3] ss:$4 sm:$0xff] }
 0x614   :  { %5588 = vmatpush3.msra.mxu0 %v6316_v37  ;;  %5589 = vmatprep.mubr.msk.f32.mxu0 %vm6060_vm0, %v7067_v1 }
 0x615   :  { %5593 = vmatpush3.msra.mxu1 %v6321_v40  ;;  %5594 = vmatprep.mubr.msk.f32.mxu1 %vm6060_vm0, %v7067_v1 }
 0x616   :  { %5608 = vmatprep.subr.mxu1 %v7067_v1  ;;  %5597 = vmatprep.subr.mxu0 %v7067_v1 }
 0x617   :  { %5590 = vmatmul.mubr.msk.f32.vlgmr.msra.gmra.mxu0 %vm276_vm2, %v1095_v41  ;;  %5595 = vmatmul.mubr.msk.f32.vlgmr.msra.gmra.mxu1 %vm276_vm2, %v1171_v42 }
 0x618   :  { %5616 = vmatprep.mubr.msk.f32.mxu1 %vm6060_vm0, %v7067_v1  ;;  %5605 = vmatprep.mubr.msk.f32.mxu0 %vm6060_vm0, %v7067_v1 }
 0x619   :  { %5609 = vmatpush3.msra.mxu1 %v6345_v61  ;;  %5598 = vmatpush3.msra.mxu0 %v6359_v62 }
 0x61a   :  { %5610 = vmatprep.subr.mxu1 %v7067_v1  ;;  %5599 = vmatprep.subr.mxu0 %v7067_v1 }
 0x61b   :  { %5600 = vmatpush3.msra.mxu0 %v6371_v10 }
 0x61c   :  { %5601 = vmatprep.subr.mxu0 %v7067_v1 }
 0x61d   :  { %5602 = vmatpush3.msra.mxu0 %v6386_v14 }
 0x61e   :  { %5603 = vmatprep.subr.mxu0 %v7067_v1 }
 0x61f   :  { %5604 = vmatpush3.msra.mxu0 %v6395_v15 }
 0x620   :  { %5619 = vmatprep.subr.msk.mxu0 %vm102_vm1, %v101_v12 }
 0x6d3   :  { %v1017_v43 = vpop.f32.mrf.mxu0  ;;  %v1090_v44 = vpop.f32.mrf.mxu1 }
 0x6d4   :  { %v1091_v47 = vadd.f32 %v1090_v44, %v1017_v43 }
 0x6d5   :  { %v5581_v45 = vpop.f32.mrf.mxu0  ;;  %v5586_v46 = vpop.f32.mrf.mxu1 }
 0x6d7   :  { %v1165_v48 = vpop.f32.mrf.mxu0  ;;  %v1241_v49 = vpop.f32.mrf.mxu1 }
 0x6d8   :  { %v1169_v50 = vadd.f32 %v1165_v48, %v1091_v47 }
 0x6d9   :  { %v5591_v51 = vpop.f32.mrf.mxu0  ;;  %v5596_v52 = vpop.f32.mrf.mxu1 }
 0x6da   :  { %v1245_v53 = vadd.f32 %v1241_v49, %v1169_v50 }
 0x6dc   :  { %v1246_v54 = vadd.f32 %v1245_v53, %v6175_v5  ;;  %v6352_v5 = vld [vmem:[%s7059_s6 + $0x10] sm:$0xff] }
 0x6dd   :  { %5611 = vmatpush3.msra.mxu1 %v6352_v5 }
 0x6de   :  { %v1247_v55 = vsel %vm102_vm1, %v1246_v54, 0.0  ;;  %5612 = vmatprep.subr.mxu1 %v7067_v1 }
 0x6df   :  { %1248 = vadd.xlane.f32.xlu0 %v1247_v55  ;;  %5613 = vmatpush3.msra.mxu1 %v6364_v63 }
 0x6e0   :  { %5614 = vmatprep.subr.mxu1 %v7067_v1 }
 0x6e1   :  { %5615 = vmatpush3.msra.mxu1 %v6376_v11 }
 0x6e2   :  { %5617 = vmatmul.mubr.msk.f32.vlgmr.msra.gmra.mxu1 %vm102_vm1, %v101_v12  ;;  %5627 = vmatprep.subr.mxu1 %v7067_v1 }
 0x6e3   :  { %5629 = vmatprep.mubr.msk.f32.mxu1 %vm6060_vm0, %v7067_v1 }
 0x768   :  { %v1249_v56 = vpop.xlane.xlu0 %1248 }
 0x769   :  { %v1251_v57 = vmul.f32 0.03125, %v1249_v56 }
 0x76b   :  { %v1252_v58 = vsub.f32 %v1246_v54, %v1251_v57 }
 0x76d   :  { %v1253_v59 = vmul.f32 %v1252_v58, %v1252_v58 }
 0x76f   :  { %v1254_v60 = vsel %vm102_vm1, %v1253_v59, 0.0 }
 0x770   :  { %1255 = vadd.xlane.f32.xlu1 %v1254_v60 }
 0x7a2   :  { %v1413_v16 = vpop.f32.mrf.mxu1 }
 0x7a3   :  { %1681 = vrot.lane.b32.xlu0 %v1413_v16, %s6063_s27  ;;  %5628 = vmatpush3.xpose.msk.msra.mxu1 %vm276_vm2, %v1413_v16 }
 0x7a4   :  { %v5618_v32 = vpop.f32.mrf.mxu1  ;;  %5632 = vmatprep.subr.mxu1 %v7067_v1 }
 0x7f9   :  { %v1256_v18 = vpop.xlane.xlu1 %1255 }
 0x7fa   :  { %v1257_v20 = vmul.f32 0.03125, %v1256_v18 }
 0x7fc   :  { %v1258_v22 = vadd.f32 1e-05, %v1257_v20 }
 0x7fe   :  { %5976 = vrsqrt.f32 %v1258_v22 }
 0x80b   :  { %v5977_v27 = vpop.eup %5976 }
 0x80c   :  { %v1260_v28 = vmul.f32 %v5977_v27, %v1252_v58 }
 0x80e   :  { %v1265_v30 = vmul.f32 %v6412_v26, %v1260_v28 }
 0x810   :  { %v6419_v31 = vadd.f32 %v6415_v29, %v1265_v30 }
 0x812   :  { %5606 = vmatmul.mubr.msk.f32.vlgmr.msra.gmra.mxu0 %vm102_vm1, %v6419_v31 }
 0x813   :  { %5620 = vmatpush3.xpose.msk.msra.mxu0 %vm102_vm1, %v101_v12  ;;  %5621 = vmatprep.mubr.msk.f32.mxu0 %vm102_vm1, %v6431_v33 }
 0x814   :  { %5637 = vmatprep.subr.mxu0 %v7067_v1 }
 0x815   :  { %v1682_v38 = vpop.permute.xlu0 %1681 }
 0x816   :  { %5622 = vmatmul.mubr.msk.f32.vlgmr.msra.gmra.mxu0 %vm102_vm1, %v6436_v34 }
 0x817   :  { %5624 = vmatprep.mubr.msk.f32.mxu0 %vm102_vm1, %v6441_v35  ;;  %5638 = vmatpush3.xpose.msk.msra.mxu0 %vm276_vm2, %v1682_v38 }
 0x818   :  { %5647 = vmatprep.subr.mxu0 %v7067_v1 }
 0x81a   :  { %5625 = vmatmul.mubr.msk.f32.gmra.mxu0 %vm102_vm1, %v6452_v36 }
 0x81b   :  { %5639 = vmatprep.mubr.msk.f32.mxu0 %vm6060_vm0, %v7067_v1 }
 0x8d2   :  { %v1340_v39 = vpop.f32.mrf.mxu0 }
 0x8d3   :  { %1846 = vrot.lane.b32.xlu0 %v1340_v39, %s6066_s29  ;;  %1679 = vrot.lane.b32.xlu1 %v1340_v39, %s6063_s27 }
 0x8d4   :  { %5630 = vmatmul.mubr.msk.f32.vlgmr.msra.gmra.mxu1 %vm276_vm2, %v1340_v39  ;;  %v5607_v41 = vpop.f32.mrf.mxu0 }
 0x8d5   :  { %5634 = vmatprep.mubr.msk.f32.mxu1 %vm6060_vm0, %v7067_v1 }
 0x8d6   :  { %v6482_v51 = vpop.f32.mrf.mxu0 }
 0x8d7   :  { %2013 = vrot.lane.b32.xlu0 %v1340_v39, %s6065_s3  ;;  %1848 = vrot.lane.b32.xlu1 %v1413_v16, %s6066_s29 }
 0x8d8   :  { %v1495_v52 = vpop.f32.mrf.mxu0 }
 0x8da   :  { %v6484_v53 = vpop.f32.mrf.mxu0 }
 0x8db   :  { %2015 = vrot.lane.b32.xlu1 %v1413_v16, %s6065_s3 }
 0x8dc   :  { %v6486_v54 = vpop.f32.mrf.mxu0 }
 0x945   :  { %v1680_v42 = vpop.permute.xlu1 %1679  ;;  %v1847_v44 = vpop.permute.xlu0 %1846 }
 0x946   :  { %5640 = vmatmul.mubr.msk.f32.vlgmr.msra.gmra.mxu0 %vm276_vm2, %v1680_v42 }
 0x947   :  { %5649 = vmatprep.mubr.msk.f32.mxu0 %vm6060_vm0, %v7067_v1 }
 0x949   :  { %v1849_v43 = vpop.permute.xlu1 %1848  ;;  %v2014_v46 = vpop.permute.xlu0 %2013 }
 0x94a   :  { %5648 = vmatpush3.xpose.msk.msra.mxu0 %vm276_vm2, %v1849_v43 }
 0x94b   :  { %5657 = vmatprep.subr.mxu0 %v7067_v1 }
 0x94d   :  { %5650 = vmatmul.mubr.msk.f32.vlgmr.msra.gmra.mxu0 %vm276_vm2, %v1847_v44  ;;  %v2016_v45 = vpop.permute.xlu1 %2015 }
 0x94e   :  { %5658 = vmatpush3.xpose.msk.msra.mxu0 %vm276_vm2, %v2016_v45  ;;  %5659 = vmatprep.mubr.msk.f32.mxu0 %vm6060_vm0, %v7067_v1 }
 0x94f   :  { %5667 = vmatprep.subr.mxu0 %v7067_v1 }
 0x951   :  { %5660 = vmatmul.mubr.msk.f32.vlgmr.msra.gmra.mxu0 %vm276_vm2, %v2014_v46 }
 0x952   :  { %5669 = vmatprep.mubr.msk.f32.mxu0 %vm6060_vm0, %v7067_v1 }
 0x994   :  { %v1586_v47 = vpop.f32.mrf.mxu1 }
 0x995   :  { %v1590_v48 = vmul.f32 0.35355338, %v1586_v47 }
 0x996   :  { %v5631_v49 = vpop.f32.mrf.mxu1 }
 0x997   :  { %v1591_v50 = vsel %vm276_vm2, %v1590_v48, -inf }
 0x998   :  { %1592 = vmax.xlane.f32.xlu1 %v1591_v50 }
 0xa06   :  { %v1753_v55 = vpop.f32.mrf.mxu0 }
 0xa07   :  { %v1757_v56 = vmul.f32 0.35355338, %v1753_v55 }
 0xa08   :  { %v5641_v57 = vpop.f32.mrf.mxu0 }
 0xa09   :  { %v1758_v58 = vsel %vm276_vm2, %v1757_v56, -inf }
 0xa0a   :  { %1759 = vmax.xlane.f32.xlu0 %v1758_v58 }
 0xa0d   :  { %v1920_v59 = vpop.f32.mrf.mxu0 }
 0xa0e   :  { %v1924_v60 = vmul.f32 0.35355338, %v1920_v59 }
 0xa0f   :  { %v5651_v12 = vpop.f32.mrf.mxu0 }
 0xa10   :  { %v1925_v18 = vsel %vm276_vm2, %v1924_v60, -inf }
 0xa11   :  { %1926 = vmax.xlane.f32.xlu0 %v1925_v18  ;;  %v2087_v20 = vpop.f32.mrf.mxu0 }
 0xa12   :  { %v2091_v22 = vmul.f32 0.35355338, %v2087_v20 }
 0xa13   :  { %v5661_v23 = vpop.f32.mrf.mxu0 }
 0xa14   :  { %v2092_v25 = vsel %vm276_vm2, %v2091_v22, -inf }
 0xa15   :  { %2093 = vmax.xlane.f32.xlu1 %v2092_v25 }
 0xa21   :  { %v1593_v27 = vpop.xlane.xlu1 %1592 }
 0xa22   :  { %v1594_v28 = vsub.f32 %v1590_v48, %v1593_v27 }
 0xa24   :  { %v1595_v30 = vmul.f32 1.442695, %v1594_v28 }
 0xa26   :  { %5978 = vpow2.f32 %v1595_v30 }
 0xa33   :  { %v5979_v16 = vpop.eup %5978 }
 0xa34   :  { %v1597_v32 = vsel %vm276_vm2, %v5979_v16, 0.0 }
 0xa35   :  { %1598 = vadd.xlane.f32.xlu0 %v1597_v32 }
 0xa93   :  { %v1760_v38 = vpop.xlane.xlu0 %1759 }
 0xa94   :  { %v1761_v39 = vsub.f32 %v1757_v56, %v1760_v38 }
 0xa96   :  { %v1762_v41 = vmul.f32 1.442695, %v1761_v39 }
 0xa98   :  { %5980 = vpow2.f32 %v1762_v41 }
 0xa9a   :  { %v1927_v42 = vpop.xlane.xlu0 %1926 }
 0xa9b   :  { %v1928_v43 = vsub.f32 %v1924_v60, %v1927_v42 }
 0xa9d   :  { %v1929_v44 = vmul.f32 1.442695, %v1928_v43  ;;  %v6539_v43 = vld [vmem:[%s7061_s8 + $0x10] sm:$0xff] }
 0xa9e   :  { %v2094_v45 = vpop.xlane.xlu1 %2093 }
 0xa9f   :  { %5982 = vpow2.f32 %v1929_v44  ;;  %v2095_v46 = vsub.f32 %v2091_v22, %v2094_v45 }
 0xaa1   :  { %v2096_v47 = vmul.f32 1.442695, %v2095_v46  ;;  %v6544_v46 = vld [vmem:[%s7061_s8 + $0x18] sm:$0xff] }
 0xaa3   :  { %5984 = vpow2.f32 %v2096_v47 }
 0xaa5   :  { %v5981_v49 = vpop.eup %5980 }
 0xaa6   :  { %v1764_v48 = vsel %vm276_vm2, %v5981_v49, 0.0 }
 0xaa7   :  { %1765 = vadd.xlane.f32.xlu1 %v1764_v48 }
 0xaac   :  { %v5983_v50 = vpop.eup %5982 }
 0xaad   :  { %v1931_v55 = vsel %vm276_vm2, %v5983_v50, 0.0 }
 0xaae   :  { %1932 = vadd.xlane.f32.xlu0 %v1931_v55 }
 0xab0   :  { %v5985_v57 = vpop.eup %5984 }
 0xab1   :  { %v2098_v56 = vsel %vm276_vm2, %v5985_v57, 0.0 }
 0xab2   :  { %2099 = vadd.xlane.f32.xlu1 %v2098_v56 }
 0xabe   :  { %v1599_v58 = vpop.xlane.xlu0 %1598 }
 0xabf   :  { %5986 = vrcp.f32 %v1599_v58 }
 0xacc   :  { %v5987_v59 = vpop.eup %5986 }
 0xacd   :  { %v1601_v60 = vmul.f32 %v5987_v59, %v5979_v16 }
 0xacf   :  { %5633 = vmatpush3.xpose.msk.msra.mxu1 %vm276_vm2, %v1601_v60 }
 0xad0   :  { %5642 = vmatprep.subr.mxu1 %v7067_v1 }
 0xad2   :  { %5635 = vmatmul.mubr.msk.f32.vlgmr.msra.gmra.mxu1 %vm276_vm2, %v1495_v52 }
 0xad3   :  { %5644 = vmatprep.mubr.msk.f32.mxu1 %vm6060_vm0, %v7067_v1 }
 0xb30   :  { %v1766_v12 = vpop.xlane.xlu1 %1765 }
 0xb31   :  { %5988 = vrcp.f32 %v1766_v12 }
 0xb37   :  { %v1933_v18 = vpop.xlane.xlu0 %1932 }
 0xb38   :  { %5990 = vrcp.f32 %v1933_v18 }
 0xb3b   :  { %v2100_v20 = vpop.xlane.xlu1 %2099 }
 0xb3c   :  { %5992 = vrcp.f32 %v2100_v20 }
 0xb3e   :  { %v5989_v22 = vpop.eup %5988 }
 0xb3f   :  { %v1768_v23 = vmul.f32 %v5989_v22, %v5981_v49 }
 0xb41   :  { %5643 = vmatpush3.xpose.msk.msra.mxu1 %vm276_vm2, %v1768_v23 }
 0xb42   :  { %5652 = vmatprep.subr.mxu1 %v7067_v1 }
 0xb44   :  { %5645 = vmatmul.mubr.msk.f32.vlgmr.msra.gmra.mxu1 %vm276_vm2, %v6482_v51  ;;  %v6521_v51 = vld [vmem:[%s7061_s8 + $0x8] sm:$0xff] }
 0xb45   :  { %v5991_v25 = vpop.eup %5990  ;;  %5654 = vmatprep.mubr.msk.f32.mxu1 %vm6060_vm0, %v7067_v1  ;;  %5668 = vmatpush3.msra.mxu0 %v6521_v51 }
 0xb46   :  { %v1935_v52 = vmul.f32 %v5991_v25, %v5983_v50  ;;  %5677 = vmatprep.subr.mxu0 %v7067_v1 }
 0xb48   :  { %5653 = vmatpush3.xpose.msk.msra.mxu1 %vm276_vm2, %v1935_v52 }
 0xb49   :  { %v5993_v27 = vpop.eup %5992  ;;  %5662 = vmatprep.subr.mxu1 %v7067_v1 }
 0xb4a   :  { %v2102_v28 = vmul.f32 %v5993_v27, %v5985_v57 }
 0xb4b   :  { %5655 = vmatmul.mubr.msk.f32.vlgmr.msra.gmra.mxu1 %vm276_vm2, %v6486_v54  ;;  %v6526_v54 = vld [vmem:[%s7061_s8] sm:$0xff] }
 0xb4c   :  { %5663 = vmatpush3.xpose.msk.msra.mxu1 %vm276_vm2, %v2102_v28  ;;  %5664 = vmatprep.mubr.msk.f32.mxu1 %vm6060_vm0, %v7067_v1 }
 0xb4d   :  { %5672 = vmatprep.subr.mxu1 %v7067_v1 }
 0xb4f   :  { %5665 = vmatmul.mubr.msk.f32.vlgmr.msra.gmra.mxu1 %vm276_vm2, %v6484_v53 }
 0xb50   :  { %5674 = vmatprep.mubr.msk.f32.mxu1 %vm6060_vm0, %v7067_v1  ;;  %5673 = vmatpush3.msra.mxu1 %v6526_v54 }
 0xb51   :  { %5682 = vmatprep.subr.mxu1 %v7067_v1 }
 0xb92   :  { %v1674_v30 = vpop.f32.mrf.mxu1 }
 0xb93   :  { %1678 = vst.msk [vmem:[#allocation2] sm:$0xff] %vm276_vm2, %v1674_v30 }
 0xb94   :  { %v5636_v53 = vpop.f32.mrf.mxu1 }
 0xb95   :  { %v6572_v53 = vld [vmem:[%s7062_s9 + $0x18] sm:$0xff] }
 0xc04   :  { %v1841_v16 = vpop.f32.mrf.mxu1 }
 0xc05   :  { %1845 = vst.msk [vmem:[#allocation2 + $0x8] sm:$0xff] %vm276_vm2, %v1841_v16  ;;  %v6584_v16 = vld [vmem:[%s7062_s9 + $0x8] sm:$0xff] }
 0xc06   :  { %v5646_v32 = vpop.f32.mrf.mxu1 }
 0xc07   :  { %v6591_v32 = vld [vmem:[%s7062_s9] sm:$0xff] }
 0xc0b   :  { %v2008_v38 = vpop.f32.mrf.mxu1 }
 0xc0c   :  { %2012 = vst.msk [vmem:[#allocation2 + $0x10] sm:$0xff] %vm276_vm2, %v2008_v38  ;;  %v6600_v38 = vld [vmem:[%s7064_s11 + $0x78] sm:$0xff] }
 0xc0d   :  { %v5656_v39 = vpop.f32.mrf.mxu1 }
 0xc0e   :  { %v6605_v39 = vld [vmem:[%s7064_s11 + $0x70] sm:$0xff] }
 0xc0f   :  { %v2175_v41 = vpop.f32.mrf.mxu1 }
 0xc10   :  { %2179 = vst.msk [vmem:[#allocation2 + $0x18] sm:$0xff] %vm276_vm2, %v2175_v41  ;;  %v6612_v41 = vld [vmem:[%s7064_s11 + $0x68] sm:$0xff] }
 0xc11   :  { %v5666_v42 = vpop.f32.mrf.mxu1 }
 0xc12   :  { %v6619_v42 = vld [vmem:[%s7064_s11 + $0x60] sm:$0xff] }
 0xc17   :  { %v2181_v44 = vld [vmem:[#allocation2 + $0x1] ss:$4 sm:$0xff]  ;;  %v2180_v45 = vld [vmem:[#allocation2] ss:$4 sm:$0xff]  ;;  %v2328_v47 = vld [vmem:[#allocation2 + $0x2] ss:$4 sm:$0xff] }
 0xc18   :  { %5670 = vmatmul.mubr.msk.f32.vlgmr.msra.gmra.mxu0 %vm276_vm2, %v2181_v44  ;;  %5675 = vmatmul.mubr.msk.f32.vlgmr.msra.gmra.mxu1 %vm276_vm2, %v2180_v45  ;;  %v2403_v49 = vld [vmem:[#allocation2 + $0x3] ss:$4 sm:$0xff] }
 0xc19   :  { %5678 = vmatpush3.msra.mxu0 %v6539_v43  ;;  %5679 = vmatprep.mubr.msk.f32.mxu0 %vm6060_vm0, %v7067_v1  ;;  %v6626_v44 = vld [vmem:[%s7064_s11 + $0x58] sm:$0xff]  ;;  %v6633_v45 = vld [vmem:[%s7064_s11 + $0x50] sm:$0xff] }
 0xc1a   :  { %5683 = vmatpush3.msra.mxu1 %v6544_v46  ;;  %5684 = vmatprep.mubr.msk.f32.mxu1 %vm6060_vm0, %v7067_v1 }
 0xc1b   :  { %5687 = vmatprep.subr.mxu0 %v7067_v1  ;;  %5698 = vmatprep.subr.mxu1 %v7067_v1 }
 0xc1c   :  { %5680 = vmatmul.mubr.msk.f32.vlgmr.msra.gmra.mxu0 %vm276_vm2, %v2328_v47  ;;  %5685 = vmatmul.mubr.msk.f32.vlgmr.msra.gmra.mxu1 %vm276_vm2, %v2403_v49  ;;  %v6640_v47 = vld [vmem:[%s7064_s11 + $0x48] sm:$0xff]  ;;  %v6647_v49 = vld [vmem:[%s7064_s11 + $0x40] sm:$0xff] }
 0xc1d   :  { %5695 = vmatprep.mubr.msk.f32.mxu0 %vm6060_vm0, %v7067_v1  ;;  %5730 = vmatprep.mubr.msk.f32.mxu1 %vm6060_vm0, %v7067_v1 }
 0xc1e   :  { %5688 = vmatpush3.msra.mxu0 %v6572_v53  ;;  %5699 = vmatpush3.msra.mxu1 %v6600_v38 }
 0xc1f   :  { %5689 = vmatprep.subr.mxu0 %v7067_v1  ;;  %5700 = vmatprep.subr.mxu1 %v7067_v1 }
 0xc20   :  { %5701 = vmatpush3.msra.mxu1 %v6605_v39 }
 0xc21   :  { %5702 = vmatprep.subr.mxu1 %v7067_v1 }
 0xc22   :  { %5703 = vmatpush3.msra.mxu1 %v6612_v41 }
 0xc23   :  { %5704 = vmatprep.subr.mxu1 %v7067_v1 }
 0xc24   :  { %5705 = vmatpush3.msra.mxu1 %v6619_v42 }
 0xc25   :  { %5706 = vmatprep.subr.mxu1 %v7067_v1 }
 0xc26   :  { %5707 = vmatpush3.msra.mxu1 %v6626_v44 }
 0xc27   :  { %5708 = vmatprep.subr.mxu1 %v7067_v1 }
 0xc28   :  { %5709 = vmatpush3.msra.mxu1 %v6633_v45 }
 0xc29   :  { %5710 = vmatprep.subr.mxu1 %v7067_v1 }
 0xc2a   :  { %5711 = vmatpush3.msra.mxu1 %v6640_v47 }
 0xc2b   :  { %5712 = vmatprep.subr.mxu1 %v7067_v1 }
 0xc2c   :  { %5713 = vmatpush3.msra.mxu1 %v6647_v49 }
 0xc2d   :  { %5714 = vmatprep.subr.mxu1 %v7067_v1 }
 0xcd8   :  { %v2251_v48 = vpop.f32.mrf.mxu0  ;;  %v2324_v50 = vpop.f32.mrf.mxu1 }
 0xcd9   :  { %v2325_v56 = vadd.f32 %v2324_v50, %v2251_v48  ;;  %v6654_v48 = vld [vmem:[%s7064_s11 + $0x38] sm:$0xff]  ;;  %v6661_v50 = vld [vmem:[%s7064_s11 + $0x30] sm:$0xff] }
 0xcda   :  { %v5671_v55 = vpop.f32.mrf.mxu0  ;;  %v5676_v57 = vpop.f32.mrf.mxu1  ;;  %5715 = vmatpush3.msra.mxu1 %v6654_v48 }
 0xcdb   :  { %5716 = vmatprep.subr.mxu1 %v7067_v1  ;;  %v6668_v55 = vld [vmem:[%s7064_s11 + $0x28] sm:$0xff]  ;;  %v6675_v57 = vld [vmem:[%s7064_s11 + $0x20] sm:$0xff] }
 0xcdc   :  { %v2398_v58 = vpop.f32.mrf.mxu0  ;;  %v2473_v59 = vpop.f32.mrf.mxu1  ;;  %5717 = vmatpush3.msra.mxu1 %v6661_v50 }
 0xcdd   :  { %v2402_v60 = vadd.f32 %v2398_v58, %v2325_v56  ;;  %5718 = vmatprep.subr.mxu1 %v7067_v1  ;;  %v6682_v56 = vld [vmem:[%s7064_s11 + $0x18] sm:$0xff] }
 0xcde   :  { %v5681_v12 = vpop.f32.mrf.mxu0  ;;  %v5686_v18 = vpop.f32.mrf.mxu1  ;;  %5719 = vmatpush3.msra.mxu1 %v6668_v55 }
 0xcdf   :  { %v2477_v20 = vadd.f32 %v2473_v59, %v2402_v60  ;;  %5720 = vmatprep.subr.mxu1 %v7067_v1  ;;  %v2494_v12 = vsub.s32 2, %v6229_v17  ;;  %v2499_v18 = vsub.s32 3, %v6229_v17 }
 0xce0   :  { %5721 = vmatpush3.msra.mxu1 %v6675_v57 }
 0xce1   :  { %v2478_v22 = vadd.f32 %v2477_v20, %v6419_v31  ;;  %v6579_v31 = vld [vmem:[%s7062_s9 + $0x10] sm:$0xff]  ;;  %5722 = vmatprep.subr.mxu1 %v7067_v1  ;;  %v6691_v20 = vrot.slane %v6408_v24, %v2494_v12 }
 0xce2   :  { %5690 = vmatpush3.msra.mxu0 %v6579_v31  ;;  %5723 = vmatpush3.msra.mxu1 %v6682_v56 }
 0xce3   :  { %v2479_v23 = vsel %vm102_vm1, %v2478_v22, 0.0  ;;  %5691 = vmatprep.subr.mxu0 %v7067_v1  ;;  %5724 = vmatprep.subr.mxu1 %v7067_v1  ;;  %7078 = vst [vmem:[#allocation7_spill] sm:$0xff] %v6691_v20 }
 0xce4   :  { %2480 = vadd.xlane.f32.xlu0 %v2479_v23  ;;  %5692 = vmatpush3.msra.mxu0 %v6584_v16 }
 0xce5   :  { %5693 = vmatprep.subr.mxu0 %v7067_v1 }
 0xce6   :  { %5694 = vmatpush3.msra.mxu0 %v6591_v32 }
 0xce7   :  { %5733 = vmatprep.subr.mxu0 %v7067_v1 }
 0xd6d   :  { %v2481_v25 = vpop.xlane.xlu0 %2480 }
 0xd6e   :  { %v2482_v52 = vmul.f32 0.03125, %v2481_v25  ;;  %v6695_v25 = vrot.slane %v6408_v24, %v2499_v18  ;;  %v6713_v24 = vld [vmem:[%s7053_s0 + $0x8] sm:$0xff] }
 0xd70   :  { %v6564_v27 = vsub.f32 %v2478_v22, %v2482_v52  ;;  %7079 = vst [vmem:[#allocation8_spill] sm:$0xff] %v6695_v25 }
 0xd72   :  { %v2484_v28 = vmul.f32 %v6564_v27, %v6564_v27 }
 0xd74   :  { %v2485_v30 = vsel %vm102_vm1, %v2484_v28, 0.0 }
 0xd75   :  { %2486 = vadd.xlane.f32.xlu1 %v2485_v30 }
 0xdfe   :  { %v2487_v58 = vpop.xlane.xlu1 %2486 }
 0xdff   :  { %v2488_v59 = vmul.f32 0.03125, %v2487_v58 }
 0xe01   :  { %v2489_v60 = vadd.f32 1e-05, %v2488_v59 }
 0xe03   :  { %5994 = vrsqrt.f32 %v2489_v60 }
 0xe10   :  { %v5995_v22 = vpop.eup %5994 }
 0xe11   :  { %v2491_v23 = vmul.f32 %v5995_v22, %v6564_v27 }
 0xe13   :  { %v2496_v52 = vmul.f32 %v6691_v20, %v2491_v23 }
 0xe15   :  { %v6699_v28 = vadd.f32 %v6695_v25, %v2496_v52 }
 0xe17   :  { %7080 = vst [vmem:[#allocation9_spill] sm:$0xff] %v6699_v28  ;;  %5696 = vmatmul.mubr.msk.f32.vlgmr.msra.gmra.mxu0 %vm102_vm1, %v6699_v28 }
 0xe18   :  { %5734 = vmatpush3.msra.mxu0 %v6144_v0  ;;  %5741 = vmatprep.mubr.msk.f32.mxu0 %vm6060_vm0, %v7067_v1  ;;  %v6737_v0 = vld [vmem:[%s7064_s11 + $0x10] sm:$0xff] }
 0xe19   :  { %5735 = vmatprep.subr.mxu0 %v7067_v1  ;;  %5725 = vmatpush3.msra.mxu1 %v6737_v0 }
 0xe1a   :  { %5736 = vmatpush3.msra.mxu0 %v6150_v2  ;;  %5726 = vmatprep.subr.mxu1 %v7067_v1  ;;  %v6744_v2 = vld [vmem:[%s7064_s11 + $0x8] sm:$0xff] }
 0xe1b   :  { %5737 = vmatprep.subr.mxu0 %v7067_v1  ;;  %5727 = vmatpush3.msra.mxu1 %v6744_v2 }
 0xe1c   :  { %5738 = vmatpush3.msra.mxu0 %v6160_v3  ;;  %v6750_v3 = vld [vmem:[%s7064_s11] sm:$0xff]  ;;  %5728 = vmatprep.subr.mxu1 %v7067_v1 }
 0xe1d   :  { %5739 = vmatprep.subr.mxu0 %v7067_v1  ;;  %5729 = vmatpush3.msra.mxu1 %v6750_v3 }
 0xe1e   :  { %5740 = vmatpush3.msra.mxu0 %v6169_v4  ;;  %5767 = vmatprep.subr.mxu1 %v7067_v1  ;;  %v6758_v4 = vld [vmem:[%s7063_s10] ss:$0 sm:$0xff] }
 0xe1f   :  { %5742 = vmatmul.mubr.msk.f32.vlgmr.msra.gmra.mxu0 %vm102_vm1, %v6713_v24  ;;  %5744 = vmatprep.subr.msk.mxu0 %vm102_vm1, %v6713_v24  ;;  %7081 = vst [vmem:[#allocation10_spill] sm:$0xff] %v6758_v4 }
 0xe20   :  { %5745 = vmatpush3.xpose.msk.msra.mxu0 %vm102_vm1, %v6713_v24  ;;  %5746 = vmatprep.mubr.msk.f32.mxu0 %vm102_vm1, %v6189_v6 }
 0xe21   :  { %5752 = vmatprep.subr.mxu0 %v7067_v1 }
 0xe23   :  { %5747 = vmatmul.mubr.msk.f32.vlgmr.msra.gmra.mxu0 %vm102_vm1, %v6194_v7 }
 0xe24   :  { %5749 = vmatprep.mubr.msk.f32.mxu0 %vm102_vm1, %v6199_v8 }
 0xe27   :  { %5750 = vmatmul.mubr.msk.f32.gmra.mxu0 %vm102_vm1, %v6210_v9 }
 0xe28   :  { %5754 = vmatprep.mubr.msk.f32.mxu0 %vm6060_vm0, %v7067_v1 }
 0xed7   :  { %v2577_v6 = vpop.f32.mrf.mxu0 }
 0xed8   :  { %v2578_v7 = vadd.f32 %v6758_v4, %v2577_v6 }
 0xed9   :  { %v5697_v8 = vpop.f32.mrf.mxu0 }
 0xeda   :  { %v2581_v9 = vmax.f32 %v2578_v7, 0.0 }
 0xedc   :  { %5731 = vmatmul.mubr.f32.vlgmr.msra.gmra.mxu1 %v2581_v9 }
 0xedd   :  { %5769 = vmatprep.mubr.msk.f32.mxu1 %vm6060_vm0, %v7067_v1 }
 0xedf   :  { %v2754_v27 = vpop.f32.mrf.mxu0 }
 0xee0   :  { %2844 = vrot.lane.b32.xlu0 %v2754_v27, %s6062_s26 }
 0xee1   :  { %v5743_v30 = vpop.f32.mrf.mxu0 }
 0xee3   :  { %v6774_v12 = vpop.f32.mrf.mxu0 }
 0xee4   :  { %3010 = vrot.lane.b32.xlu0 %v2754_v27, %s6063_s27 }
 0xee5   :  { %v2824_v18 = vpop.f32.mrf.mxu0 }
 0xee7   :  { %v6776_v22 = vpop.f32.mrf.mxu0 }
 0xee8   :  { %3180 = vrot.lane.b32.xlu0 %v2754_v27, %s6064_s28 }
 0xee9   :  { %v6778_v23 = vpop.f32.mrf.mxu0 }
 0xeec   :  { %3348 = vrot.lane.b32.xlu0 %v2754_v27, %s6067_s30 }
 0xf52   :  { %v2845_v58 = vpop.permute.xlu0 %2844 }
 0xf53   :  { %5753 = vmatpush3.xpose.msk.msra.mxu0 %vm276_vm2, %v2845_v58 }
 0xf54   :  { %5757 = vmatprep.subr.mxu0 %v7067_v1 }
 0xf56   :  { %5755 = vmatmul.mubr.msk.f32.vlgmr.msra.gmra.mxu0 %vm276_vm2, %v2754_v27  ;;  %v3011_v25 = vpop.permute.xlu0 %3010 }
 0xf57   :  { %5759 = vmatprep.mubr.msk.f32.mxu0 %vm6060_vm0, %v7067_v1 }
 0xf9c   :  { %v6772_v59 = vpop.f32.mrf.mxu1 }
 0xf9d   :  { %7082 = vst [vmem:[#allocation11_spill] sm:$0xff] %v6772_v59 }
 0xf9e   :  { %v5732_v60 = vpop.f32.mrf.mxu1 }
0x1016   :  { %v2916_v52 = vpop.f32.mrf.mxu0 }
0x1017   :  { %v2920_v6 = vmul.f32 0.35355338, %v2916_v52 }
0x1018   :  { %v5756_v7 = vpop.f32.mrf.mxu0 }
0x1019   :  { %v2921_v8 = vsel %vm6234_vm3, %v2920_v6, -1e+30 }
0x101a   :  { %v2922_v9 = vsel %vm276_vm2, %v2921_v8, -inf }
0x101b   :  { %2923 = vmax.xlane.f32.xlu1 %v2922_v9 }
0x10a4   :  { %v2924_v30 = vpop.xlane.xlu1 %2923 }
0x10a5   :  { %v2925_v58 = vsub.f32 %v2921_v8, %v2924_v30  ;;  %v7083_v8 = vmov 0.0  }
0x10a7   :  { %v2926_v1 = vmul.f32 1.442695, %v2925_v58 }
0x10a9   :  { %5996 = vpow2.f32 %v2926_v1 }
0x10b6   :  { %v5997_v60 = vpop.eup %5996 }
0x10b7   :  { %v2928_v4 = vsel %vm276_vm2, %v5997_v60, 0.0 }
0x10b8   :  { %2929 = vadd.xlane.f32.xlu1 %v2928_v4  ;;  %v3181_v4 = vpop.permute.xlu0 %3180 }
0x10bc   :  { %v3349_v9 = vpop.permute.xlu0 %3348 }
0x10c9   :  { %3012 = vrot.lane.b32.xlu1 %v2754_v27, %s6061_s25 }
0x10cd   :  { %3178 = vrot.lane.b32.xlu1 %v2754_v27, %s6066_s29 }
0x10d1   :  { %3346 = vrot.lane.b32.xlu1 %v2754_v27, %s6065_s3 }
0x1141   :  { %v2930_v52 = vpop.xlane.xlu1 %2929 }
0x1142   :  { %5998 = vrcp.f32 %v2930_v52 }
0x1145   :  { %v3013_v1 = vpop.permute.xlu1 %3012 }
0x1149   :  { %v3179_v27 = vpop.permute.xlu1 %3178 }
0x114f   :  { %v5999_v6 = vpop.eup %5998 }
0x1150   :  { %v2932_v7 = vmul.f32 %v5999_v6, %v5997_v60 }
0x1152   :  { %5758 = vmatpush3.xpose.msk.msra.mxu0 %vm276_vm2, %v2932_v7 }
0x1153   :  { %5762 = vmatprep.subr.mxu0 %v7083_v8 }
0x1155   :  { %5760 = vmatmul.mubr.msk.f32.vlgmr.msra.gmra.mxu0 %vm276_vm2, %v2824_v18  ;;  %v3347_v18 = vpop.permute.xlu1 %3346 }
0x1156   :  { %5763 = vmatpush3.xpose.msk.msra.mxu0 %vm276_vm2, %v3013_v1  ;;  %5764 = vmatprep.mubr.msk.f32.mxu0 %vm6060_vm0, %v7083_v8 }
0x1157   :  { %5772 = vmatprep.subr.mxu0 %v7083_v8 }
0x1159   :  { %5765 = vmatmul.mubr.msk.f32.vlgmr.msra.gmra.mxu0 %vm276_vm2, %v3011_v25 }
0x115a   :  { %5773 = vmatpush3.xpose.msk.msra.mxu0 %vm276_vm2, %v3181_v4  ;;  %5774 = vmatprep.mubr.msk.f32.mxu0 %vm6060_vm0, %v7083_v8 }
0x115b   :  { %5782 = vmatprep.subr.mxu0 %v7083_v8 }
0x115d   :  { %5775 = vmatmul.mubr.msk.f32.vlgmr.msra.gmra.mxu0 %vm276_vm2, %v3179_v27 }
0x115e   :  { %5783 = vmatpush3.xpose.msk.msra.mxu0 %vm276_vm2, %v3349_v9  ;;  %5784 = vmatprep.mubr.msk.f32.mxu0 %vm6060_vm0, %v7083_v8 }
0x115f   :  { %5792 = vmatprep.subr.mxu0 %v7083_v8 }
0x1161   :  { %5785 = vmatmul.mubr.msk.f32.vlgmr.msra.gmra.mxu0 %vm276_vm2, %v3347_v18 }
0x1162   :  { %5793 = vmatpush3.msra.mxu0 %v6299_v13  ;;  %5794 = vmatprep.mubr.msk.f32.mxu0 %vm6060_vm0, %v7083_v8 }
0x1163   :  { %5802 = vmatprep.subr.mxu0 %v7083_v8 }
0x1215   :  { %v3005_v25 = vpop.f32.mrf.mxu0 }
0x1216   :  { %3009 = vst.msk [vmem:[#allocation2] sm:$0xff] %vm276_vm2, %v3005_v25 }
0x1217   :  { %v5761_v30 = vpop.f32.mrf.mxu0 }
0x1219   :  { %v3084_v58 = vpop.f32.mrf.mxu0 }
0x121a   :  { %v3088_v60 = vmul.f32 0.35355338, %v3084_v58 }
0x121b   :  { %v5766_v52 = vpop.f32.mrf.mxu0 }
0x121c   :  { %v3089_v6 = vsel %vm6234_vm3, %v3088_v60, -1e+30 }
0x121d   :  { %v3252_v7 = vpop.f32.mrf.mxu0  ;;  %v3090_v1 = vsel %vm276_vm2, %v3089_v6, -inf }
0x121e   :  { %v3256_v4 = vmul.f32 0.35355338, %v3252_v7  ;;  %3091 = vmax.xlane.f32.xlu0 %v3090_v1 }
0x121f   :  { %v5776_v13 = vpop.f32.mrf.mxu0 }
0x1220   :  { %v3257_v27 = vsel %vm6234_vm3, %v3256_v4, -1e+30 }
0x1221   :  { %v3420_v9 = vpop.f32.mrf.mxu0  ;;  %v3258_v18 = vsel %vm276_vm2, %v3257_v27, -inf }
0x1222   :  { %v3424_v25 = vmul.f32 0.35355338, %v3420_v9  ;;  %3259 = vmax.xlane.f32.xlu1 %v3258_v18 }
0x1223   :  { %v5786_v30 = vpop.f32.mrf.mxu0 }
0x1224   :  { %v3425_v58 = vsel %vm6234_vm3, %v3424_v25, -1e+30 }
0x1225   :  { %v3426_v60 = vsel %vm276_vm2, %v3425_v58, -inf }
0x1226   :  { %3427 = vmax.xlane.f32.xlu0 %v3426_v60 }
0x12a7   :  { %v3092_v52 = vpop.xlane.xlu0 %3091 }
0x12a8   :  { %v3093_v20 = vsub.f32 %v3089_v6, %v3092_v52 }
0x12aa   :  { %v3094_v7 = vmul.f32 1.442695, %v3093_v20 }
0x12ab   :  { %v3260_v1 = vpop.xlane.xlu1 %3259 }
0x12ac   :  { %6000 = vpow2.f32 %v3094_v7  ;;  %v3261_v13 = vsub.f32 %v3257_v27, %v3260_v1 }
0x12ae   :  { %v3262_v28 = vmul.f32 1.442695, %v3261_v13 }
0x12af   :  { %v3428_v4 = vpop.xlane.xlu0 %3427 }
0x12b0   :  { %6002 = vpow2.f32 %v3262_v28  ;;  %v3429_v59 = vsub.f32 %v3425_v58, %v3428_v4 }
0x12b2   :  { %v3430_v17 = vmul.f32 1.442695, %v3429_v59 }
0x12b4   :  { %6004 = vpow2.f32 %v3430_v17 }
0x12b9   :  { %v6001_v9 = vpop.eup %6000 }
0x12ba   :  { %v3096_v18 = vsel %vm276_vm2, %v6001_v9, 0.0 }
0x12bb   :  { %3097 = vadd.xlane.f32.xlu0 %v3096_v18 }
0x12bd   :  { %v6003_v21 = vpop.eup %6002 }
0x12be   :  { %v3264_v25 = vsel %vm276_vm2, %v6003_v21, 0.0 }
0x12bf   :  { %3265 = vadd.xlane.f32.xlu1 %v3264_v25 }
0x12c1   :  { %v6005_v30 = vpop.eup %6004 }
0x12c2   :  { %v3432_v20 = vsel %vm276_vm2, %v6005_v30, 0.0 }
0x12c3   :  { %3433 = vadd.xlane.f32.xlu0 %v3432_v20 }
0x1344   :  { %v3098_v6 = vpop.xlane.xlu0 %3097 }
0x1345   :  { %6006 = vrcp.f32 %v3098_v6 }
0x1348   :  { %v3266_v27 = vpop.xlane.xlu1 %3265 }
0x1349   :  { %6008 = vrcp.f32 %v3266_v27 }
0x134c   :  { %v3434_v28 = vpop.xlane.xlu0 %3433 }
0x134d   :  { %6010 = vrcp.f32 %v3434_v28 }
0x1352   :  { %v6007_v59 = vpop.eup %6006 }
0x1353   :  { %v3100_v17 = vmul.f32 %v6007_v59, %v6001_v9 }
0x1355   :  { %5768 = vmatpush3.xpose.msk.msra.mxu1 %vm276_vm2, %v3100_v17 }
0x1356   :  { %v6009_v58 = vpop.eup %6008  ;;  %5777 = vmatprep.subr.mxu1 %v7083_v8 }
0x1357   :  { %v3268_v60 = vmul.f32 %v6009_v58, %v6003_v21  ;;  %v5273_v58 = vld [vmem:[%s7054_s1 + $0x8] sm:$0xff] }
0x1358   :  { %5770 = vmatmul.mubr.msk.f32.vlgmr.msra.gmra.mxu1 %vm276_vm2, %v6774_v12 }
0x1359   :  { %5778 = vmatpush3.xpose.msk.msra.mxu1 %vm276_vm2, %v3268_v60  ;;  %5779 = vmatprep.mubr.msk.f32.mxu1 %vm6060_vm0, %v7083_v8 }
0x135a   :  { %v6011_v52 = vpop.eup %6010  ;;  %5787 = vmatprep.subr.mxu1 %v7083_v8 }
0x135b   :  { %v3436_v7 = vmul.f32 %v6011_v52, %v6005_v30 }
0x135c   :  { %5780 = vmatmul.mubr.msk.f32.vlgmr.msra.gmra.mxu1 %vm276_vm2, %v6778_v23 }
0x135d   :  { %5788 = vmatpush3.xpose.msk.msra.mxu1 %vm276_vm2, %v3436_v7  ;;  %5789 = vmatprep.mubr.msk.f32.mxu1 %vm6060_vm0, %v7083_v8 }
0x135e   :  { %5797 = vmatprep.subr.mxu1 %v7083_v8 }
0x1360   :  { %5790 = vmatmul.mubr.msk.f32.vlgmr.msra.gmra.mxu1 %vm276_vm2, %v6776_v22 }
0x1361   :  { %5798 = vmatpush3.msra.mxu1 %v6304_v19  ;;  %5799 = vmatprep.mubr.msk.f32.mxu1 %vm6060_vm0, %v7083_v8 }
0x1362   :  { %5807 = vmatprep.subr.mxu1 %v7083_v8 }
0x1418   :  { %v3173_v12 = vpop.f32.mrf.mxu1 }
0x1419   :  { %3177 = vst.msk [vmem:[#allocation2 + $0x8] sm:$0xff] %vm276_vm2, %v3173_v12 }
0x141a   :  { %v5771_v23 = vpop.f32.mrf.mxu1 }
0x141c   :  { %v3341_v1 = vpop.f32.mrf.mxu1 }
0x141d   :  { %3345 = vst.msk [vmem:[#allocation2 + $0x10] sm:$0xff] %vm276_vm2, %v3341_v1 }
0x141e   :  { %v5781_v13 = vpop.f32.mrf.mxu1 }
0x1420   :  { %v3509_v4 = vpop.f32.mrf.mxu1 }
0x1421   :  { %3513 = vst.msk [vmem:[#allocation2 + $0x18] sm:$0xff] %vm276_vm2, %v3509_v4 }
0x1422   :  { %v5791_v9 = vpop.f32.mrf.mxu1 }
0x1428   :  { %v3515_v22 = vld [vmem:[#allocation2 + $0x1] ss:$4 sm:$0xff]  ;;  %v3514_v18 = vld [vmem:[#allocation2] ss:$4 sm:$0xff]  ;;  %v3662_v19 = vld [vmem:[#allocation2 + $0x2] ss:$4 sm:$0xff] }
0x1429   :  { %5795 = vmatmul.mubr.msk.f32.vlgmr.msra.gmra.mxu0 %vm276_vm2, %v3515_v22  ;;  %5800 = vmatmul.mubr.msk.f32.vlgmr.msra.gmra.mxu1 %vm276_vm2, %v3514_v18  ;;  %v3737_v21 = vld [vmem:[#allocation2 + $0x3] ss:$4 sm:$0xff] }
0x142a   :  { %5803 = vmatpush3.msra.mxu0 %v6316_v37  ;;  %5804 = vmatprep.mubr.msk.f32.mxu0 %vm6060_vm0, %v7083_v8 }
0x142b   :  { %5808 = vmatpush3.msra.mxu1 %v6321_v40  ;;  %5809 = vmatprep.mubr.msk.f32.mxu1 %vm6060_vm0, %v7083_v8 }
0x142c   :  { %5823 = vmatprep.subr.mxu1 %v7083_v8  ;;  %5812 = vmatprep.subr.mxu0 %v7083_v8 }
0x142d   :  { %5805 = vmatmul.mubr.msk.f32.vlgmr.msra.gmra.mxu0 %vm276_vm2, %v3662_v19  ;;  %5810 = vmatmul.mubr.msk.f32.vlgmr.msra.gmra.mxu1 %vm276_vm2, %v3737_v21 }
0x142e   :  { %5824 = vmatpush3.msra.mxu1 %v6345_v61  ;;  %5831 = vmatprep.mubr.msk.f32.mxu1 %vm6060_vm0, %v7083_v8 }
0x142f   :  { %5825 = vmatprep.subr.mxu1 %v7083_v8  ;;  %5813 = vmatpush3.msra.mxu0 %v6359_v62 }
0x1430   :  { %5826 = vmatpush3.msra.mxu1 %v6352_v5  ;;  %5814 = vmatprep.subr.mxu0 %v7083_v8 }
0x1431   :  { %5827 = vmatprep.subr.mxu1 %v7083_v8  ;;  %5815 = vmatpush3.msra.mxu0 %v6371_v10 }
0x1432   :  { %5828 = vmatpush3.msra.mxu1 %v6364_v63  ;;  %5816 = vmatprep.subr.mxu0 %v7083_v8 }
0x1433   :  { %5829 = vmatprep.subr.mxu1 %v7083_v8  ;;  %5817 = vmatpush3.msra.mxu0 %v6386_v14 }
0x1434   :  { %5830 = vmatpush3.msra.mxu1 %v6376_v11  ;;  %5818 = vmatprep.subr.mxu0 %v7083_v8 }
0x1435   :  { %5819 = vmatpush3.msra.mxu0 %v6395_v15  ;;  %5820 = vmatprep.mubr.msk.f32.mxu0 %vm6060_vm0, %v7083_v8 }
0x1436   :  { %5842 = vmatprep.subr.mxu1 %v7083_v8  ;;  %5832 = vmatmul.mubr.msk.f32.vlgmr.msra.gmra.mxu1 %vm102_vm1, %v5273_v58 }
0x1437   :  { %5834 = vmatprep.subr.msk.mxu0 %vm102_vm1, %v5273_v58  ;;  %5844 = vmatprep.mubr.msk.f32.mxu1 %vm6060_vm0, %v7083_v8 }
0x14e9   :  { %v3585_v37 = vpop.f32.mrf.mxu0  ;;  %v3658_v40 = vpop.f32.mrf.mxu1 }
0x14ea   :  { %v3659_v62 = vadd.f32 %v3658_v40, %v3585_v37 }
0x14eb   :  { %v5796_v61 = vpop.f32.mrf.mxu0  ;;  %v5801_v5 = vpop.f32.mrf.mxu1 }
0x14ed   :  { %v3732_v63 = vpop.f32.mrf.mxu0  ;;  %v3807_v10 = vpop.f32.mrf.mxu1 }
0x14ee   :  { %v3736_v25 = vadd.f32 %v3732_v63, %v3659_v62 }
0x14ef   :  { %v5806_v14 = vpop.f32.mrf.mxu0  ;;  %v5811_v30 = vpop.f32.mrf.mxu1 }
0x14f0   :  { %v3811_v11 = vadd.f32 %v3807_v10, %v3736_v25 }
0x14f2   :  { %v3812_v20 = vadd.f32 %v6713_v24, %v3811_v11 }
0x14f4   :  { %v3813_v15 = vsel %vm102_vm1, %v3812_v20, 0.0 }
0x14f5   :  { %3814 = vadd.xlane.f32.xlu1 %v3813_v15 }
0x157e   :  { %v3815_v6 = vpop.xlane.xlu1 %3814 }
0x157f   :  { %v3816_v27 = vmul.f32 0.03125, %v3815_v6 }
0x1581   :  { %v3817_v28 = vsub.f32 %v3812_v20, %v3816_v27 }
0x1583   :  { %v3818_v59 = vmul.f32 %v3817_v28, %v3817_v28 }
0x1585   :  { %v3819_v17 = vsel %vm102_vm1, %v3818_v59, 0.0 }
0x1586   :  { %3820 = vadd.xlane.f32.xlu0 %v3819_v17 }
0x160f   :  { %v3821_v24 = vpop.xlane.xlu0 %3820 }
0x1610   :  { %v3822_v60 = vmul.f32 0.03125, %v3821_v24 }
0x1612   :  { %v3823_v52 = vadd.f32 1e-05, %v3822_v60 }
0x1614   :  { %6012 = vrsqrt.f32 %v3823_v52 }
0x1621   :  { %v6013_v7 = vpop.eup %6012 }
0x1622   :  { %v3825_v12 = vmul.f32 %v6013_v7, %v3817_v28 }
0x1624   :  { %v3826_v23 = vmul.f32 %v3825_v12, %v6412_v26  ;;  %v3970_v26 = vpop.f32.mrf.mxu1 }
0x1625   :  { %4226 = vrot.lane.b32.xlu1 %v3970_v26, %s6063_s27  ;;  %5843 = vmatpush3.xpose.msk.msra.mxu1 %vm276_vm2, %v3970_v26 }
0x1626   :  { %v6888_v1 = vadd.f32 %v3826_v23, %v6415_v29  ;;  %v5833_v29 = vpop.f32.mrf.mxu1  ;;  %5847 = vmatprep.subr.mxu1 %v7083_v8 }
0x1628   :  { %5821 = vmatmul.mubr.msk.f32.vlgmr.msra.gmra.mxu0 %vm102_vm1, %v6888_v1 }
0x1629   :  { %5835 = vmatpush3.xpose.msk.msra.mxu0 %vm102_vm1, %v5273_v58  ;;  %5836 = vmatprep.mubr.msk.f32.mxu0 %vm102_vm1, %v6431_v33 }
0x162a   :  { %5852 = vmatprep.subr.mxu0 %v7083_v8  ;;  %4393 = vrot.lane.b32.xlu1 %v3970_v26, %s6066_s29 }
0x162c   :  { %5837 = vmatmul.mubr.msk.f32.vlgmr.msra.gmra.mxu0 %vm102_vm1, %v6436_v34 }
0x162d   :  { %5839 = vmatprep.mubr.msk.f32.mxu0 %vm102_vm1, %v6441_v35 }
0x1630   :  { %5840 = vmatmul.mubr.msk.f32.gmra.mxu0 %vm102_vm1, %v6452_v36 }
0x1631   :  { %5854 = vmatprep.mubr.msk.f32.mxu0 %vm6060_vm0, %v7083_v8 }
0x1697   :  { %v4227_v33 = vpop.permute.xlu1 %4226 }
0x1698   :  { %5853 = vmatpush3.xpose.msk.msra.mxu0 %vm276_vm2, %v4227_v33 }
0x1699   :  { %5862 = vmatprep.subr.mxu0 %v7083_v8 }
0x169c   :  { %v4394_v36 = vpop.permute.xlu1 %4393 }
0x16e8   :  { %v3897_v34 = vpop.f32.mrf.mxu0 }
0x16e9   :  { %4391 = vrot.lane.b32.xlu1 %v3897_v34, %s6066_s29  ;;  %4224 = vrot.lane.b32.xlu0 %v3897_v34, %s6063_s27 }
0x16ea   :  { %5845 = vmatmul.mubr.msk.f32.vlgmr.msra.gmra.mxu1 %vm276_vm2, %v3897_v34  ;;  %v5822_v35 = vpop.f32.mrf.mxu0 }
0x16eb   :  { %5849 = vmatprep.mubr.msk.f32.mxu1 %vm6060_vm0, %v7083_v8 }
0x16ec   :  { %v6933_v40 = vpop.f32.mrf.mxu0 }
0x16ed   :  { %4558 = vrot.lane.b32.xlu1 %v3897_v34, %s6065_s3  ;;  %4560 = vrot.lane.b32.xlu0 %v3970_v26, %s6065_s3 }
0x16ee   :  { %v4040_v61 = vpop.f32.mrf.mxu0 }
0x16f0   :  { %v6935_v5 = vpop.f32.mrf.mxu0 }
0x16f2   :  { %v6937_v62 = vpop.f32.mrf.mxu0 }
0x175b   :  { %v4225_v13 = vpop.permute.xlu0 %4224  ;;  %v4392_v4 = vpop.permute.xlu1 %4391 }
0x175c   :  { %5855 = vmatmul.mubr.msk.f32.vlgmr.msra.gmra.mxu0 %vm276_vm2, %v4225_v13 }
0x175d   :  { %5863 = vmatpush3.xpose.msk.msra.mxu0 %vm276_vm2, %v4394_v36  ;;  %5864 = vmatprep.mubr.msk.f32.mxu0 %vm6060_vm0, %v7083_v8 }
0x175e   :  { %5872 = vmatprep.subr.mxu0 %v7083_v8 }
0x175f   :  { %v4561_v9 = vpop.permute.xlu0 %4560  ;;  %v4559_v22 = vpop.permute.xlu1 %4558 }
0x1760   :  { %5865 = vmatmul.mubr.msk.f32.vlgmr.msra.gmra.mxu0 %vm276_vm2, %v4392_v4 }
0x1761   :  { %5873 = vmatpush3.xpose.msk.msra.mxu0 %vm276_vm2, %v4561_v9  ;;  %5874 = vmatprep.mubr.msk.f32.mxu0 %vm6060_vm0, %v7083_v8 }
0x1762   :  { %5882 = vmatprep.subr.mxu0 %v7083_v8 }
0x1764   :  { %5875 = vmatmul.mubr.msk.f32.vlgmr.msra.gmra.mxu0 %vm276_vm2, %v4559_v22 }
0x1765   :  { %5883 = vmatpush3.msra.mxu0 %v6521_v51  ;;  %5884 = vmatprep.mubr.msk.f32.mxu0 %vm6060_vm0, %v7083_v8 }
0x1766   :  { %5892 = vmatprep.subr.mxu0 %v7083_v8 }
0x17aa   :  { %v4131_v18 = vpop.f32.mrf.mxu1 }
0x17ab   :  { %v4135_v19 = vmul.f32 0.35355338, %v4131_v18 }
0x17ac   :  { %v5846_v21 = vpop.f32.mrf.mxu1 }
0x17ad   :  { %v4136_v37 = vsel %vm276_vm2, %v4135_v19, -inf }
0x17ae   :  { %4137 = vmax.xlane.f32.xlu0 %v4136_v37 }
0x181c   :  { %v4298_v63 = vpop.f32.mrf.mxu0 }
0x181d   :  { %v4302_v51 = vmul.f32 0.35355338, %v4298_v63 }
0x181e   :  { %v5856_v10 = vpop.f32.mrf.mxu0 }
0x181f   :  { %v4303_v25 = vsel %vm276_vm2, %v4302_v51, -inf }
0x1820   :  { %4304 = vmax.xlane.f32.xlu1 %v4303_v25  ;;  %v4465_v14 = vpop.f32.mrf.mxu0 }
0x1821   :  { %v4469_v30 = vmul.f32 0.35355338, %v4465_v14 }
0x1822   :  { %v5866_v11 = vpop.f32.mrf.mxu0 }
0x1823   :  { %v4470_v20 = vsel %vm276_vm2, %v4469_v30, -inf }
0x1824   :  { %4471 = vmax.xlane.f32.xlu0 %v4470_v20  ;;  %v4632_v15 = vpop.f32.mrf.mxu0 }
0x1825   :  { %v4636_v6 = vmul.f32 0.35355338, %v4632_v15 }
0x1826   :  { %v5876_v27 = vpop.f32.mrf.mxu0 }
0x1827   :  { %v4637_v28 = vsel %vm276_vm2, %v4636_v6, -inf }
0x1828   :  { %4638 = vmax.xlane.f32.xlu0 %v4637_v28 }
0x1837   :  { %v4138_v59 = vpop.xlane.xlu0 %4137 }
0x1838   :  { %v4139_v17 = vsub.f32 %v4135_v19, %v4138_v59 }
0x183a   :  { %v4140_v58 = vmul.f32 1.442695, %v4139_v17 }
0x183c   :  { %6014 = vpow2.f32 %v4140_v58 }
0x1849   :  { %v6015_v24 = vpop.eup %6014 }
0x184a   :  { %v4142_v60 = vsel %vm276_vm2, %v6015_v24, 0.0 }
0x184b   :  { %4143 = vadd.xlane.f32.xlu1 %v4142_v60 }
0x18a9   :  { %v4305_v52 = vpop.xlane.xlu1 %4304 }
0x18aa   :  { %v4306_v7 = vsub.f32 %v4302_v51, %v4305_v52 }
0x18ac   :  { %v4307_v12 = vmul.f32 1.442695, %v4306_v7 }
0x18ad   :  { %v4472_v23 = vpop.xlane.xlu0 %4471 }
0x18ae   :  { %6016 = vpow2.f32 %v4307_v12  ;;  %v4473_v26 = vsub.f32 %v4469_v30, %v4472_v23 }
0x18b0   :  { %v4474_v29 = vmul.f32 1.442695, %v4473_v26 }
0x18b1   :  { %v4639_v33 = vpop.xlane.xlu0 %4638 }
0x18b2   :  { %6018 = vpow2.f32 %v4474_v29  ;;  %v4640_v34 = vsub.f32 %v4636_v6, %v4639_v33 }
0x18b4   :  { %v4641_v35 = vmul.f32 1.442695, %v4640_v34 }
0x18b6   :  { %6020 = vpow2.f32 %v4641_v35 }
0x18bb   :  { %v6017_v36 = vpop.eup %6016 }
0x18bc   :  { %v4309_v13 = vsel %vm276_vm2, %v6017_v36, 0.0 }
0x18bd   :  { %4310 = vadd.xlane.f32.xlu0 %v4309_v13 }
0x18bf   :  { %v6019_v4 = vpop.eup %6018 }
0x18c0   :  { %v4476_v9 = vsel %vm276_vm2, %v6019_v4, 0.0 }
0x18c1   :  { %4477 = vadd.xlane.f32.xlu1 %v4476_v9 }
0x18c3   :  { %v6021_v22 = vpop.eup %6020 }
0x18c4   :  { %v4643_v18 = vsel %vm276_vm2, %v6021_v22, 0.0 }
0x18c5   :  { %4644 = vadd.xlane.f32.xlu0 %v4643_v18 }
0x18d4   :  { %v4144_v19 = vpop.xlane.xlu1 %4143 }
0x18d5   :  { %6022 = vrcp.f32 %v4144_v19 }
0x18e2   :  { %v6023_v21 = vpop.eup %6022 }
0x18e3   :  { %v4146_v37 = vmul.f32 %v6023_v21, %v6015_v24 }
0x18e5   :  { %5848 = vmatpush3.xpose.msk.msra.mxu1 %vm276_vm2, %v4146_v37  ;;  %v7087_v37 = vld [vmem:[#allocation7_spill] sm:$0xff] }
0x18e6   :  { %5857 = vmatprep.subr.mxu1 %v7083_v8 }
0x18e8   :  { %5850 = vmatmul.mubr.msk.f32.vlgmr.msra.gmra.mxu1 %vm276_vm2, %v4040_v61 }
0x18e9   :  { %5859 = vmatprep.mubr.msk.f32.mxu1 %vm6060_vm0, %v7083_v8 }
0x1946   :  { %v4311_v63 = vpop.xlane.xlu0 %4310 }
0x1947   :  { %6024 = vrcp.f32 %v4311_v63 }
0x194a   :  { %v4478_v51 = vpop.xlane.xlu1 %4477 }
0x194b   :  { %6026 = vrcp.f32 %v4478_v51 }
0x194e   :  { %v4645_v10 = vpop.xlane.xlu0 %4644 }
0x194f   :  { %6028 = vrcp.f32 %v4645_v10 }
0x1954   :  { %v6025_v25 = vpop.eup %6024 }
0x1955   :  { %v4313_v14 = vmul.f32 %v6025_v25, %v6017_v36  ;;  %v7088_v25 = vld [vmem:[#allocation8_spill] sm:$0xff] }
0x1957   :  { %5858 = vmatpush3.xpose.msk.msra.mxu1 %vm276_vm2, %v4313_v14 }
0x1958   :  { %v6027_v30 = vpop.eup %6026  ;;  %5867 = vmatprep.subr.mxu1 %v7083_v8 }
0x1959   :  { %v4480_v11 = vmul.f32 %v6027_v30, %v6019_v4 }
0x195a   :  { %5860 = vmatmul.mubr.msk.f32.vlgmr.msra.gmra.mxu1 %vm276_vm2, %v6933_v40 }
0x195b   :  { %5868 = vmatpush3.xpose.msk.msra.mxu1 %vm276_vm2, %v4480_v11  ;;  %5869 = vmatprep.mubr.msk.f32.mxu1 %vm6060_vm0, %v7083_v8 }
0x195c   :  { %v6029_v61 = vpop.eup %6028  ;;  %5877 = vmatprep.subr.mxu1 %v7083_v8 }
0x195d   :  { %v4647_v20 = vmul.f32 %v6029_v61, %v6021_v22 }
0x195e   :  { %5870 = vmatmul.mubr.msk.f32.vlgmr.msra.gmra.mxu1 %vm276_vm2, %v6937_v62 }
0x195f   :  { %5878 = vmatpush3.xpose.msk.msra.mxu1 %vm276_vm2, %v4647_v20  ;;  %5879 = vmatprep.mubr.msk.f32.mxu1 %vm6060_vm0, %v7083_v8 }
0x1960   :  { %5887 = vmatprep.subr.mxu1 %v7083_v8 }
0x1962   :  { %5880 = vmatmul.mubr.msk.f32.vlgmr.msra.gmra.mxu1 %vm276_vm2, %v6935_v5 }
0x1963   :  { %5888 = vmatpush3.msra.mxu1 %v6526_v54  ;;  %5889 = vmatprep.mubr.msk.f32.mxu1 %vm6060_vm0, %v7083_v8 }
0x1964   :  { %5897 = vmatprep.subr.mxu1 %v7083_v8 }
0x19a8   :  { %v4219_v40 = vpop.f32.mrf.mxu1 }
0x19a9   :  { %4223 = vst.msk [vmem:[#allocation2] sm:$0xff] %vm276_vm2, %v4219_v40 }
0x19aa   :  { %v5851_v62 = vpop.f32.mrf.mxu1 }
0x19ab   :  { %v7089_v62 = vld [vmem:[#allocation10_spill] sm:$0xff] }
0x1a1a   :  { %v4386_v15 = vpop.f32.mrf.mxu1 }
0x1a1b   :  { %4390 = vst.msk [vmem:[#allocation2 + $0x8] sm:$0xff] %vm276_vm2, %v4386_v15 }
0x1a1c   :  { %v5861_v6 = vpop.f32.mrf.mxu1 }
0x1a1e   :  { %v4553_v27 = vpop.f32.mrf.mxu1 }
0x1a1f   :  { %4557 = vst.msk [vmem:[#allocation2 + $0x10] sm:$0xff] %vm276_vm2, %v4553_v27 }
0x1a20   :  { %v5871_v28 = vpop.f32.mrf.mxu1 }
0x1a22   :  { %v4720_v5 = vpop.f32.mrf.mxu1 }
0x1a23   :  { %4724 = vst.msk [vmem:[#allocation2 + $0x18] sm:$0xff] %vm276_vm2, %v4720_v5 }
0x1a24   :  { %v5881_v54 = vpop.f32.mrf.mxu1 }
0x1a2a   :  { %v4726_v59 = vld [vmem:[#allocation2 + $0x1] ss:$4 sm:$0xff]  ;;  %v4725_v17 = vld [vmem:[#allocation2] ss:$4 sm:$0xff]  ;;  %v4873_v58 = vld [vmem:[#allocation2 + $0x2] ss:$4 sm:$0xff] }
0x1a2b   :  { %5885 = vmatmul.mubr.msk.f32.vlgmr.msra.gmra.mxu0 %vm276_vm2, %v4726_v59  ;;  %5890 = vmatmul.mubr.msk.f32.vlgmr.msra.gmra.mxu1 %vm276_vm2, %v4725_v17  ;;  %v4948_v24 = vld [vmem:[#allocation2 + $0x3] ss:$4 sm:$0xff] }
0x1a2c   :  { %5893 = vmatpush3.msra.mxu0 %v6539_v43  ;;  %5894 = vmatprep.mubr.msk.f32.mxu0 %vm6060_vm0, %v7083_v8  ;;  %v7084_v43 = vld [vmem:[#allocation6_spill] sm:$0xff] }
0x1a2d   :  { %5898 = vmatpush3.msra.mxu1 %v6544_v46  ;;  %5899 = vmatprep.mubr.msk.f32.mxu1 %vm6060_vm0, %v7083_v8  ;;  %v2584_v46 = vsub.s32 6, %v7084_v43  ;;  %v2672_v22 = vsub.s32 4, %v7084_v43  ;;  %v2677_v21 = vsub.s32 5, %v7084_v43 }
0x1a2e   :  { %5902 = vmatprep.subr.mxu0 %v7083_v8  ;;  %5913 = vmatprep.subr.mxu1 %v7083_v8 }
0x1a2f   :  { %5895 = vmatmul.mubr.msk.f32.vlgmr.msra.gmra.mxu0 %vm276_vm2, %v4873_v58  ;;  %5900 = vmatmul.mubr.msk.f32.vlgmr.msra.gmra.mxu1 %vm276_vm2, %v4948_v24 }
0x1a30   :  { %5903 = vmatpush3.msra.mxu0 %v6572_v53  ;;  %5910 = vmatprep.mubr.msk.f32.mxu0 %vm6060_vm0, %v7083_v8 }
0x1a31   :  { %5904 = vmatprep.subr.mxu0 %v7083_v8  ;;  %5914 = vmatpush3.msra.mxu1 %v6600_v38  ;;  %v6036_v38 = vld [vmem:[%s7065_s12] sm:$0xff]  ;;  %s6068_s12 = smov [#allocation3]  }
0x1a32   :  { %5905 = vmatpush3.msra.mxu0 %v6579_v31  ;;  %5915 = vmatprep.subr.mxu1 %v7083_v8  ;;  %v2673_v51 = vrot.slane %v6036_v38, %v2672_v22  ;;  %v2678_v11 = vrot.slane %v6036_v38, %v2677_v21  ;;  %s5206_s26 = sshll.u32 %s6068_s12, 4  ;;  %s5207_s26 = int_to_ptr.vmem [resolvable:$true] %s5206_s26 }
0x1a33   :  { %5906 = vmatprep.subr.mxu0 %v7083_v8  ;;  %5916 = vmatpush3.msra.mxu1 %v6605_v39  ;;  %v2585_v39 = vrot.slane %v6036_v38, %v2584_v46  ;;  %s6037_s27 = scalar_lea.vmem %s5207_s26, 256  ;;  %p6042_p1 = scmp.lt.s32.totalorder %s5207_s26, %s5207_s26 }
0x1a34   :  { %5907 = vmatpush3.msra.mxu0 %v6584_v16  ;;  %5917 = vmatprep.subr.mxu1 %v7083_v8  ;;  %p6038_p0 = scmp.ne.s32.totalorder %s5207_s26, %s6037_s27  ;;  %p6043_p2 = scmp.lt.s32.totalorder %s6037_s27, %s6037_s27 }
0x1a35   :  { %5908 = vmatprep.subr.mxu0 %v7083_v8  ;;  %5918 = vmatpush3.msra.mxu1 %v6612_v41 }
0x1a36   :  { %5909 = vmatpush3.msra.mxu0 %v6591_v32  ;;  %5919 = vmatprep.subr.mxu1 %v7083_v8  ;;  %p6044_p3 = por %p6043_p2, %p6042_p1 }
0x1a37   :  { %5920 = vmatpush3.msra.mxu1 %v6619_v42  ;;  %5945 = vmatprep.mubr.msk.f32.mxu1 %vm6060_vm0, %v7083_v8 }
0x1a38   :  { %5921 = vmatprep.subr.mxu1 %v7083_v8  ;;  %p6045_p4 = pnand %p6044_p3, %p6038_p0 }
0x1a39   :  { %5922 = vmatpush3.msra.mxu1 %v6626_v44 }
0x1a3a   :  { %5923 = vmatprep.subr.mxu1 %v7083_v8 }
0x1a3b   :  { %5924 = vmatpush3.msra.mxu1 %v6633_v45 }
0x1a3c   :  { %5925 = vmatprep.subr.mxu1 %v7083_v8 }
0x1a3d   :  { %5926 = vmatpush3.msra.mxu1 %v6640_v47 }
0x1a3e   :  { %5927 = vmatprep.subr.mxu1 %v7083_v8 }
0x1a3f   :  { %5928 = vmatpush3.msra.mxu1 %v6647_v49 }
0x1a40   :  { %5929 = vmatprep.subr.mxu1 %v7083_v8 }
0x1a41   :  { %5930 = vmatpush3.msra.mxu1 %v6654_v48  ;;  %v7085_v48 = vld [vmem:[#allocation11_spill] sm:$0xff] }
0x1a42   :  { %5931 = vmatprep.subr.mxu1 %v7083_v8 }
0x1a43   :  { %5932 = vmatpush3.msra.mxu1 %v6661_v50  ;;  %v2653_v50 = vadd.f32 %v7085_v48, %v2585_v39 }
0x1a44   :  { %5933 = vmatprep.subr.mxu1 %v7083_v8 }
0x1a45   :  { %5934 = vmatpush3.msra.mxu1 %v6668_v55 }
0x1a46   :  { %5935 = vmatprep.subr.mxu1 %v7083_v8 }
0x1a47   :  { %5936 = vmatpush3.msra.mxu1 %v6675_v57 }
0x1a48   :  { %5937 = vmatprep.subr.mxu1 %v7083_v8 }
0x1a49   :  { %5938 = vmatpush3.msra.mxu1 %v6682_v56 }
0x1a4a   :  { %5939 = vmatprep.subr.mxu1 %v7083_v8 }
0x1a4b   :  { %5940 = vmatpush3.msra.mxu1 %v6737_v0  ;;  %v7086_v0 = vld [vmem:[#allocation9_spill] sm:$0xff] }
0x1a4c   :  { %5941 = vmatprep.subr.mxu1 %v7083_v8 }
0x1a4d   :  { %5942 = vmatpush3.msra.mxu1 %v6744_v2  ;;  %v2656_v2 = vadd.f32 %v2653_v50, %v7086_v0 }
0x1a4e   :  { %5943 = vmatprep.subr.mxu1 %v7083_v8 }
0x1a4f   :  { %5944 = vmatpush3.msra.mxu1 %v6750_v3  ;;  %v2657_v3 = vsel %vm102_vm1, %v2656_v2, 0.0 }
0x1aeb   :  { %v4796_v53 = vpop.f32.mrf.mxu0  ;;  %v4869_v31 = vpop.f32.mrf.mxu1 }
0x1aec   :  { %v4870_v41 = vadd.f32 %v4869_v31, %v4796_v53 }
0x1aed   :  { %v5886_v16 = vpop.f32.mrf.mxu0  ;;  %v5891_v32 = vpop.f32.mrf.mxu1 }
0x1aef   :  { %v4943_v42 = vpop.f32.mrf.mxu0  ;;  %v5018_v44 = vpop.f32.mrf.mxu1 }
0x1af0   :  { %v4947_v45 = vadd.f32 %v4943_v42, %v4870_v41 }
0x1af1   :  { %v5896_v47 = vpop.f32.mrf.mxu0  ;;  %v5901_v49 = vpop.f32.mrf.mxu1 }
0x1af2   :  { %v5022_v55 = vadd.f32 %v5018_v44, %v4947_v45 }
0x1af4   :  { %v5023_v57 = vadd.f32 %v5022_v55, %v6888_v1 }
0x1af6   :  { %v5024_v56 = vsel %vm102_vm1, %v5023_v57, 0.0 }
0x1af7   :  { %5025 = vadd.xlane.f32.xlu1 %v5024_v56 }
0x1afb   :  { %2658 = vadd.xlane.f32.xlu1 %v2657_v3 }
0x1b80   :  { %v5026_v8 = vpop.xlane.xlu1 %5025 }
0x1b81   :  { %v5027_v60 = vmul.f32 0.03125, %v5026_v8 }
0x1b83   :  { %v5028_v52 = vsub.f32 %v5023_v57, %v5027_v60 }
0x1b84   :  { %v2659_v7 = vpop.xlane.xlu1 %2658 }
0x1b85   :  { %v2660_v12 = vmul.f32 0.03125, %v2659_v7  ;;  %v5029_v23 = vmul.f32 %v5028_v52, %v5028_v52 }
0x1b87   :  { %v2661_v26 = vsub.f32 %v2656_v2, %v2660_v12  ;;  %v5030_v29 = vsel %vm102_vm1, %v5029_v23, 0.0 }
0x1b88   :  { %5031 = vadd.xlane.f32.xlu0 %v5030_v29 }
0x1b89   :  { %v2662_v33 = vmul.f32 %v2661_v26, %v2661_v26 }
0x1b8b   :  { %v2663_v1 = vsel %vm102_vm1, %v2662_v33, 0.0 }
0x1b8c   :  { %2664 = vadd.xlane.f32.xlu0 %v2663_v1 }
0x1c11   :  { %v5032_v34 = vpop.xlane.xlu0 %5031 }
0x1c12   :  { %v5033_v35 = vmul.f32 0.03125, %v5032_v34 }
0x1c14   :  { %v5034_v36 = vadd.f32 1e-05, %v5033_v35 }
0x1c15   :  { %v2665_v13 = vpop.xlane.xlu0 %2664 }
0x1c16   :  { %6030 = vrsqrt.f32 %v5034_v36  ;;  %v2666_v4 = vmul.f32 0.03125, %v2665_v13 }
0x1c18   :  { %v2667_v9 = vadd.f32 1e-05, %v2666_v4 }
0x1c1a   :  { %6032 = vrsqrt.f32 %v2667_v9 }
0x1c23   :  { %v6031_v18 = vpop.eup %6030 }
0x1c24   :  { %v5036_v19 = vmul.f32 %v6031_v18, %v5028_v52 }
0x1c26   :  { %v5037_v63 = vmul.f32 %v5036_v19, %v7087_v37 }
0x1c27   :  { %v6033_v10 = vpop.eup %6032 }
0x1c28   :  { %v5038_v14 = vadd.f32 %v5037_v63, %v7088_v25  ;;  %v2669_v30 = vmul.f32 %v6033_v10, %v2661_v26 }
0x1c2a   :  { %5911 = vmatmul.mubr.msk.f32.vlgmr.msra.gmra.mxu0 %vm102_vm1, %v5038_v14  ;;  %v2674_v61 = vmul.f32 %v2673_v51, %v2669_v30 }
0x1c2c   :  { %v2679_v20 = vadd.f32 %v2678_v11, %v2674_v61 }
0x1c2e   :  { %2680 = vst.msk [vmem:[#allocation3] sm:$0xff] %vm102_vm1, %v2679_v20 }
0x1cea   :  { %v5108_v40 = vpop.f32.mrf.mxu0 }
0x1ceb   :  { %v5109_v15 = vadd.f32 %v7089_v62, %v5108_v40 }
0x1cec   :  { %v5912_v6 = vpop.f32.mrf.mxu0 }
0x1ced   :  { %v5112_v27 = vmax.f32 %v5109_v15, 0.0 }
0x1cef   :  { %5946 = vmatmul.mubr.f32.vlgmr.msra.gmra.mxu1 %v5112_v27 }
0x1daf   :  { %v5179_v28 = vpop.f32.mrf.mxu1 }
0x1db0   :  { %v5180_v5 = vadd.f32 %v5179_v28, %v2585_v39 }
0x1db1   :  { %v5947_v54 = vpop.f32.mrf.mxu1 }
0x1db2   :  { %v5183_v59 = vadd.f32 %v5180_v5, %v5038_v14 }
0x1db4   :  { %v5184_v17 = vsel %vm102_vm1, %v5183_v59, 0.0 }
0x1db5   :  { %5185 = vadd.xlane.f32.xlu1 %v5184_v17 }
0x1e3e   :  { %v5186_v58 = vpop.xlane.xlu1 %5185 }
0x1e3f   :  { %v5187_v24 = vmul.f32 0.03125, %v5186_v58 }
0x1e41   :  { %v5188_v43 = vsub.f32 %v5183_v59, %v5187_v24 }
0x1e43   :  { %v5189_v46 = vmul.f32 %v5188_v43, %v5188_v43 }
0x1e45   :  { %v5190_v53 = vsel %vm102_vm1, %v5189_v46, 0.0 }
0x1e46   :  { %5191 = vadd.xlane.f32.xlu0 %v5190_v53 }
0x1ecf   :  { %v5192_v31 = vpop.xlane.xlu0 %5191 }
0x1ed0   :  { %v5193_v16 = vmul.f32 0.03125, %v5192_v31 }
0x1ed2   :  { %v5194_v32 = vadd.f32 1e-05, %v5193_v16 }
0x1ed4   :  { %6034 = vrsqrt.f32 %v5194_v32 }
0x1ee1   :  { %v6035_v38 = vpop.eup %6034 }
0x1ee2   :  { %v5196_v41 = vmul.f32 %v6035_v38, %v5188_v43 }
0x1ee4   :  { %v5197_v39 = vmul.f32 %v5196_v41, %v2673_v51 }
0x1ee6   :  { %v5198_v42 = vadd.f32 %v5197_v39, %v2678_v11 }
0x1ee8   :  { %5200 = vst.msk [vmem:[#allocation3 + $0x8] sm:$0xff] %vm102_vm1, %v5198_v42 }
0x1ee9   :  { %6048 = shalt.err (!%p6045_p4)
}
0x1eea   :  { %s6069_s28 = smov 128   ;;  %s6070_s3 = smov 8  }
0x1eeb   :  { %5212 = dma.vmem_to_hbm [thread:$0]  %s5207_s26, 256, %s7066_s13, [#allocation4], %s6069_s28, %s6069_s28, %s6070_s3  }
0x1eec   :  { %6057 = dma.done.wait [#allocation4], 256  }
0x1eed   :  { %6058 = vsyncadd [#allocation4], 4294967040 }
0x1eee   :  { %5216 = vsyncpa [#allocation4], 1 }

</bundles_post_ra>
